<compile_context>
chip_gen: v6e
topology: v6e:2x2x1
jax: 0.10.0
libtpu: 0.0.40
codegen_flags: <defaults>
</compile_context>

<pallas_src>
import jax
import jax.numpy as jnp
from jax.experimental import pallas as pl
from jax.experimental.pallas import tpu as pltpu

LN_EPS = 1e-5
NEG_INF = -1e9

_PARAM_ORDER = (
    "ln1_g", "ln1_b",
    "wq_s", "wk_s", "wv_s", "wo_s", "bo_s",
    "ln2_g", "ln2_b",
    "wq_m", "wk_m", "wv_m", "wo_m", "bo_m",
    "lnc_g", "lnc_b",
    "wq_c", "wk_c", "wv_c", "wo_c", "bo_c",
    "ln3_g", "ln3_b",
    "w1", "b1", "w2", "b2",
)


# ----------------------------- kernel helpers ------------------------------

def _layernorm(x, g, b):
    mu = jnp.mean(x, axis=-1, keepdims=True)
    var = jnp.mean((x - mu) ** 2, axis=-1, keepdims=True)
    return (x - mu) * jax.lax.rsqrt(var + LN_EPS) * g + b


def _gelu_exact(x):
    # nn.GELU() default: exact (erf-based) GELU.
    return 0.5 * x * (1.0 + jax.lax.erf(x * 0.7071067811865476))


def _mha(xq, kv, wq_ref, wk_ref, wv_ref, wo_ref, bo_ref, mask):
    """Multi-head attention with the head axis as a leading batch dim.

    xq: (Nq, D) f32 queries source, kv: (Nk, D) f32 key/value source.
    wq/wk/wv refs: (H, D, hd), wo ref: (H, hd, D), bo ref: (1, D).
    mask: additive (Nq, Nk) f32 mask or None.
    All matmuls use bf16 inputs with f32 accumulation.
    """
    H, D, hd = wq_ref.shape
    Nq = xq.shape[0]
    Nk = kv.shape[0]
    scale = jnp.float32(1.0 / (hd ** 0.5))

    xq_b = jnp.broadcast_to(xq.astype(jnp.bfloat16)[None], (H, Nq, D))
    kv_b = jnp.broadcast_to(kv.astype(jnp.bfloat16)[None], (H, Nk, D))

    q = jnp.einsum("hnd,hdk->hnk", xq_b, wq_ref[...].astype(jnp.bfloat16),
                   preferred_element_type=jnp.float32)
    k = jnp.einsum("hnd,hdk->hnk", kv_b, wk_ref[...].astype(jnp.bfloat16),
                   preferred_element_type=jnp.float32)
    v = jnp.einsum("hnd,hdk->hnk", kv_b, wv_ref[...].astype(jnp.bfloat16),
                   preferred_element_type=jnp.float32)

    s = jnp.einsum("hqd,hkd->hqk", q.astype(jnp.bfloat16),
                   k.astype(jnp.bfloat16),
                   preferred_element_type=jnp.float32) * scale
    if mask is not None:
        s = s + mask[None]

    m = jnp.max(s, axis=-1, keepdims=True)
    p = jnp.exp(s - m)
    l = jnp.sum(p, axis=-1, keepdims=True)
    ctx = jnp.einsum("hqk,hkd->hqd", p.astype(jnp.bfloat16),
                     v.astype(jnp.bfloat16),
                     preferred_element_type=jnp.float32)
    ctx = ctx * pl.reciprocal(l, approx=True)

    o_heads = jnp.einsum("hnk,hkd->hnd", ctx.astype(jnp.bfloat16),
                         wo_ref[...].astype(jnp.bfloat16),
                         preferred_element_type=jnp.float32)
    return jnp.sum(o_heads, axis=0) + bo_ref[...]          # (Nq, D)


# ------------------------------ fused kernel -------------------------------

def tiered_decoder_layer_kernel(
        x_ref, mem_ref, mask_self_ref, mask_multi_ref,
        ln1_g_ref, ln1_b_ref,
        wq_s_ref, wk_s_ref, wv_s_ref, wo_s_ref, bo_s_ref,
        ln2_g_ref, ln2_b_ref,
        wq_m_ref, wk_m_ref, wv_m_ref, wo_m_ref, bo_m_ref,
        lnc_g_ref, lnc_b_ref,
        wq_c_ref, wk_c_ref, wv_c_ref, wo_c_ref, bo_c_ref,
        ln3_g_ref, ln3_b_ref,
        w1_ref, b1_ref, w2_ref, b2_ref,
        o_ref):
    x = x_ref[0].astype(jnp.float32)       # (N, D), N = L*S (one group)
    mem = mem_ref[0].astype(jnp.float32)   # (M, D)
    mask_self = mask_self_ref[...]         # (N, N) additive
    mask_multi = mask_multi_ref[...]       # (N, N) additive

    # --- norm1 + self_attn (per-sequence causal) + residual ---
    xn = _layernorm(x, ln1_g_ref[...], ln1_b_ref[...])
    h = x + _mha(xn, xn, wq_s_ref, wk_s_ref, wv_s_ref, wo_s_ref, bo_s_ref,
                 mask_self)

    # --- norm2 + multihead_attn (group-level causal) + residual ---
    hn = _layernorm(h, ln2_g_ref[...], ln2_b_ref[...])
    h = h + _mha(hn, hn, wq_m_ref, wk_m_ref, wv_m_ref, wo_m_ref, bo_m_ref,
                 mask_multi)

    # --- norm_cross + cross_attn to memory (unmasked) + residual ---
    cn = _layernorm(h, lnc_g_ref[...], lnc_b_ref[...])
    h = h + _mha(cn, mem, wq_c_ref, wk_c_ref, wv_c_ref, wo_c_ref, bo_c_ref,
                 None)

    # --- norm3 + FFN (linear1 -> GELU -> linear2) + residual ---
    fn = _layernorm(h, ln3_g_ref[...], ln3_b_ref[...])
    f = jnp.dot(fn.astype(jnp.bfloat16), w1_ref[...].astype(jnp.bfloat16),
                preferred_element_type=jnp.float32) + b1_ref[...]
    f = _gelu_exact(f)
    f = jnp.dot(f.astype(jnp.bfloat16), w2_ref[...].astype(jnp.bfloat16),
                preferred_element_type=jnp.float32) + b2_ref[...]

    o_ref[0] = (h + f).astype(o_ref.dtype)


# ------------------------------ wrapper ------------------------------------

def _build_masks(L, S):
    N = L * S
    pos = jnp.arange(N)
    causal = pos[None, :] <= pos[:, None]
    same_seq = (pos[:, None] // S) == (pos[None, :] // S)
    mask_multi = jnp.where(causal, 0.0, NEG_INF).astype(jnp.float32)
    mask_self = jnp.where(causal & same_seq, 0.0, NEG_INF).astype(jnp.float32)
    return mask_self, mask_multi


def tiered_transformer_decoder_layer(x, memory, params):
    """x: (B, L, S, D) groups of L padded sequences; memory: (B, M, D)."""
    B, L, S, D = x.shape
    _, M, _ = memory.shape
    N = L * S

    x_flat = x.reshape(B, N, D)
    mask_self, mask_multi = _build_masks(L, S)

    # Matmul weights are fed to the MXU in bf16 (f32 accumulation in-kernel);
    # LayerNorm params and biases stay f32.
    def prep(name, arr):
        if name.startswith(("wq", "wk", "wv", "wo", "w1", "w2")):
            return arr.astype(jnp.bfloat16)
        return arr.astype(jnp.float32)

    weights = [prep(n, params[n]) for n in _PARAM_ORDER]

    # Constant (grid-invariant) operands: whole array resident in VMEM once,
    # no per-step DMA and no double buffering.
    vmem_full = pl.BlockSpec(memory_space=pltpu.MemorySpace.VMEM)

    in_specs = [
        pl.BlockSpec((1, N, D), lambda b: (b, 0, 0)),   # x (one group per step)
        pl.BlockSpec((1, M, D), lambda b: (b, 0, 0)),   # memory
        vmem_full,                                      # mask_self
        vmem_full,                                      # mask_multi
    ] + [vmem_full] * len(weights)

    out = pl.pallas_call(
        tiered_decoder_layer_kernel,
        out_shape=jax.ShapeDtypeStruct((B, N, D), x.dtype),
        grid_spec=pltpu.PrefetchScalarGridSpec(
            num_scalar_prefetch=0,
            grid=(B,),
            in_specs=in_specs,
            out_specs=pl.BlockSpec((1, N, D), lambda b: (b, 0, 0)),
        ),
        compiler_params=pltpu.CompilerParams(
            dimension_semantics=("parallel",),
            vmem_limit_bytes=48 * 1024 * 1024,
        ),
    )(x_flat, memory, mask_self, mask_multi, *weights)

    return out.reshape(B, L, S, D)


# --------------------------- pure-JAX reference -----------------------------

def _ref_attention(xq, kv, wq, wk, wv, wo, bo, mask):
    hd = wq.shape[-1]
    q = jnp.einsum("bnd,hdk->bhnk", xq, wq)
    k = jnp.einsum("bnd,hdk->bhnk", kv, wk)
    v = jnp.einsum("bnd,hdk->bhnk", kv, wv)
    s = jnp.einsum("bhqc,bhkc->bhqk", q, k) / jnp.sqrt(jnp.float32(hd))
    if mask is not None:
        s = s + mask[None, None]
    a = jax.nn.softmax(s, axis=-1)
    ctx = jnp.einsum("bhqk,bhkc->bhqc", a, v)
    return jnp.einsum("bhqc,hcd->bqd", ctx, wo) + bo


def reference_layer(x_flat, memory, p, mask_self, mask_multi):
    def ln(v, g, b):
        mu = v.mean(-1, keepdims=True)
        var = ((v - mu) ** 2).mean(-1, keepdims=True)
        return (v - mu) / jnp.sqrt(var + LN_EPS) * g + b

    h = x_flat
    xn = ln(h, p["ln1_g"], p["ln1_b"])
    h = h + _ref_attention(xn, xn, p["wq_s"], p["wk_s"], p["wv_s"],
                           p["wo_s"], p["bo_s"], mask_self)
    hn = ln(h, p["ln2_g"], p["ln2_b"])
    h = h + _ref_attention(hn, hn, p["wq_m"], p["wk_m"], p["wv_m"],
                           p["wo_m"], p["bo_m"], mask_multi)
    cn = ln(h, p["lnc_g"], p["lnc_b"])
    h = h + _ref_attention(cn, memory, p["wq_c"], p["wk_c"], p["wv_c"],
                           p["wo_c"], p["bo_c"], None)
    fn = ln(h, p["ln3_g"], p["ln3_b"])
    f = fn @ p["w1"] + p["b1"]
    f = 0.5 * f * (1.0 + jax.lax.erf(f / jnp.sqrt(2.0)))
    f = f @ p["w2"] + p["b2"]
    return h + f


# --------------------------------- main -------------------------------------

if __name__ == "__main__":
    B, L, S, D = 2, 2, 8, 128        # 2 groups x 2 sequences x 8 tokens, d_model=128
    H, M = 4, 8                      # 4 heads, memory length 8
    F = 4 * D                        # module default dim_feedforward
    hd = D // H

    keys = iter(jax.random.split(jax.random.PRNGKey(0), 64))

    def w(shape, scale=0.02):
        return (scale * jax.random.normal(next(keys), shape)).astype(jnp.float32)

    def ln_pair():
        g = (1.0 + 0.1 * jax.random.normal(next(keys), (1, D))).astype(jnp.float32)
        b = (0.1 * jax.random.normal(next(keys), (1, D))).astype(jnp.float32)
        return g, b

    def attn_block():
        return dict(wq=w((H, D, hd)), wk=w((H, D, hd)), wv=w((H, D, hd)),
                    wo=w((H, hd, D)), bo=w((1, D)))

    ln1_g, ln1_b = ln_pair()
    ln2_g, ln2_b = ln_pair()
    lnc_g, lnc_b = ln_pair()
    ln3_g, ln3_b = ln_pair()
    s_attn, m_attn, c_attn = attn_block(), attn_block(), attn_block()

    # NOTE: the module zero-inits linear2 (w2/b2); nonzero deterministic values
    # are used here so the FFN path is actually exercised — semantics identical.
    params = {
        "ln1_g": ln1_g, "ln1_b": ln1_b,
        "wq_s": s_attn["wq"], "wk_s": s_attn["wk"], "wv_s": s_attn["wv"],
        "wo_s": s_attn["wo"], "bo_s": s_attn["bo"],
        "ln2_g": ln2_g, "ln2_b": ln2_b,
        "wq_m": m_attn["wq"], "wk_m": m_attn["wk"], "wv_m": m_attn["wv"],
        "wo_m": m_attn["wo"], "bo_m": m_attn["bo"],
        "lnc_g": lnc_g, "lnc_b": lnc_b,
        "wq_c": c_attn["wq"], "wk_c": c_attn["wk"], "wv_c": c_attn["wv"],
        "wo_c": c_attn["wo"], "bo_c": c_attn["bo"],
        "ln3_g": ln3_g, "ln3_b": ln3_b,
        "w1": w((D, F)), "b1": w((1, F)),
        "w2": w((F, D)), "b2": w((1, D)),
    }

    x = jax.random.normal(next(keys), (B, L, S, D), dtype=jnp.float32)
    memory = jax.random.normal(next(keys), (B, M, D), dtype=jnp.float32)

    out = tiered_transformer_decoder_layer(x, memory, params)
    out = jax.block_until_ready(out)
    assert out.shape == (B, L, S, D)

    mask_self, mask_multi = _build_masks(L, S)
    ref = reference_layer(x.reshape(B, L * S, D), memory, params,
                          mask_self, mask_multi).reshape(B, L, S, D)

    err = float(jnp.max(jnp.abs(out - ref)))
    # Loosened tolerance: bf16 matmul inputs + approx-reciprocal softmax norm.
    assert jnp.allclose(out, ref, atol=2e-2, rtol=2e-2), f"max abs err {err}"
    print("KERNEL_OK")
</pallas_src>

<mosaic_0001>
module attributes {stable_mosaic.version = 11 : i64} {
  func.func @tiered_decoder_layer_kernel(%arg0: i32, %arg1: memref<1x16x128xf32, #tpu.memory_space<vmem>>, %arg2: memref<1x8x128xf32, #tpu.memory_space<vmem>>, %arg3: memref<16x16xf32, #tpu.memory_space<vmem>>, %arg4: memref<16x16xf32, #tpu.memory_space<vmem>>, %arg5: memref<1x128xf32, #tpu.memory_space<vmem>>, %arg6: memref<1x128xf32, #tpu.memory_space<vmem>>, %arg7: memref<4x128x32xbf16, #tpu.memory_space<vmem>>, %arg8: memref<4x128x32xbf16, #tpu.memory_space<vmem>>, %arg9: memref<4x128x32xbf16, #tpu.memory_space<vmem>>, %arg10: memref<4x32x128xbf16, #tpu.memory_space<vmem>>, %arg11: memref<1x128xf32, #tpu.memory_space<vmem>>, %arg12: memref<1x128xf32, #tpu.memory_space<vmem>>, %arg13: memref<1x128xf32, #tpu.memory_space<vmem>>, %arg14: memref<4x128x32xbf16, #tpu.memory_space<vmem>>, %arg15: memref<4x128x32xbf16, #tpu.memory_space<vmem>>, %arg16: memref<4x128x32xbf16, #tpu.memory_space<vmem>>, %arg17: memref<4x32x128xbf16, #tpu.memory_space<vmem>>, %arg18: memref<1x128xf32, #tpu.memory_space<vmem>>, %arg19: memref<1x128xf32, #tpu.memory_space<vmem>>, %arg20: memref<1x128xf32, #tpu.memory_space<vmem>>, %arg21: memref<4x128x32xbf16, #tpu.memory_space<vmem>>, %arg22: memref<4x128x32xbf16, #tpu.memory_space<vmem>>, %arg23: memref<4x128x32xbf16, #tpu.memory_space<vmem>>, %arg24: memref<4x32x128xbf16, #tpu.memory_space<vmem>>, %arg25: memref<1x128xf32, #tpu.memory_space<vmem>>, %arg26: memref<1x128xf32, #tpu.memory_space<vmem>>, %arg27: memref<1x128xf32, #tpu.memory_space<vmem>>, %arg28: memref<128x512xbf16, #tpu.memory_space<vmem>>, %arg29: memref<1x512xf32, #tpu.memory_space<vmem>>, %arg30: memref<512x128xbf16, #tpu.memory_space<vmem>>, %arg31: memref<1x128xf32, #tpu.memory_space<vmem>>, %arg32: memref<1x16x128xf32, #tpu.memory_space<vmem>>) attributes {dimension_semantics = [#tpu.dimension_semantics<parallel>], iteration_bounds = array<i64: 2>, scalar_prefetch = 0 : i64, scratch_operands = 0 : i64, tpu.core_type = #tpu.core_type<tc>, window_params = [{transform_indices = @transform_0, window_bounds = array<i64: 1, 16, 128>}, {transform_indices = @transform_1, window_bounds = array<i64: 1, 8, 128>}, {pipeline_mode = #tpu.pipeline_mode<synchronous>, transform_indices = @transform_2, window_bounds = array<i64: 16, 16>}, {pipeline_mode = #tpu.pipeline_mode<synchronous>, transform_indices = @transform_3, window_bounds = array<i64: 16, 16>}, {pipeline_mode = #tpu.pipeline_mode<synchronous>, transform_indices = @transform_4, window_bounds = array<i64: 1, 128>}, {pipeline_mode = #tpu.pipeline_mode<synchronous>, transform_indices = @transform_5, window_bounds = array<i64: 1, 128>}, {pipeline_mode = #tpu.pipeline_mode<synchronous>, transform_indices = @transform_6, window_bounds = array<i64: 4, 128, 32>}, {pipeline_mode = #tpu.pipeline_mode<synchronous>, transform_indices = @transform_7, window_bounds = array<i64: 4, 128, 32>}, {pipeline_mode = #tpu.pipeline_mode<synchronous>, transform_indices = @transform_8, window_bounds = array<i64: 4, 128, 32>}, {pipeline_mode = #tpu.pipeline_mode<synchronous>, transform_indices = @transform_9, window_bounds = array<i64: 4, 32, 128>}, {pipeline_mode = #tpu.pipeline_mode<synchronous>, transform_indices = @transform_10, window_bounds = array<i64: 1, 128>}, {pipeline_mode = #tpu.pipeline_mode<synchronous>, transform_indices = @transform_11, window_bounds = array<i64: 1, 128>}, {pipeline_mode = #tpu.pipeline_mode<synchronous>, transform_indices = @transform_12, window_bounds = array<i64: 1, 128>}, {pipeline_mode = #tpu.pipeline_mode<synchronous>, transform_indices = @transform_13, window_bounds = array<i64: 4, 128, 32>}, {pipeline_mode = #tpu.pipeline_mode<synchronous>, transform_indices = @transform_14, window_bounds = array<i64: 4, 128, 32>}, {pipeline_mode = #tpu.pipeline_mode<synchronous>, transform_indices = @transform_15, window_bounds = array<i64: 4, 128, 32>}, {pipeline_mode = #tpu.pipeline_mode<synchronous>, transform_indices = @transform_16, window_bounds = array<i64: 4, 32, 128>}, {pipeline_mode = #tpu.pipeline_mode<synchronous>, transform_indices = @transform_17, window_bounds = array<i64: 1, 128>}, {pipeline_mode = #tpu.pipeline_mode<synchronous>, transform_indices = @transform_18, window_bounds = array<i64: 1, 128>}, {pipeline_mode = #tpu.pipeline_mode<synchronous>, transform_indices = @transform_19, window_bounds = array<i64: 1, 128>}, {pipeline_mode = #tpu.pipeline_mode<synchronous>, transform_indices = @transform_20, window_bounds = array<i64: 4, 128, 32>}, {pipeline_mode = #tpu.pipeline_mode<synchronous>, transform_indices = @transform_21, window_bounds = array<i64: 4, 128, 32>}, {pipeline_mode = #tpu.pipeline_mode<synchronous>, transform_indices = @transform_22, window_bounds = array<i64: 4, 128, 32>}, {pipeline_mode = #tpu.pipeline_mode<synchronous>, transform_indices = @transform_23, window_bounds = array<i64: 4, 32, 128>}, {pipeline_mode = #tpu.pipeline_mode<synchronous>, transform_indices = @transform_24, window_bounds = array<i64: 1, 128>}, {pipeline_mode = #tpu.pipeline_mode<synchronous>, transform_indices = @transform_25, window_bounds = array<i64: 1, 128>}, {pipeline_mode = #tpu.pipeline_mode<synchronous>, transform_indices = @transform_26, window_bounds = array<i64: 1, 128>}, {pipeline_mode = #tpu.pipeline_mode<synchronous>, transform_indices = @transform_27, window_bounds = array<i64: 128, 512>}, {pipeline_mode = #tpu.pipeline_mode<synchronous>, transform_indices = @transform_28, window_bounds = array<i64: 1, 512>}, {pipeline_mode = #tpu.pipeline_mode<synchronous>, transform_indices = @transform_29, window_bounds = array<i64: 512, 128>}, {pipeline_mode = #tpu.pipeline_mode<synchronous>, transform_indices = @transform_30, window_bounds = array<i64: 1, 128>}, {transform_indices = @transform_31, window_bounds = array<i64: 1, 16, 128>}]} {
    %c0 = arith.constant 0 : index
    %c0_0 = arith.constant 0 : index
    %c0_1 = arith.constant 0 : index
    %0 = vector.load %arg1[%c0, %c0_0, %c0_1] : memref<1x16x128xf32, #tpu.memory_space<vmem>>, vector<1x16x128xf32>
    %1 = vector.shape_cast %0 : vector<1x16x128xf32> to vector<16x128xf32>
    %c0_2 = arith.constant 0 : index
    %c0_3 = arith.constant 0 : index
    %c0_4 = arith.constant 0 : index
    %2 = vector.load %arg2[%c0_2, %c0_3, %c0_4] : memref<1x8x128xf32, #tpu.memory_space<vmem>>, vector<1x8x128xf32>
    %3 = vector.shape_cast %2 : vector<1x8x128xf32> to vector<8x128xf32>
    %c0_5 = arith.constant 0 : index
    %c0_6 = arith.constant 0 : index
    %4 = vector.load %arg3[%c0_5, %c0_6] : memref<16x16xf32, #tpu.memory_space<vmem>>, vector<16x16xf32>
    %c0_7 = arith.constant 0 : index
    %c0_8 = arith.constant 0 : index
    %5 = vector.load %arg4[%c0_7, %c0_8] : memref<16x16xf32, #tpu.memory_space<vmem>>, vector<16x16xf32>
    %c0_9 = arith.constant 0 : index
    %c0_10 = arith.constant 0 : index
    %6 = vector.load %arg5[%c0_9, %c0_10] : memref<1x128xf32, #tpu.memory_space<vmem>>, vector<1x128xf32>
    %c0_11 = arith.constant 0 : index
    %c0_12 = arith.constant 0 : index
    %7 = vector.load %arg6[%c0_11, %c0_12] : memref<1x128xf32, #tpu.memory_space<vmem>>, vector<1x128xf32>
    %cst = arith.constant dense<0.000000e+00> : vector<16xf32>
    %8 = vector.multi_reduction <add>, %1, %cst [1] : vector<16x128xf32> to vector<16xf32>
    %9 = vector.shape_cast %8 : vector<16xf32> to vector<16x1xf32>
    %cst_13 = arith.constant 1.280000e+02 : f32
    %10 = vector.broadcast %cst_13 : f32 to vector<16x1xf32>
    %11 = arith.divf %9, %10 : vector<16x1xf32>
    %12 = vector.broadcast %11 : vector<16x1xf32> to vector<16x128xf32>
    %13 = arith.subf %1, %12 : vector<16x128xf32>
    %14 = arith.mulf %13, %13 : vector<16x128xf32>
    %cst_14 = arith.constant dense<0.000000e+00> : vector<16xf32>
    %15 = vector.multi_reduction <add>, %14, %cst_14 [1] : vector<16x128xf32> to vector<16xf32>
    %16 = vector.shape_cast %15 : vector<16xf32> to vector<16x1xf32>
    %cst_15 = arith.constant 1.280000e+02 : f32
    %17 = vector.broadcast %cst_15 : f32 to vector<16x1xf32>
    %18 = arith.divf %16, %17 : vector<16x1xf32>
    %19 = vector.broadcast %11 : vector<16x1xf32> to vector<16x128xf32>
    %20 = arith.subf %1, %19 : vector<16x128xf32>
    %cst_16 = arith.constant 9.99999974E-6 : f32
    %21 = vector.broadcast %cst_16 : f32 to vector<16x1xf32>
    %22 = arith.addf %18, %21 : vector<16x1xf32>
    %23 = math.rsqrt %22 : vector<16x1xf32>
    %24 = vector.broadcast %23 : vector<16x1xf32> to vector<16x128xf32>
    %25 = arith.mulf %20, %24 : vector<16x128xf32>
    %26 = vector.broadcast %6 : vector<1x128xf32> to vector<16x128xf32>
    %27 = arith.mulf %25, %26 : vector<16x128xf32>
    %28 = vector.broadcast %7 : vector<1x128xf32> to vector<16x128xf32>
    %29 = arith.addf %27, %28 : vector<16x128xf32>
    %30 = arith.truncf %29 : vector<16x128xf32> to vector<16x128xbf16>
    %31 = vector.shape_cast %30 : vector<16x128xbf16> to vector<1x16x128xbf16>
    %32 = vector.shape_cast %31 : vector<1x16x128xbf16> to vector<1x16x128xbf16>
    %33 = vector.broadcast %32 : vector<1x16x128xbf16> to vector<4x16x128xbf16>
    %34 = arith.truncf %29 : vector<16x128xf32> to vector<16x128xbf16>
    %35 = vector.shape_cast %34 : vector<16x128xbf16> to vector<1x16x128xbf16>
    %36 = vector.shape_cast %35 : vector<1x16x128xbf16> to vector<1x16x128xbf16>
    %37 = vector.broadcast %36 : vector<1x16x128xbf16> to vector<4x16x128xbf16>
    %c0_17 = arith.constant 0 : index
    %c0_18 = arith.constant 0 : index
    %c0_19 = arith.constant 0 : index
    %38 = vector.load %arg7[%c0_17, %c0_18, %c0_19] : memref<4x128x32xbf16, #tpu.memory_space<vmem>>, vector<4x128x32xbf16>
    "tpu.trace_start"() <{level = 10 : i32, message = "hnd,hdk->hnk"}> : () -> ()
    %cst_20 = arith.constant dense<0.000000e+00> : vector<4x16x32xf32>
    %39 = tpu.matmul %33, %38, %cst_20 {dimension_numbers = #tpu.dot_dimension_numbers<[2], [1], [1], [2], [0, 0, 0, 1, 1, 2], [0], [0]>} : vector<4x16x128xbf16>, vector<4x128x32xbf16>, vector<4x16x32xf32> -> vector<4x16x32xf32>
    "tpu.trace_stop"() : () -> ()
    %c0_21 = arith.constant 0 : index
    %c0_22 = arith.constant 0 : index
    %c0_23 = arith.constant 0 : index
    %40 = vector.load %arg8[%c0_21, %c0_22, %c0_23] : memref<4x128x32xbf16, #tpu.memory_space<vmem>>, vector<4x128x32xbf16>
    "tpu.trace_start"() <{level = 10 : i32, message = "hnd,hdk->hnk"}> : () -> ()
    %cst_24 = arith.constant dense<0.000000e+00> : vector<4x16x32xf32>
    %41 = tpu.matmul %37, %40, %cst_24 {dimension_numbers = #tpu.dot_dimension_numbers<[2], [1], [1], [2], [0, 0, 0, 1, 1, 2], [0], [0]>} : vector<4x16x128xbf16>, vector<4x128x32xbf16>, vector<4x16x32xf32> -> vector<4x16x32xf32>
    "tpu.trace_stop"() : () -> ()
    %c0_25 = arith.constant 0 : index
    %c0_26 = arith.constant 0 : index
    %c0_27 = arith.constant 0 : index
    %42 = vector.load %arg9[%c0_25, %c0_26, %c0_27] : memref<4x128x32xbf16, #tpu.memory_space<vmem>>, vector<4x128x32xbf16>
    "tpu.trace_start"() <{level = 10 : i32, message = "hnd,hdk->hnk"}> : () -> ()
    %cst_28 = arith.constant dense<0.000000e+00> : vector<4x16x32xf32>
    %43 = tpu.matmul %37, %42, %cst_28 {dimension_numbers = #tpu.dot_dimension_numbers<[2], [1], [1], [2], [0, 0, 0, 1, 1, 2], [0], [0]>} : vector<4x16x128xbf16>, vector<4x128x32xbf16>, vector<4x16x32xf32> -> vector<4x16x32xf32>
    "tpu.trace_stop"() : () -> ()
    %44 = arith.truncf %39 : vector<4x16x32xf32> to vector<4x16x32xbf16>
    %45 = arith.truncf %41 : vector<4x16x32xf32> to vector<4x16x32xbf16>
    "tpu.trace_start"() <{level = 10 : i32, message = "hqd,hkd->hqk"}> : () -> ()
    %cst_29 = arith.constant dense<0.000000e+00> : vector<4x16x16xf32>
    %46 = tpu.matmul %44, %45, %cst_29 {dimension_numbers = #tpu.dot_dimension_numbers<[2], [2], [1], [1], [0, 0, 0, 1, 1, 1], [0], [0]>} : vector<4x16x32xbf16>, vector<4x16x32xbf16>, vector<4x16x16xf32> -> vector<4x16x16xf32>
    "tpu.trace_stop"() : () -> ()
    %cst_30 = arith.constant 0.176776692 : f32
    %47 = vector.broadcast %cst_30 : f32 to vector<4x16x16xf32>
    %48 = arith.mulf %46, %47 : vector<4x16x16xf32>
    %49 = vector.shape_cast %4 : vector<16x16xf32> to vector<1x16x16xf32>
    %50 = vector.broadcast %49 : vector<1x16x16xf32> to vector<4x16x16xf32>
    %51 = arith.addf %48, %50 : vector<4x16x16xf32>
    %cst_31 = arith.constant dense<0xFF800000> : vector<4x16xf32>
    %52 = vector.multi_reduction <maximumf>, %51, %cst_31 [2] : vector<4x16x16xf32> to vector<4x16xf32>
    %53 = vector.shape_cast %52 : vector<4x16xf32> to vector<4x16x1xf32>
    %54 = vector.broadcast %53 : vector<4x16x1xf32> to vector<4x16x16xf32>
    %55 = arith.subf %51, %54 : vector<4x16x16xf32>
    %56 = math.exp %55 : vector<4x16x16xf32>
    %cst_32 = arith.constant dense<0.000000e+00> : vector<4x16xf32>
    %57 = vector.multi_reduction <add>, %56, %cst_32 [2] : vector<4x16x16xf32> to vector<4x16xf32>
    %58 = vector.shape_cast %57 : vector<4x16xf32> to vector<4x16x1xf32>
    %59 = arith.truncf %56 : vector<4x16x16xf32> to vector<4x16x16xbf16>
    %60 = arith.truncf %43 : vector<4x16x32xf32> to vector<4x16x32xbf16>
    "tpu.trace_start"() <{level = 10 : i32, message = "hqk,hkd->hqd"}> : () -> ()
    %cst_33 = arith.constant dense<0.000000e+00> : vector<4x16x32xf32>
    %61 = tpu.matmul %59, %60, %cst_33 {dimension_numbers = #tpu.dot_dimension_numbers<[2], [1], [1], [2], [0, 0, 0, 1, 1, 2], [0], [0]>} : vector<4x16x16xbf16>, vector<4x16x32xbf16>, vector<4x16x32xf32> -> vector<4x16x32xf32>
    "tpu.trace_stop"() : () -> ()
    %62 = tpu.reciprocal %58 {approx = true} : vector<4x16x1xf32> -> vector<4x16x1xf32>
    %63 = vector.broadcast %62 : vector<4x16x1xf32> to vector<4x16x32xf32>
    %64 = arith.mulf %61, %63 : vector<4x16x32xf32>
    %65 = arith.truncf %64 : vector<4x16x32xf32> to vector<4x16x32xbf16>
    %c0_34 = arith.constant 0 : index
    %c0_35 = arith.constant 0 : index
    %c0_36 = arith.constant 0 : index
    %66 = vector.load %arg10[%c0_34, %c0_35, %c0_36] : memref<4x32x128xbf16, #tpu.memory_space<vmem>>, vector<4x32x128xbf16>
    "tpu.trace_start"() <{level = 10 : i32, message = "hnk,hkd->hnd"}> : () -> ()
    %cst_37 = arith.constant dense<0.000000e+00> : vector<4x16x128xf32>
    %67 = tpu.matmul %65, %66, %cst_37 {dimension_numbers = #tpu.dot_dimension_numbers<[2], [1], [1], [2], [0, 0, 0, 1, 1, 2], [0], [0]>} : vector<4x16x32xbf16>, vector<4x32x128xbf16>, vector<4x16x128xf32> -> vector<4x16x128xf32>
    "tpu.trace_stop"() : () -> ()
    %cst_38 = arith.constant dense<0.000000e+00> : vector<16x128xf32>
    %68 = vector.multi_reduction <add>, %67, %cst_38 [0] : vector<4x16x128xf32> to vector<16x128xf32>
    %c0_39 = arith.constant 0 : index
    %c0_40 = arith.constant 0 : index
    %69 = vector.load %arg11[%c0_39, %c0_40] : memref<1x128xf32, #tpu.memory_space<vmem>>, vector<1x128xf32>
    %70 = vector.broadcast %69 : vector<1x128xf32> to vector<16x128xf32>
    %71 = arith.addf %68, %70 : vector<16x128xf32>
    %72 = arith.addf %1, %71 : vector<16x128xf32>
    %c0_41 = arith.constant 0 : index
    %c0_42 = arith.constant 0 : index
    %73 = vector.load %arg12[%c0_41, %c0_42] : memref<1x128xf32, #tpu.memory_space<vmem>>, vector<1x128xf32>
    %c0_43 = arith.constant 0 : index
    %c0_44 = arith.constant 0 : index
    %74 = vector.load %arg13[%c0_43, %c0_44] : memref<1x128xf32, #tpu.memory_space<vmem>>, vector<1x128xf32>
    %cst_45 = arith.constant dense<0.000000e+00> : vector<16xf32>
    %75 = vector.multi_reduction <add>, %72, %cst_45 [1] : vector<16x128xf32> to vector<16xf32>
    %76 = vector.shape_cast %75 : vector<16xf32> to vector<16x1xf32>
    %cst_46 = arith.constant 1.280000e+02 : f32
    %77 = vector.broadcast %cst_46 : f32 to vector<16x1xf32>
    %78 = arith.divf %76, %77 : vector<16x1xf32>
    %79 = vector.broadcast %78 : vector<16x1xf32> to vector<16x128xf32>
    %80 = arith.subf %72, %79 : vector<16x128xf32>
    %81 = arith.mulf %80, %80 : vector<16x128xf32>
    %cst_47 = arith.constant dense<0.000000e+00> : vector<16xf32>
    %82 = vector.multi_reduction <add>, %81, %cst_47 [1] : vector<16x128xf32> to vector<16xf32>
    %83 = vector.shape_cast %82 : vector<16xf32> to vector<16x1xf32>
    %cst_48 = arith.constant 1.280000e+02 : f32
    %84 = vector.broadcast %cst_48 : f32 to vector<16x1xf32>
    %85 = arith.divf %83, %84 : vector<16x1xf32>
    %86 = vector.broadcast %78 : vector<16x1xf32> to vector<16x128xf32>
    %87 = arith.subf %72, %86 : vector<16x128xf32>
    %cst_49 = arith.constant 9.99999974E-6 : f32
    %88 = vector.broadcast %cst_49 : f32 to vector<16x1xf32>
    %89 = arith.addf %85, %88 : vector<16x1xf32>
    %90 = math.rsqrt %89 : vector<16x1xf32>
    %91 = vector.broadcast %90 : vector<16x1xf32> to vector<16x128xf32>
    %92 = arith.mulf %87, %91 : vector<16x128xf32>
    %93 = vector.broadcast %73 : vector<1x128xf32> to vector<16x128xf32>
    %94 = arith.mulf %92, %93 : vector<16x128xf32>
    %95 = vector.broadcast %74 : vector<1x128xf32> to vector<16x128xf32>
    %96 = arith.addf %94, %95 : vector<16x128xf32>
    %97 = arith.truncf %96 : vector<16x128xf32> to vector<16x128xbf16>
    %98 = vector.shape_cast %97 : vector<16x128xbf16> to vector<1x16x128xbf16>
    %99 = vector.shape_cast %98 : vector<1x16x128xbf16> to vector<1x16x128xbf16>
    %100 = vector.broadcast %99 : vector<1x16x128xbf16> to vector<4x16x128xbf16>
    %101 = arith.truncf %96 : vector<16x128xf32> to vector<16x128xbf16>
    %102 = vector.shape_cast %101 : vector<16x128xbf16> to vector<1x16x128xbf16>
    %103 = vector.shape_cast %102 : vector<1x16x128xbf16> to vector<1x16x128xbf16>
    %104 = vector.broadcast %103 : vector<1x16x128xbf16> to vector<4x16x128xbf16>
    %c0_50 = arith.constant 0 : index
    %c0_51 = arith.constant 0 : index
    %c0_52 = arith.constant 0 : index
    %105 = vector.load %arg14[%c0_50, %c0_51, %c0_52] : memref<4x128x32xbf16, #tpu.memory_space<vmem>>, vector<4x128x32xbf16>
    "tpu.trace_start"() <{level = 10 : i32, message = "hnd,hdk->hnk"}> : () -> ()
    %cst_53 = arith.constant dense<0.000000e+00> : vector<4x16x32xf32>
    %106 = tpu.matmul %100, %105, %cst_53 {dimension_numbers = #tpu.dot_dimension_numbers<[2], [1], [1], [2], [0, 0, 0, 1, 1, 2], [0], [0]>} : vector<4x16x128xbf16>, vector<4x128x32xbf16>, vector<4x16x32xf32> -> vector<4x16x32xf32>
    "tpu.trace_stop"() : () -> ()
    %c0_54 = arith.constant 0 : index
    %c0_55 = arith.constant 0 : index
    %c0_56 = arith.constant 0 : index
    %107 = vector.load %arg15[%c0_54, %c0_55, %c0_56] : memref<4x128x32xbf16, #tpu.memory_space<vmem>>, vector<4x128x32xbf16>
    "tpu.trace_start"() <{level = 10 : i32, message = "hnd,hdk->hnk"}> : () -> ()
    %cst_57 = arith.constant dense<0.000000e+00> : vector<4x16x32xf32>
    %108 = tpu.matmul %104, %107, %cst_57 {dimension_numbers = #tpu.dot_dimension_numbers<[2], [1], [1], [2], [0, 0, 0, 1, 1, 2], [0], [0]>} : vector<4x16x128xbf16>, vector<4x128x32xbf16>, vector<4x16x32xf32> -> vector<4x16x32xf32>
    "tpu.trace_stop"() : () -> ()
    %c0_58 = arith.constant 0 : index
    %c0_59 = arith.constant 0 : index
    %c0_60 = arith.constant 0 : index
    %109 = vector.load %arg16[%c0_58, %c0_59, %c0_60] : memref<4x128x32xbf16, #tpu.memory_space<vmem>>, vector<4x128x32xbf16>
    "tpu.trace_start"() <{level = 10 : i32, message = "hnd,hdk->hnk"}> : () -> ()
    %cst_61 = arith.constant dense<0.000000e+00> : vector<4x16x32xf32>
    %110 = tpu.matmul %104, %109, %cst_61 {dimension_numbers = #tpu.dot_dimension_numbers<[2], [1], [1], [2], [0, 0, 0, 1, 1, 2], [0], [0]>} : vector<4x16x128xbf16>, vector<4x128x32xbf16>, vector<4x16x32xf32> -> vector<4x16x32xf32>
    "tpu.trace_stop"() : () -> ()
    %111 = arith.truncf %106 : vector<4x16x32xf32> to vector<4x16x32xbf16>
    %112 = arith.truncf %108 : vector<4x16x32xf32> to vector<4x16x32xbf16>
    "tpu.trace_start"() <{level = 10 : i32, message = "hqd,hkd->hqk"}> : () -> ()
    %cst_62 = arith.constant dense<0.000000e+00> : vector<4x16x16xf32>
    %113 = tpu.matmul %111, %112, %cst_62 {dimension_numbers = #tpu.dot_dimension_numbers<[2], [2], [1], [1], [0, 0, 0, 1, 1, 1], [0], [0]>} : vector<4x16x32xbf16>, vector<4x16x32xbf16>, vector<4x16x16xf32> -> vector<4x16x16xf32>
    "tpu.trace_stop"() : () -> ()
    %cst_63 = arith.constant 0.176776692 : f32
    %114 = vector.broadcast %cst_63 : f32 to vector<4x16x16xf32>
    %115 = arith.mulf %113, %114 : vector<4x16x16xf32>
    %116 = vector.shape_cast %5 : vector<16x16xf32> to vector<1x16x16xf32>
    %117 = vector.broadcast %116 : vector<1x16x16xf32> to vector<4x16x16xf32>
    %118 = arith.addf %115, %117 : vector<4x16x16xf32>
    %cst_64 = arith.constant dense<0xFF800000> : vector<4x16xf32>
    %119 = vector.multi_reduction <maximumf>, %118, %cst_64 [2] : vector<4x16x16xf32> to vector<4x16xf32>
    %120 = vector.shape_cast %119 : vector<4x16xf32> to vector<4x16x1xf32>
    %121 = vector.broadcast %120 : vector<4x16x1xf32> to vector<4x16x16xf32>
    %122 = arith.subf %118, %121 : vector<4x16x16xf32>
    %123 = math.exp %122 : vector<4x16x16xf32>
    %cst_65 = arith.constant dense<0.000000e+00> : vector<4x16xf32>
    %124 = vector.multi_reduction <add>, %123, %cst_65 [2] : vector<4x16x16xf32> to vector<4x16xf32>
    %125 = vector.shape_cast %124 : vector<4x16xf32> to vector<4x16x1xf32>
    %126 = arith.truncf %123 : vector<4x16x16xf32> to vector<4x16x16xbf16>
    %127 = arith.truncf %110 : vector<4x16x32xf32> to vector<4x16x32xbf16>
    "tpu.trace_start"() <{level = 10 : i32, message = "hqk,hkd->hqd"}> : () -> ()
    %cst_66 = arith.constant dense<0.000000e+00> : vector<4x16x32xf32>
    %128 = tpu.matmul %126, %127, %cst_66 {dimension_numbers = #tpu.dot_dimension_numbers<[2], [1], [1], [2], [0, 0, 0, 1, 1, 2], [0], [0]>} : vector<4x16x16xbf16>, vector<4x16x32xbf16>, vector<4x16x32xf32> -> vector<4x16x32xf32>
    "tpu.trace_stop"() : () -> ()
    %129 = tpu.reciprocal %125 {approx = true} : vector<4x16x1xf32> -> vector<4x16x1xf32>
    %130 = vector.broadcast %129 : vector<4x16x1xf32> to vector<4x16x32xf32>
    %131 = arith.mulf %128, %130 : vector<4x16x32xf32>
    %132 = arith.truncf %131 : vector<4x16x32xf32> to vector<4x16x32xbf16>
    %c0_67 = arith.constant 0 : index
    %c0_68 = arith.constant 0 : index
    %c0_69 = arith.constant 0 : index
    %133 = vector.load %arg17[%c0_67, %c0_68, %c0_69] : memref<4x32x128xbf16, #tpu.memory_space<vmem>>, vector<4x32x128xbf16>
    "tpu.trace_start"() <{level = 10 : i32, message = "hnk,hkd->hnd"}> : () -> ()
    %cst_70 = arith.constant dense<0.000000e+00> : vector<4x16x128xf32>
    %134 = tpu.matmul %132, %133, %cst_70 {dimension_numbers = #tpu.dot_dimension_numbers<[2], [1], [1], [2], [0, 0, 0, 1, 1, 2], [0], [0]>} : vector<4x16x32xbf16>, vector<4x32x128xbf16>, vector<4x16x128xf32> -> vector<4x16x128xf32>
    "tpu.trace_stop"() : () -> ()
    %cst_71 = arith.constant dense<0.000000e+00> : vector<16x128xf32>
    %135 = vector.multi_reduction <add>, %134, %cst_71 [0] : vector<4x16x128xf32> to vector<16x128xf32>
    %c0_72 = arith.constant 0 : index
    %c0_73 = arith.constant 0 : index
    %136 = vector.load %arg18[%c0_72, %c0_73] : memref<1x128xf32, #tpu.memory_space<vmem>>, vector<1x128xf32>
    %137 = vector.broadcast %136 : vector<1x128xf32> to vector<16x128xf32>
    %138 = arith.addf %135, %137 : vector<16x128xf32>
    %139 = arith.addf %72, %138 : vector<16x128xf32>
    %c0_74 = arith.constant 0 : index
    %c0_75 = arith.constant 0 : index
    %140 = vector.load %arg19[%c0_74, %c0_75] : memref<1x128xf32, #tpu.memory_space<vmem>>, vector<1x128xf32>
    %c0_76 = arith.constant 0 : index
    %c0_77 = arith.constant 0 : index
    %141 = vector.load %arg20[%c0_76, %c0_77] : memref<1x128xf32, #tpu.memory_space<vmem>>, vector<1x128xf32>
    %cst_78 = arith.constant dense<0.000000e+00> : vector<16xf32>
    %142 = vector.multi_reduction <add>, %139, %cst_78 [1] : vector<16x128xf32> to vector<16xf32>
    %143 = vector.shape_cast %142 : vector<16xf32> to vector<16x1xf32>
    %cst_79 = arith.constant 1.280000e+02 : f32
    %144 = vector.broadcast %cst_79 : f32 to vector<16x1xf32>
    %145 = arith.divf %143, %144 : vector<16x1xf32>
    %146 = vector.broadcast %145 : vector<16x1xf32> to vector<16x128xf32>
    %147 = arith.subf %139, %146 : vector<16x128xf32>
    %148 = arith.mulf %147, %147 : vector<16x128xf32>
    %cst_80 = arith.constant dense<0.000000e+00> : vector<16xf32>
    %149 = vector.multi_reduction <add>, %148, %cst_80 [1] : vector<16x128xf32> to vector<16xf32>
    %150 = vector.shape_cast %149 : vector<16xf32> to vector<16x1xf32>
    %cst_81 = arith.constant 1.280000e+02 : f32
    %151 = vector.broadcast %cst_81 : f32 to vector<16x1xf32>
    %152 = arith.divf %150, %151 : vector<16x1xf32>
    %153 = vector.broadcast %145 : vector<16x1xf32> to vector<16x128xf32>
    %154 = arith.subf %139, %153 : vector<16x128xf32>
    %cst_82 = arith.constant 9.99999974E-6 : f32
    %155 = vector.broadcast %cst_82 : f32 to vector<16x1xf32>
    %156 = arith.addf %152, %155 : vector<16x1xf32>
    %157 = math.rsqrt %156 : vector<16x1xf32>
    %158 = vector.broadcast %157 : vector<16x1xf32> to vector<16x128xf32>
    %159 = arith.mulf %154, %158 : vector<16x128xf32>
    %160 = vector.broadcast %140 : vector<1x128xf32> to vector<16x128xf32>
    %161 = arith.mulf %159, %160 : vector<16x128xf32>
    %162 = vector.broadcast %141 : vector<1x128xf32> to vector<16x128xf32>
    %163 = arith.addf %161, %162 : vector<16x128xf32>
    %164 = arith.truncf %163 : vector<16x128xf32> to vector<16x128xbf16>
    %165 = vector.shape_cast %164 : vector<16x128xbf16> to vector<1x16x128xbf16>
    %166 = vector.shape_cast %165 : vector<1x16x128xbf16> to vector<1x16x128xbf16>
    %167 = vector.broadcast %166 : vector<1x16x128xbf16> to vector<4x16x128xbf16>
    %168 = arith.truncf %3 : vector<8x128xf32> to vector<8x128xbf16>
    %169 = vector.shape_cast %168 : vector<8x128xbf16> to vector<1x8x128xbf16>
    %170 = vector.shape_cast %169 : vector<1x8x128xbf16> to vector<1x8x128xbf16>
    %171 = vector.broadcast %170 : vector<1x8x128xbf16> to vector<4x8x128xbf16>
    %c0_83 = arith.constant 0 : index
    %c0_84 = arith.constant 0 : index
    %c0_85 = arith.constant 0 : index
    %172 = vector.load %arg21[%c0_83, %c0_84, %c0_85] : memref<4x128x32xbf16, #tpu.memory_space<vmem>>, vector<4x128x32xbf16>
    "tpu.trace_start"() <{level = 10 : i32, message = "hnd,hdk->hnk"}> : () -> ()
    %cst_86 = arith.constant dense<0.000000e+00> : vector<4x16x32xf32>
    %173 = tpu.matmul %167, %172, %cst_86 {dimension_numbers = #tpu.dot_dimension_numbers<[2], [1], [1], [2], [0, 0, 0, 1, 1, 2], [0], [0]>} : vector<4x16x128xbf16>, vector<4x128x32xbf16>, vector<4x16x32xf32> -> vector<4x16x32xf32>
    "tpu.trace_stop"() : () -> ()
    %c0_87 = arith.constant 0 : index
    %c0_88 = arith.constant 0 : index
    %c0_89 = arith.constant 0 : index
    %174 = vector.load %arg22[%c0_87, %c0_88, %c0_89] : memref<4x128x32xbf16, #tpu.memory_space<vmem>>, vector<4x128x32xbf16>
    "tpu.trace_start"() <{level = 10 : i32, message = "hnd,hdk->hnk"}> : () -> ()
    %cst_90 = arith.constant dense<0.000000e+00> : vector<4x8x32xf32>
    %175 = tpu.matmul %171, %174, %cst_90 {dimension_numbers = #tpu.dot_dimension_numbers<[2], [1], [1], [2], [0, 0, 0, 1, 1, 2], [0], [0]>} : vector<4x8x128xbf16>, vector<4x128x32xbf16>, vector<4x8x32xf32> -> vector<4x8x32xf32>
    "tpu.trace_stop"() : () -> ()
    %c0_91 = arith.constant 0 : index
    %c0_92 = arith.constant 0 : index
    %c0_93 = arith.constant 0 : index
    %176 = vector.load %arg23[%c0_91, %c0_92, %c0_93] : memref<4x128x32xbf16, #tpu.memory_space<vmem>>, vector<4x128x32xbf16>
    "tpu.trace_start"() <{level = 10 : i32, message = "hnd,hdk->hnk"}> : () -> ()
    %cst_94 = arith.constant dense<0.000000e+00> : vector<4x8x32xf32>
    %177 = tpu.matmul %171, %176, %cst_94 {dimension_numbers = #tpu.dot_dimension_numbers<[2], [1], [1], [2], [0, 0, 0, 1, 1, 2], [0], [0]>} : vector<4x8x128xbf16>, vector<4x128x32xbf16>, vector<4x8x32xf32> -> vector<4x8x32xf32>
    "tpu.trace_stop"() : () -> ()
    %178 = arith.truncf %173 : vector<4x16x32xf32> to vector<4x16x32xbf16>
    %179 = arith.truncf %175 : vector<4x8x32xf32> to vector<4x8x32xbf16>
    "tpu.trace_start"() <{level = 10 : i32, message = "hqd,hkd->hqk"}> : () -> ()
    %cst_95 = arith.constant dense<0.000000e+00> : vector<4x16x8xf32>
    %180 = tpu.matmul %178, %179, %cst_95 {dimension_numbers = #tpu.dot_dimension_numbers<[2], [2], [1], [1], [0, 0, 0, 1, 1, 1], [0], [0]>} : vector<4x16x32xbf16>, vector<4x8x32xbf16>, vector<4x16x8xf32> -> vector<4x16x8xf32>
    "tpu.trace_stop"() : () -> ()
    %cst_96 = arith.constant 0.176776692 : f32
    %181 = vector.broadcast %cst_96 : f32 to vector<4x16x8xf32>
    %182 = arith.mulf %180, %181 : vector<4x16x8xf32>
    %cst_97 = arith.constant dense<0xFF800000> : vector<4x16xf32>
    %183 = vector.multi_reduction <maximumf>, %182, %cst_97 [2] : vector<4x16x8xf32> to vector<4x16xf32>
    %184 = vector.shape_cast %183 : vector<4x16xf32> to vector<4x16x1xf32>
    %185 = vector.broadcast %184 : vector<4x16x1xf32> to vector<4x16x8xf32>
    %186 = arith.subf %182, %185 : vector<4x16x8xf32>
    %187 = math.exp %186 : vector<4x16x8xf32>
    %cst_98 = arith.constant dense<0.000000e+00> : vector<4x16xf32>
    %188 = vector.multi_reduction <add>, %187, %cst_98 [2] : vector<4x16x8xf32> to vector<4x16xf32>
    %189 = vector.shape_cast %188 : vector<4x16xf32> to vector<4x16x1xf32>
    %190 = arith.truncf %187 : vector<4x16x8xf32> to vector<4x16x8xbf16>
    %191 = arith.truncf %177 : vector<4x8x32xf32> to vector<4x8x32xbf16>
    "tpu.trace_start"() <{level = 10 : i32, message = "hqk,hkd->hqd"}> : () -> ()
    %cst_99 = arith.constant dense<0.000000e+00> : vector<4x16x32xf32>
    %192 = tpu.matmul %190, %191, %cst_99 {dimension_numbers = #tpu.dot_dimension_numbers<[2], [1], [1], [2], [0, 0, 0, 1, 1, 2], [0], [0]>} : vector<4x16x8xbf16>, vector<4x8x32xbf16>, vector<4x16x32xf32> -> vector<4x16x32xf32>
    "tpu.trace_stop"() : () -> ()
    %193 = tpu.reciprocal %189 {approx = true} : vector<4x16x1xf32> -> vector<4x16x1xf32>
    %194 = vector.broadcast %193 : vector<4x16x1xf32> to vector<4x16x32xf32>
    %195 = arith.mulf %192, %194 : vector<4x16x32xf32>
    %196 = arith.truncf %195 : vector<4x16x32xf32> to vector<4x16x32xbf16>
    %c0_100 = arith.constant 0 : index
    %c0_101 = arith.constant 0 : index
    %c0_102 = arith.constant 0 : index
    %197 = vector.load %arg24[%c0_100, %c0_101, %c0_102] : memref<4x32x128xbf16, #tpu.memory_space<vmem>>, vector<4x32x128xbf16>
    "tpu.trace_start"() <{level = 10 : i32, message = "hnk,hkd->hnd"}> : () -> ()
    %cst_103 = arith.constant dense<0.000000e+00> : vector<4x16x128xf32>
    %198 = tpu.matmul %196, %197, %cst_103 {dimension_numbers = #tpu.dot_dimension_numbers<[2], [1], [1], [2], [0, 0, 0, 1, 1, 2], [0], [0]>} : vector<4x16x32xbf16>, vector<4x32x128xbf16>, vector<4x16x128xf32> -> vector<4x16x128xf32>
    "tpu.trace_stop"() : () -> ()
    %cst_104 = arith.constant dense<0.000000e+00> : vector<16x128xf32>
    %199 = vector.multi_reduction <add>, %198, %cst_104 [0] : vector<4x16x128xf32> to vector<16x128xf32>
    %c0_105 = arith.constant 0 : index
    %c0_106 = arith.constant 0 : index
    %200 = vector.load %arg25[%c0_105, %c0_106] : memref<1x128xf32, #tpu.memory_space<vmem>>, vector<1x128xf32>
    %201 = vector.broadcast %200 : vector<1x128xf32> to vector<16x128xf32>
    %202 = arith.addf %199, %201 : vector<16x128xf32>
    %203 = arith.addf %139, %202 : vector<16x128xf32>
    %c0_107 = arith.constant 0 : index
    %c0_108 = arith.constant 0 : index
    %204 = vector.load %arg26[%c0_107, %c0_108] : memref<1x128xf32, #tpu.memory_space<vmem>>, vector<1x128xf32>
    %c0_109 = arith.constant 0 : index
    %c0_110 = arith.constant 0 : index
    %205 = vector.load %arg27[%c0_109, %c0_110] : memref<1x128xf32, #tpu.memory_space<vmem>>, vector<1x128xf32>
    %cst_111 = arith.constant dense<0.000000e+00> : vector<16xf32>
    %206 = vector.multi_reduction <add>, %203, %cst_111 [1] : vector<16x128xf32> to vector<16xf32>
    %207 = vector.shape_cast %206 : vector<16xf32> to vector<16x1xf32>
    %cst_112 = arith.constant 1.280000e+02 : f32
    %208 = vector.broadcast %cst_112 : f32 to vector<16x1xf32>
    %209 = arith.divf %207, %208 : vector<16x1xf32>
    %210 = vector.broadcast %209 : vector<16x1xf32> to vector<16x128xf32>
    %211 = arith.subf %203, %210 : vector<16x128xf32>
    %212 = arith.mulf %211, %211 : vector<16x128xf32>
    %cst_113 = arith.constant dense<0.000000e+00> : vector<16xf32>
    %213 = vector.multi_reduction <add>, %212, %cst_113 [1] : vector<16x128xf32> to vector<16xf32>
    %214 = vector.shape_cast %213 : vector<16xf32> to vector<16x1xf32>
    %cst_114 = arith.constant 1.280000e+02 : f32
    %215 = vector.broadcast %cst_114 : f32 to vector<16x1xf32>
    %216 = arith.divf %214, %215 : vector<16x1xf32>
    %217 = vector.broadcast %209 : vector<16x1xf32> to vector<16x128xf32>
    %218 = arith.subf %203, %217 : vector<16x128xf32>
    %cst_115 = arith.constant 9.99999974E-6 : f32
    %219 = vector.broadcast %cst_115 : f32 to vector<16x1xf32>
    %220 = arith.addf %216, %219 : vector<16x1xf32>
    %221 = math.rsqrt %220 : vector<16x1xf32>
    %222 = vector.broadcast %221 : vector<16x1xf32> to vector<16x128xf32>
    %223 = arith.mulf %218, %222 : vector<16x128xf32>
    %224 = vector.broadcast %204 : vector<1x128xf32> to vector<16x128xf32>
    %225 = arith.mulf %223, %224 : vector<16x128xf32>
    %226 = vector.broadcast %205 : vector<1x128xf32> to vector<16x128xf32>
    %227 = arith.addf %225, %226 : vector<16x128xf32>
    %228 = arith.truncf %227 : vector<16x128xf32> to vector<16x128xbf16>
    %c0_116 = arith.constant 0 : index
    %c0_117 = arith.constant 0 : index
    %229 = vector.load %arg28[%c0_116, %c0_117] : memref<128x512xbf16, #tpu.memory_space<vmem>>, vector<128x512xbf16>
    %cst_118 = arith.constant dense<0.000000e+00> : vector<16x512xf32>
    %230 = tpu.matmul %228, %229, %cst_118 {dimension_numbers = #tpu.dot_dimension_numbers<[1], [0], [0], [1], [0, 0, 1, 1], [], []>} : vector<16x128xbf16>, vector<128x512xbf16>, vector<16x512xf32> -> vector<16x512xf32>
    %c0_119 = arith.constant 0 : index
    %c0_120 = arith.constant 0 : index
    %231 = vector.load %arg29[%c0_119, %c0_120] : memref<1x512xf32, #tpu.memory_space<vmem>>, vector<1x512xf32>
    %232 = vector.broadcast %231 : vector<1x512xf32> to vector<16x512xf32>
    %233 = arith.addf %230, %232 : vector<16x512xf32>
    %cst_121 = arith.constant 5.000000e-01 : f32
    %234 = vector.broadcast %cst_121 : f32 to vector<16x512xf32>
    %235 = arith.mulf %234, %233 : vector<16x512xf32>
    %cst_122 = arith.constant 0.707106769 : f32
    %236 = vector.broadcast %cst_122 : f32 to vector<16x512xf32>
    %237 = arith.mulf %233, %236 : vector<16x512xf32>
    %238 = math.erf %237 : vector<16x512xf32>
    %cst_123 = arith.constant 1.000000e+00 : f32
    %239 = vector.broadcast %cst_123 : f32 to vector<16x512xf32>
    %240 = arith.addf %239, %238 : vector<16x512xf32>
    %241 = arith.mulf %235, %240 : vector<16x512xf32>
    %242 = arith.truncf %241 : vector<16x512xf32> to vector<16x512xbf16>
    %c0_124 = arith.constant 0 : index
    %c0_125 = arith.constant 0 : index
    %243 = vector.load %arg30[%c0_124, %c0_125] : memref<512x128xbf16, #tpu.memory_space<vmem>>, vector<512x128xbf16>
    %cst_126 = arith.constant dense<0.000000e+00> : vector<16x128xf32>
    %244 = tpu.matmul %242, %243, %cst_126 {dimension_numbers = #tpu.dot_dimension_numbers<[1], [0], [0], [1], [0, 0, 1, 1], [], []>} : vector<16x512xbf16>, vector<512x128xbf16>, vector<16x128xf32> -> vector<16x128xf32>
    %c0_127 = arith.constant 0 : index
    %c0_128 = arith.constant 0 : index
    %245 = vector.load %arg31[%c0_127, %c0_128] : memref<1x128xf32, #tpu.memory_space<vmem>>, vector<1x128xf32>
    %246 = vector.broadcast %245 : vector<1x128xf32> to vector<16x128xf32>
    %247 = arith.addf %244, %246 : vector<16x128xf32>
    %248 = arith.addf %203, %247 : vector<16x128xf32>
    %c0_129 = arith.constant 0 : index
    %c0_130 = arith.constant 0 : index
    %c0_131 = arith.constant 0 : index
    %249 = vector.load %arg32[%c0_129, %c0_130, %c0_131] : memref<1x16x128xf32, #tpu.memory_space<vmem>>, vector<1x16x128xf32>
    %250 = vector.shape_cast %249 : vector<1x16x128xf32> to vector<16x128xf32>
    %251 = vector.shape_cast %248 : vector<16x128xf32> to vector<1x16x128xf32>
    tpu.vector_store %arg32[%c0_129, %c0_130, %c0_131], %251 {strides = array<i32>} : memref<1x16x128xf32, #tpu.memory_space<vmem>>, vector<1x16x128xf32>,
    return
  }
  func.func @transform_0(%arg0: i32) -> (i32, i32, i32) {
    %c0_i32 = arith.constant 0 : i32
    %c0_i32_0 = arith.constant 0 : i32
    %c0_i32_1 = arith.constant 0 : i32
    return %arg0, %c0_i32, %c0_i32_0 : i32, i32, i32
  }
  func.func @transform_1(%arg0: i32) -> (i32, i32, i32) {
    %c0_i32 = arith.constant 0 : i32
    %c0_i32_0 = arith.constant 0 : i32
    %c0_i32_1 = arith.constant 0 : i32
    return %arg0, %c0_i32, %c0_i32_0 : i32, i32, i32
  }
  func.func @transform_2(%arg0: i32) -> (i32, i32) {
    %c0_i32 = arith.constant 0 : i32
    %c0_i32_0 = arith.constant 0 : i32
    %c0_i32_1 = arith.constant 0 : i32
    return %c0_i32, %c0_i32_0 : i32, i32
  }
  func.func @transform_3(%arg0: i32) -> (i32, i32) {
    %c0_i32 = arith.constant 0 : i32
    %c0_i32_0 = arith.constant 0 : i32
    %c0_i32_1 = arith.constant 0 : i32
    return %c0_i32, %c0_i32_0 : i32, i32
  }
  func.func @transform_4(%arg0: i32) -> (i32, i32) {
    %c0_i32 = arith.constant 0 : i32
    %c0_i32_0 = arith.constant 0 : i32
    %c0_i32_1 = arith.constant 0 : i32
    return %c0_i32, %c0_i32_0 : i32, i32
  }
  func.func @transform_5(%arg0: i32) -> (i32, i32) {
    %c0_i32 = arith.constant 0 : i32
    %c0_i32_0 = arith.constant 0 : i32
    %c0_i32_1 = arith.constant 0 : i32
    return %c0_i32, %c0_i32_0 : i32, i32
  }
  func.func @transform_6(%arg0: i32) -> (i32, i32, i32) {
    %c0_i32 = arith.constant 0 : i32
    %c0_i32_0 = arith.constant 0 : i32
    %c0_i32_1 = arith.constant 0 : i32
    %c0_i32_2 = arith.constant 0 : i32
    return %c0_i32, %c0_i32_0, %c0_i32_1 : i32, i32, i32
  }
  func.func @transform_7(%arg0: i32) -> (i32, i32, i32) {
    %c0_i32 = arith.constant 0 : i32
    %c0_i32_0 = arith.constant 0 : i32
    %c0_i32_1 = arith.constant 0 : i32
    %c0_i32_2 = arith.constant 0 : i32
    return %c0_i32, %c0_i32_0, %c0_i32_1 : i32, i32, i32
  }
  func.func @transform_8(%arg0: i32) -> (i32, i32, i32) {
    %c0_i32 = arith.constant 0 : i32
    %c0_i32_0 = arith.constant 0 : i32
    %c0_i32_1 = arith.constant 0 : i32
    %c0_i32_2 = arith.constant 0 : i32
    return %c0_i32, %c0_i32_0, %c0_i32_1 : i32, i32, i32
  }
  func.func @transform_9(%arg0: i32) -> (i32, i32, i32) {
    %c0_i32 = arith.constant 0 : i32
    %c0_i32_0 = arith.constant 0 : i32
    %c0_i32_1 = arith.constant 0 : i32
    %c0_i32_2 = arith.constant 0 : i32
    return %c0_i32, %c0_i32_0, %c0_i32_1 : i32, i32, i32
  }
  func.func @transform_10(%arg0: i32) -> (i32, i32) {
    %c0_i32 = arith.constant 0 : i32
    %c0_i32_0 = arith.constant 0 : i32
    %c0_i32_1 = arith.constant 0 : i32
    return %c0_i32, %c0_i32_0 : i32, i32
  }
  func.func @transform_11(%arg0: i32) -> (i32, i32) {
    %c0_i32 = arith.constant 0 : i32
    %c0_i32_0 = arith.constant 0 : i32
    %c0_i32_1 = arith.constant 0 : i32
    return %c0_i32, %c0_i32_0 : i32, i32
  }
  func.func @transform_12(%arg0: i32) -> (i32, i32) {
    %c0_i32 = arith.constant 0 : i32
    %c0_i32_0 = arith.constant 0 : i32
    %c0_i32_1 = arith.constant 0 : i32
    return %c0_i32, %c0_i32_0 : i32, i32
  }
  func.func @transform_13(%arg0: i32) -> (i32, i32, i32) {
    %c0_i32 = arith.constant 0 : i32
    %c0_i32_0 = arith.constant 0 : i32
    %c0_i32_1 = arith.constant 0 : i32
    %c0_i32_2 = arith.constant 0 : i32
    return %c0_i32, %c0_i32_0, %c0_i32_1 : i32, i32, i32
  }
  func.func @transform_14(%arg0: i32) -> (i32, i32, i32) {
    %c0_i32 = arith.constant 0 : i32
    %c0_i32_0 = arith.constant 0 : i32
    %c0_i32_1 = arith.constant 0 : i32
    %c0_i32_2 = arith.constant 0 : i32
    return %c0_i32, %c0_i32_0, %c0_i32_1 : i32, i32, i32
  }
  func.func @transform_15(%arg0: i32) -> (i32, i32, i32) {
    %c0_i32 = arith.constant 0 : i32
    %c0_i32_0 = arith.constant 0 : i32
    %c0_i32_1 = arith.constant 0 : i32
    %c0_i32_2 = arith.constant 0 : i32
    return %c0_i32, %c0_i32_0, %c0_i32_1 : i32, i32, i32
  }
  func.func @transform_16(%arg0: i32) -> (i32, i32, i32) {
    %c0_i32 = arith.constant 0 : i32
    %c0_i32_0 = arith.constant 0 : i32
    %c0_i32_1 = arith.constant 0 : i32
    %c0_i32_2 = arith.constant 0 : i32
    return %c0_i32, %c0_i32_0, %c0_i32_1 : i32, i32, i32
  }
  func.func @transform_17(%arg0: i32) -> (i32, i32) {
    %c0_i32 = arith.constant 0 : i32
    %c0_i32_0 = arith.constant 0 : i32
    %c0_i32_1 = arith.constant 0 : i32
    return %c0_i32, %c0_i32_0 : i32, i32
  }
  func.func @transform_18(%arg0: i32) -> (i32, i32) {
    %c0_i32 = arith.constant 0 : i32
    %c0_i32_0 = arith.constant 0 : i32
    %c0_i32_1 = arith.constant 0 : i32
    return %c0_i32, %c0_i32_0 : i32, i32
  }
  func.func @transform_19(%arg0: i32) -> (i32, i32) {
    %c0_i32 = arith.constant 0 : i32
    %c0_i32_0 = arith.constant 0 : i32
    %c0_i32_1 = arith.constant 0 : i32
    return %c0_i32, %c0_i32_0 : i32, i32
  }
  func.func @transform_20(%arg0: i32) -> (i32, i32, i32) {
    %c0_i32 = arith.constant 0 : i32
    %c0_i32_0 = arith.constant 0 : i32
    %c0_i32_1 = arith.constant 0 : i32
    %c0_i32_2 = arith.constant 0 : i32
    return %c0_i32, %c0_i32_0, %c0_i32_1 : i32, i32, i32
  }
  func.func @transform_21(%arg0: i32) -> (i32, i32, i32) {
    %c0_i32 = arith.constant 0 : i32
    %c0_i32_0 = arith.constant 0 : i32
    %c0_i32_1 = arith.constant 0 : i32
    %c0_i32_2 = arith.constant 0 : i32
    return %c0_i32, %c0_i32_0, %c0_i32_1 : i32, i32, i32
  }
  func.func @transform_22(%arg0: i32) -> (i32, i32, i32) {
    %c0_i32 = arith.constant 0 : i32
    %c0_i32_0 = arith.constant 0 : i32
    %c0_i32_1 = arith.constant 0 : i32
    %c0_i32_2 = arith.constant 0 : i32
    return %c0_i32, %c0_i32_0, %c0_i32_1 : i32, i32, i32
  }
  func.func @transform_23(%arg0: i32) -> (i32, i32, i32) {
    %c0_i32 = arith.constant 0 : i32
    %c0_i32_0 = arith.constant 0 : i32
    %c0_i32_1 = arith.constant 0 : i32
    %c0_i32_2 = arith.constant 0 : i32
    return %c0_i32, %c0_i32_0, %c0_i32_1 : i32, i32, i32
  }
  func.func @transform_24(%arg0: i32) -> (i32, i32) {
    %c0_i32 = arith.constant 0 : i32
    %c0_i32_0 = arith.constant 0 : i32
    %c0_i32_1 = arith.constant 0 : i32
    return %c0_i32, %c0_i32_0 : i32, i32
  }
  func.func @transform_25(%arg0: i32) -> (i32, i32) {
    %c0_i32 = arith.constant 0 : i32
    %c0_i32_0 = arith.constant 0 : i32
    %c0_i32_1 = arith.constant 0 : i32
    return %c0_i32, %c0_i32_0 : i32, i32
  }
  func.func @transform_26(%arg0: i32) -> (i32, i32) {
    %c0_i32 = arith.constant 0 : i32
    %c0_i32_0 = arith.constant 0 : i32
    %c0_i32_1 = arith.constant 0 : i32
    return %c0_i32, %c0_i32_0 : i32, i32
  }
  func.func @transform_27(%arg0: i32) -> (i32, i32) {
    %c0_i32 = arith.constant 0 : i32
    %c0_i32_0 = arith.constant 0 : i32
    %c0_i32_1 = arith.constant 0 : i32
    return %c0_i32, %c0_i32_0 : i32, i32
  }
  func.func @transform_28(%arg0: i32) -> (i32, i32) {
    %c0_i32 = arith.constant 0 : i32
    %c0_i32_0 = arith.constant 0 : i32
    %c0_i32_1 = arith.constant 0 : i32
    return %c0_i32, %c0_i32_0 : i32, i32
  }
  func.func @transform_29(%arg0: i32) -> (i32, i32) {
    %c0_i32 = arith.constant 0 : i32
    %c0_i32_0 = arith.constant 0 : i32
    %c0_i32_1 = arith.constant 0 : i32
    return %c0_i32, %c0_i32_0 : i32, i32
  }
  func.func @transform_30(%arg0: i32) -> (i32, i32) {
    %c0_i32 = arith.constant 0 : i32
    %c0_i32_0 = arith.constant 0 : i32
    %c0_i32_1 = arith.constant 0 : i32
    return %c0_i32, %c0_i32_0 : i32, i32
  }
  func.func @transform_31(%arg0: i32) -> (i32, i32, i32) {
    %c0_i32 = arith.constant 0 : i32
    %c0_i32_0 = arith.constant 0 : i32
    %c0_i32_1 = arith.constant 0 : i32
    return %arg0, %c0_i32, %c0_i32_0 : i32, i32, i32
  }
}

</mosaic_0001>

<bundles_post_ra>
// kernel: tpu_custom_call.1
= control target key start
LH: loop header
LB: loop body
LE: loop exit
PB: predicated region body
PF: predicated region fallthrough
CT: control target
= control target key end

     0   :  { %s10485_s6 = smov 1   ;;  %s10486_s10 = smov 2   ;;  %s11885_s0 = inlined_call_operand.smem [shape: u32[32], index: -1, kind: input, shape index: {}] }
   0x1   :  { %s10530_s5 = sld [smem:[%s11885_s0]]   ;;  %s10487_s14 = smov 3  }
   0x2   :  { %s10535_s9 = sld [smem:[%s11885_s0 + %s10485_s6]]   ;;  %s10488_s18 = smov 4  }
   0x3   :  { %s10540_s13 = sld [smem:[%s11885_s0 + %s10486_s10]]   ;;  %s10489_s22 = smov 5  }
   0x4   :  { %s10545_s17 = sld [smem:[%s11885_s0 + %s10487_s14]]   ;;  %s10490_s26 = smov 6  }
   0x5   :  { %s10550_s21 = sld [smem:[%s11885_s0 + %s10488_s18]]   ;;  %s10491_s30 = smov 7  }
   0x6   :  { %s10555_s25 = sld [smem:[%s11885_s0 + %s10489_s22]]   ;;  %s10492_s4 = smov 8  }
   0x7   :  { %11903 = sst [smem:[#allocation5_spill]] %s10530_s5  ;;  %s10493_s10 = smov 9  }
   0x8   :  { %11904 = sst [smem:[#allocation6_spill]] %s10535_s9  ;;  %s10494_s15 = smov 10  }
   0x9   :  { %s10560_s29 = sld [smem:[%s11885_s0 + %s10490_s26]]   ;;  %s10495_s20 = smov 11  }
   0xa   :  { %11905 = sst [smem:[#allocation7_spill]] %s10545_s17  ;;  %s10496_s26 = smov 12  }
   0xb   :  { %s10565_s3 = sld [smem:[%s11885_s0 + %s10491_s30]]   ;;  %s10497_s1 = smov 13  }
   0xc   :  { %s10570_s8 = sld [smem:[%s11885_s0 + %s10492_s4]]   ;;  %s10498_s7 = smov 14  }
   0xd   :  { %s10575_s14 = sld [smem:[%s11885_s0 + %s10493_s10]]   ;;  %s10500_s22 = smov 16  }
   0xe   :  { %s10580_s19 = sld [smem:[%s11885_s0 + %s10494_s15]]   ;;  %s10499_s15 = smov 15  }
   0xf   :  { %s10585_s24 = sld [smem:[%s11885_s0 + %s10495_s20]]   ;;  %s10501_s28 = smov 17  }
  0x10   :  { %s10590_s30 = sld [smem:[%s11885_s0 + %s10496_s26]]  }
  0x11   :  { %11906 = sst [smem:[#allocation8_spill]] %s10565_s3 }
  0x12   :  { %11907 = sst [smem:[#allocation9_spill]] %s10570_s8 }
  0x13   :  { %s10595_s6 = sld [smem:[%s11885_s0 + %s10497_s1]]  }
  0x14   :  { %s10600_s12 = sld [smem:[%s11885_s0 + %s10498_s7]]   ;;  %s10502_s7 = smov 18  }
  0x15   :  { %s10605_s20 = sld [smem:[%s11885_s0 + %s10499_s15]]   ;;  %s10503_s15 = smov 19  }
  0x16   :  { %s10610_s27 = sld [smem:[%s11885_s0 + %s10500_s22]]   ;;  %s10504_s22 = smov 20  }
  0x17   :  { %s10615_s4 = sld [smem:[%s11885_s0 + %s10501_s28]]   ;;  %s10505_s28 = smov 21  }
  0x18   :  { %s10620_s9 = sld [smem:[%s11885_s0 + %s10502_s7]]   ;;  %s10506_s7 = smov 22  }
  0x19   :  { %11908 = sst [smem:[#allocation10_spill]] %s10595_s6 }
  0x1a   :  { %s10625_s17 = sld [smem:[%s11885_s0 + %s10503_s15]]   ;;  %s10507_s15 = smov 23  }
  0x1c   :  { %11909 = sst [smem:[#allocation11_spill]] %s10610_s27 }
  0x1d   :  { %11910 = sst [smem:[#allocation12_spill]] %s10615_s4 }
  0x1e   :  { %11911 = sst [smem:[#allocation13_spill]] %s10620_s9 }
  0x1f   :  { %s10630_s27 = sld [smem:[%s11885_s0 + %s10504_s22]]   ;;  %s10508_s22 = smov 24  }
  0x20   :  { %11912 = sst [smem:[#allocation14_spill]] %s10625_s17 }
  0x21   :  { %s10635_s4 = sld [smem:[%s11885_s0 + %s10505_s28]]   ;;  %s10509_s28 = smov 25  }
  0x22   :  { %s10640_s9 = sld [smem:[%s11885_s0 + %s10506_s7]]   ;;  %s10510_s7 = smov 26  }
  0x23   :  { %s10645_s17 = sld [smem:[%s11885_s0 + %s10507_s15]]   ;;  %s10511_s15 = smov 27  }
  0x25   :  { %11913 = sst [smem:[#allocation15_spill]] %s10630_s27 }
  0x26   :  { %s10650_s27 = sld [smem:[%s11885_s0 + %s10508_s22]]   ;;  %s10512_s22 = smov 28  }
  0x27   :  { %11914 = sst [smem:[#allocation16_spill]] %s10635_s4 }
  0x28   :  { %11915 = sst [smem:[#allocation17_spill]] %s10640_s9 }
  0x29   :  { %11916 = sst [smem:[#allocation18_spill]] %s10645_s17 }
  0x2a   :  { %s10655_s4 = sld [smem:[%s11885_s0 + %s10509_s28]]   ;;  %s10513_s28 = smov 29  }
  0x2b   :  { %s10660_s9 = sld [smem:[%s11885_s0 + %s10510_s7]]   ;;  %s10514_s7 = smov 30  }
  0x2c   :  { %11917 = sst [smem:[#allocation19_spill]] %s10650_s27 }
  0x2d   :  { %s10665_s17 = sld [smem:[%s11885_s0 + %s10511_s15]]   ;;  %s10515_s15 = smov 31  }
  0x2e   :  { %s10670_s27 = sld [smem:[%s11885_s0 + %s10512_s22]]  }
  0x30   :  { %11918 = sst [smem:[#allocation20_spill]] %s10655_s4 }
  0x31   :  { %11919 = sst [smem:[#allocation21_spill]] %s10660_s9 }
  0x32   :  { %s10675_s4 = sld [smem:[%s11885_s0 + %s10513_s28]]  }
  0x33   :  { %11920 = sst [smem:[#allocation22_spill]] %s10665_s17 }
  0x34   :  { %s10680_s9 = sld [smem:[%s11885_s0 + %s10514_s7]]  }
  0x35   :  { %s10685_s17 = sld [smem:[%s11885_s0 + %s10515_s15]]  }
  0x38   :  { %11921 = sst [smem:[#allocation23_spill]] %s10675_s4 }
  0x3a   :  { %11922 = sst [smem:[#allocation24_spill]] %s10680_s9 }
  0x3b   :  { %68 = vsyncpa [#allocation3], 0 }
  0x3c   :  { %70 = vsyncpa [#allocation3 + $0x1], 0  ;;  %s10687_s22 = smov 0   ;;  %s10689_s23 = smov 0  }
  0x3d   :  { %s10691_s26 = smov 0   ;;  %s10693_s28 = smov 0  }
  0x3e LB: > { %s11923_s8 = sld [smem:[#allocation9_spill]]  ;;  %s10708_s0 = sadd.s32 4294967295, %s10483_s28   ;;  %s10483_s28 = sphi %s10693_s28, %s11948_s28   ;;  %s10479_s26 = sphi %s10691_s26, %s11947_s26   ;;  %s10475_s23 = sphi %s10689_s23, %s11946_s23   ;;  %s10471_s22 = sphi %s10687_s22, %s11945_s22  }
  0x3f   : > { %s11924_s6 = sld [smem:[#allocation10_spill]]  ;;  %s7975_s1 = sadd.s32 4294967294, %s10483_s28  }
  0x40   : > { %s11925_s4 = sld [smem:[#allocation23_spill]]  ;;  %s10712_s2 = sadd.s32 1, %s10483_s28  }
  0x41   : > { %s11926_s3 = sld [smem:[#allocation8_spill]]  ;;  %s744_s7 = sadd.s32 1, %s10479_s26 }
  0x42   : > { %s741_s10 = ssub.s32 %s10483_s28, %s10712_s2  ;;  %p754_p0 = scmp.ne.s32.totalorder %s10479_s26, %s10475_s23 }
  0x43   : > { %p742_p1 = scmp.eq.s32.totalorder %s741_s10, 0  ;;  %p755_p2 = scmp.eq.s32.totalorder %s10708_s0, 1 }
  0x44   : > { %p760_p3 = scmp.ne.s32.totalorder %s10475_s23, %s10471_s22  ;;  %p761_p4 = scmp.eq.s32.totalorder %s7975_s1, 1 }
  0x45   : > { %s10723_s11 = scalar_select %p742_p1, %s10479_s26, %s744_s7  }
  0x46   : > { %p10725_p5 = por %p755_p2, %p754_p0  ;;  %p10729_p6 = por %p761_p4, %p760_p3 }
  0x47   : > { %p7978_p7 = scmp.ge.s32.totalorder %s10483_s28, 1  ;;  %p881_p8 = scmp.lt.s32.totalorder %s10483_s28, 3 }
  0x49   : > { %p882_p9 = pnand %p7978_p7, %p881_p8 }
  0x4a   : > { %s11929_s5 = sld [smem:[#allocation5_spill]] (!%p882_p9)  ;;  %p965_p10 = scmp.lt.s32.totalorder (!%p882_p9), %s10708_s0, 1 }
  0x4b   : > { %885 = sbr.rel (%p882_p9) target bundleno = 4973 (0x136d), region = 144  ;;  %s11930_s10 = sld [smem:[#allocation7_spill]] (!%p882_p9) }
  0x4c   : > { %s11944_s9 = sld [smem:[#allocation24_spill]] (!%p882_p9) }
  0x50   : > { %s10737_s18 = scalar_select %p965_p10, %s10708_s0, 1  ;;  %v9901_v2 = vld [vmem:[%s10560_s29 + $0x38] sm:$0xff]   ;;  %v10516_v4 = vmov 0.0   ;;  %v9903_v13 = vld [vmem:[%s10560_s29 + $0x30] sm:$0xff]   ;;  %v9905_v15 = vld [vmem:[%s10560_s29 + $0x28] sm:$0xff]   ;;  %vm10517_vm0 = vmmov 0  }
  0x51   : > { %v9902_v3 = vld [vmem:[%s10560_s29 + $0x78] sm:$0xff]   ;;  %8866 = vmatprep.subr.bf16.mxu0 %v10516_v4  ;;  %8886 = vmatprep.subr.bf16.mxu1 %v10516_v4  ;;  %v9904_v14 = vld [vmem:[%s10560_s29 + $0x70] sm:$0xff]   ;;  %v9906_v16 = vld [vmem:[%s10560_s29 + $0x68] sm:$0xff]   ;;  %vm2292_vm1 = vcmask 261120   ;;  %vm2497_vm2 = vcmask 130048   ;;  %vm6659_vm3 = vcmask 1043456  }
  0x52   : > { %s8412_s1 = sshll.u32 %s10737_s18, 4  ;;  %8867 = vmatpush3.bf16.msra.mxu0 %v9901_v2  ;;  %8887 = vmatpush3.bf16.msra.mxu1 %v9902_v3  ;;  %v9907_v17 = vld [vmem:[%s10560_s29 + $0x20] sm:$0xff]   ;;  %v9909_v19 = vld [vmem:[%s10560_s29 + $0x18] sm:$0xff]   ;;  %v9911_v21 = vld [vmem:[%s10560_s29 + $0x10] sm:$0xff]   ;;  %vm6575_vm4 = vcmask 64512  }
  0x53   : > { %s10741_s7 = scalar_lea.vmem %s11929_s5, %s8412_s1  ;;  %8868 = vmatprep.subr.bf16.mxu0 %v10516_v4  ;;  %8888 = vmatprep.subr.bf16.mxu1 %v10516_v4  ;;  %v9908_v18 = vld [vmem:[%s10560_s29 + $0x60] sm:$0xff]   ;;  %v9910_v20 = vld [vmem:[%s10560_s29 + $0x58] sm:$0xff]   ;;  %v9912_v22 = vld [vmem:[%s10560_s29 + $0x50] sm:$0xff]   ;;  %s11931_s1 = sld [smem:[#allocation11_spill]] }
  0x54   : > { %v975_v0 = vld [vmem:[%s10741_s7] sm:$0xff]  ;;  %v976_v1 = vld [vmem:[%s10741_s7 + $0x8] sm:$0xff]  ;;  %8882 = vmatprep.mubr.msk.bf16.mxu0 %vm10517_vm0, %v10516_v4  ;;  %8902 = vmatprep.mubr.msk.bf16.mxu1 %vm10517_vm0, %v10516_v4  ;;  %v9917_v43 = vld [vmem:[%s10560_s29 + $0xb8] sm:$0xff]  }
  0x55   : > { %984 = vadd.xlane.f32.xlu0 %v975_v0  ;;  %v9913_v23 = vld [vmem:[%s10560_s29 + $0x8] sm:$0xff]   ;;  %v9915_v25 = vld [vmem:[%s10560_s29] sm:$0xff]   ;;  %v9918_v44 = vld [vmem:[%s10560_s29 + $0xf8] sm:$0xff]  }
  0x56   : > { %8869 = vmatpush3.bf16.msra.mxu0 %v9903_v13  ;;  %8889 = vmatpush3.bf16.msra.mxu1 %v9904_v14  ;;  %v9914_v24 = vld [vmem:[%s10560_s29 + $0x48] sm:$0xff]   ;;  %v9916_v26 = vld [vmem:[%s10560_s29 + $0x40] sm:$0xff]   ;;  %v9919_v46 = vld [vmem:[%s10560_s29 + $0xb0] sm:$0xff]  }
  0x57   : > { %8870 = vmatprep.subr.bf16.mxu0 %v10516_v4  ;;  %8890 = vmatprep.subr.bf16.mxu1 %v10516_v4  ;;  %v7983_v35 = vld [vmem:[%s10550_s21] ss:$0 sm:$0xff]  ;;  %v9920_v47 = vld [vmem:[%s10560_s29 + $0xf0] sm:$0xff]   ;;  %v9921_v48 = vld [vmem:[%s10560_s29 + $0xa8] sm:$0xff]  }
  0x58   : > { %v7984_v39 = vld [vmem:[%s10555_s25] ss:$0 sm:$0xff]  ;;  %v9922_v49 = vld [vmem:[%s10560_s29 + $0xe8] sm:$0xff]   ;;  %v9925_v52 = vld [vmem:[%s10560_s29 + $0x98] sm:$0xff]  }
  0x59   : > { %986 = vadd.xlane.f32.xlu0 %v976_v1  ;;  %v9923_v50 = vld [vmem:[%s10560_s29 + $0xa0] sm:$0xff]   ;;  %v9926_v53 = vld [vmem:[%s10560_s29 + $0xd8] sm:$0xff]   ;;  %v9927_v54 = vld [vmem:[%s10560_s29 + $0x90] sm:$0xff]  }
  0x5a   : > { %8871 = vmatpush3.bf16.msra.mxu0 %v9905_v15  ;;  %8891 = vmatpush3.bf16.msra.mxu1 %v9906_v16  ;;  %v9924_v51 = vld [vmem:[%s10560_s29 + $0xe0] sm:$0xff]   ;;  %v9928_v55 = vld [vmem:[%s10560_s29 + $0xd0] sm:$0xff]   ;;  %v9929_v56 = vld [vmem:[%s10560_s29 + $0x88] sm:$0xff]  }
  0x5b   : > { %8872 = vmatprep.subr.bf16.mxu0 %v10516_v4  ;;  %8892 = vmatprep.subr.bf16.mxu1 %v10516_v4  ;;  %v9930_v57 = vld [vmem:[%s10560_s29 + $0xc8] sm:$0xff]   ;;  %v9931_v58 = vld [vmem:[%s10560_s29 + $0x80] sm:$0xff]   ;;  %v9933_v60 = vld [vmem:[%s11926_s3 + $0x38] sm:$0xff]  }
  0x5c   : > { %v9932_v59 = vld [vmem:[%s10560_s29 + $0xc0] sm:$0xff]   ;;  %v9934_v61 = vld [vmem:[%s11926_s3 + $0x78] sm:$0xff]   ;;  %v9935_v62 = vld [vmem:[%s11926_s3 + $0x30] sm:$0xff]  }
  0x5d   : > { %v9936_v63 = vld [vmem:[%s11926_s3 + $0x70] sm:$0xff]   ;;  %v9939_v2 = vld [vmem:[%s11926_s3 + $0x20] sm:$0xff]   ;;  %v9949_v13 = vld [vmem:[%s11926_s3 + $0xb8] sm:$0xff]  }
  0x5e   : > { %8873 = vmatpush3.bf16.msra.mxu0 %v9907_v17  ;;  %8893 = vmatpush3.bf16.msra.mxu1 %v9908_v18  ;;  %v9940_v3 = vld [vmem:[%s11926_s3 + $0x60] sm:$0xff]   ;;  %v9950_v14 = vld [vmem:[%s11926_s3 + $0xf8] sm:$0xff]   ;;  %v9951_v15 = vld [vmem:[%s11926_s3 + $0xb0] sm:$0xff]  }
  0x5f   : > { %8874 = vmatprep.subr.bf16.mxu0 %v10516_v4  ;;  %8894 = vmatprep.subr.bf16.mxu1 %v10516_v4  ;;  %v9952_v16 = vld [vmem:[%s11926_s3 + $0xf0] sm:$0xff]   ;;  %v9953_v17 = vld [vmem:[%s11926_s3 + $0xa8] sm:$0xff]  }
  0x60   : > { %v9954_v18 = vld [vmem:[%s11926_s3 + $0xe8] sm:$0xff]  }
  0x62   : > { %8875 = vmatpush3.bf16.msra.mxu0 %v9909_v19  ;;  %8895 = vmatpush3.bf16.msra.mxu1 %v9910_v20  ;;  %v9955_v19 = vld [vmem:[%s11926_s3 + $0xa0] sm:$0xff]  }
  0x63   : > { %8876 = vmatprep.subr.bf16.mxu0 %v10516_v4  ;;  %8896 = vmatprep.subr.bf16.mxu1 %v10516_v4  ;;  %v9956_v20 = vld [vmem:[%s11926_s3 + $0xe0] sm:$0xff]  }
  0x66   : > { %8877 = vmatpush3.bf16.msra.mxu0 %v9911_v21  ;;  %8897 = vmatpush3.bf16.msra.mxu1 %v9912_v22  ;;  %v9957_v21 = vld [vmem:[%s11926_s3 + $0x98] sm:$0xff]  }
  0x67   : > { %8878 = vmatprep.subr.bf16.mxu0 %v10516_v4  ;;  %8898 = vmatprep.subr.bf16.mxu1 %v10516_v4  ;;  %v9958_v22 = vld [vmem:[%s11926_s3 + $0xd8] sm:$0xff]  }
  0x6a   : > { %8879 = vmatpush3.bf16.msra.mxu0 %v9913_v23  ;;  %8899 = vmatpush3.bf16.msra.mxu1 %v9914_v24  ;;  %v9959_v23 = vld [vmem:[%s11926_s3 + $0x90] sm:$0xff]  }
  0x6b   : > { %8880 = vmatprep.subr.bf16.mxu0 %v10516_v4  ;;  %8900 = vmatprep.subr.bf16.mxu1 %v10516_v4  ;;  %v9960_v24 = vld [vmem:[%s11926_s3 + $0xd0] sm:$0xff]  }
  0x6e   : > { %8881 = vmatpush3.bf16.msra.mxu0 %v9915_v25  ;;  %8901 = vmatpush3.bf16.msra.mxu1 %v9916_v26  ;;  %v9961_v25 = vld [vmem:[%s11926_s3 + $0x88] sm:$0xff]  }
  0x6f   : > { %8906 = vmatprep.subr.bf16.mxu0 %v10516_v4  ;;  %8926 = vmatprep.subr.bf16.mxu1 %v10516_v4  ;;  %v9962_v26 = vld [vmem:[%s11926_s3 + $0xc8] sm:$0xff]  }
  0xde   : > { %v985_v5 = vpop.xlane.xlu0 %984 }
  0xdf   : > { %v989_v6 = vmul.f32 0.0078125, %v985_v5  ;;  %v9941_v5 = vld [vmem:[%s11926_s3 + $0x18] sm:$0xff]  }
  0xe1   : > { %v991_v7 = vsub.f32 %v975_v0, %v989_v6  ;;  %v9937_v0 = vld [vmem:[%s11926_s3 + $0x28] sm:$0xff]   ;;  %v9942_v6 = vld [vmem:[%s11926_s3 + $0x58] sm:$0xff]  }
  0xe2   : > { %v987_v8 = vpop.xlane.xlu0 %986 }
  0xe3   : > { %v990_v9 = vmul.f32 0.0078125, %v987_v8  ;;  %v993_v10 = vmul.f32 %v991_v7, %v991_v7  ;;  %v9944_v8 = vld [vmem:[%s11926_s3 + $0x50] sm:$0xff]  }
  0xe5   : > { %v992_v11 = vsub.f32 %v976_v1, %v990_v9  ;;  %995 = vadd.xlane.f32.xlu1 %v993_v10  ;;  %v9938_v1 = vld [vmem:[%s11926_s3 + $0x68] sm:$0xff]  }
  0xe6   : > { %v9945_v9 = vld [vmem:[%s11926_s3 + $0x8] sm:$0xff]  }
  0xe7   : > { %v994_v12 = vmul.f32 %v992_v11, %v992_v11  ;;  %v9946_v10 = vld [vmem:[%s11926_s3 + $0x48] sm:$0xff]  }
  0xe9   : > { %997 = vadd.xlane.f32.xlu1 %v994_v12  ;;  %v9948_v12 = vld [vmem:[%s11926_s3 + $0x40] sm:$0xff]  }
 0x16e   : > { %v996_v27 = vpop.xlane.xlu1 %995 }
 0x16f   : > { %v999_v28 = vmul.f32 0.0078125, %v996_v27  ;;  %v9963_v27 = vld [vmem:[%s11926_s3 + $0x80] sm:$0xff]  }
 0x171   : > { %v1001_v29 = vadd.f32 1e-05, %v999_v28  ;;  %v9964_v28 = vld [vmem:[%s11926_s3 + $0xc0] sm:$0xff]  }
 0x172   : > { %v998_v30 = vpop.xlane.xlu1 %997 }
 0x173   : > { %10293 = vrsqrt.f32 %v1001_v29  ;;  %v1000_v31 = vmul.f32 0.0078125, %v998_v30  ;;  %v9965_v29 = vld [vmem:[%s11923_s8 + $0x38] sm:$0xff]  }
 0x174   : > { %v9966_v30 = vld [vmem:[%s11923_s8 + $0x78] sm:$0xff]  }
 0x175   : > { %v1002_v32 = vadd.f32 1e-05, %v1000_v31  ;;  %v9967_v31 = vld [vmem:[%s11923_s8 + $0x30] sm:$0xff]  }
 0x177   : > { %10295 = vrsqrt.f32 %v1002_v32  ;;  %v9968_v32 = vld [vmem:[%s11923_s8 + $0x70] sm:$0xff]  }
 0x180   : > { %v10294_v33 = vpop.eup %10293 }
 0x181   : > { %v1005_v34 = vmul.f32 %v10294_v33, %v991_v7  ;;  %v9943_v7 = vld [vmem:[%s11926_s3 + $0x10] sm:$0xff]   ;;  %v9969_v33 = vld [vmem:[%s11923_s8 + $0x28] sm:$0xff]  }
 0x183   : > { %v1013_v37 = vmul.f32 %v7983_v35, %v1005_v34  ;;  %v9970_v34 = vld [vmem:[%s11923_s8 + $0x68] sm:$0xff]  }
 0x184   : > { %v10296_v36 = vpop.eup %10295 }
 0x185   : > { %v1006_v38 = vmul.f32 %v10296_v36, %v992_v11  ;;  %v1021_v41 = vadd.f32 %v7984_v39, %v1013_v37  ;;  %v9947_v11 = vld [vmem:[%s11926_s3] sm:$0xff]   ;;  %v9973_v37 = vld [vmem:[%s11923_s8 + $0x18] sm:$0xff]   ;;  %s11935_s3 = sld [smem:[#allocation14_spill]] }
 0x186   : > { %v9972_v36 = vld [vmem:[%s11923_s8 + $0x60] sm:$0xff]  }
 0x187   : > { %v1014_v40 = vmul.f32 %v7983_v35, %v1006_v38  ;;  %v9971_v35 = vld [vmem:[%s11923_s8 + $0x20] sm:$0xff]   ;;  %v9974_v38 = vld [vmem:[%s11923_s8 + $0x58] sm:$0xff]  }
 0x189   : > { %v1022_v42 = vadd.f32 %v7984_v39, %v1014_v40  ;;  %v9975_v39 = vld [vmem:[%s11923_s8 + $0x10] sm:$0xff]  }
 0x18a   : > { %v9976_v40 = vld [vmem:[%s11923_s8 + $0x50] sm:$0xff]  }
 0x18b   : > { %v10787_v45 = vpack.c.bf16 %v1022_v42, %v1021_v41  ;;  %v9977_v41 = vld [vmem:[%s11923_s8 + $0x8] sm:$0xff]  }
 0x18c   : > { %v9978_v42 = vld [vmem:[%s11923_s8 + $0x48] sm:$0xff]  }
 0x18d   : > { %8883 = vmatmul.mubr.bf16.vlgmr.msra.gmra.mxu0 %v10787_v45  ;;  %8903 = vmatmul.mubr.bf16.vlgmr.msra.gmra.mxu1 %v10787_v45 }
 0x18e   : > { %8907 = vmatpush3.bf16.msra.mxu0 %v9917_v43  ;;  %8927 = vmatpush3.bf16.msra.mxu1 %v9918_v44  ;;  %v9979_v43 = vld [vmem:[%s11923_s8] sm:$0xff]  }
 0x18f   : > { %8908 = vmatprep.subr.bf16.mxu0 %v10516_v4  ;;  %8928 = vmatprep.subr.bf16.mxu1 %v10516_v4  ;;  %v9980_v44 = vld [vmem:[%s11923_s8 + $0x40] sm:$0xff]  }
 0x190   : > { %8922 = vmatprep.mubr.msk.bf16.mxu0 %vm10517_vm0, %v10516_v4  ;;  %8942 = vmatprep.mubr.msk.bf16.mxu1 %vm10517_vm0, %v10516_v4 }
 0x192   : > { %8909 = vmatpush3.bf16.msra.mxu0 %v9919_v46  ;;  %8929 = vmatpush3.bf16.msra.mxu1 %v9920_v47  ;;  %v9981_v46 = vld [vmem:[%s11923_s8 + $0xb8] sm:$0xff]  }
 0x193   : > { %8910 = vmatprep.subr.bf16.mxu0 %v10516_v4  ;;  %8930 = vmatprep.subr.bf16.mxu1 %v10516_v4  ;;  %v9982_v47 = vld [vmem:[%s11923_s8 + $0xf8] sm:$0xff]  }
 0x196   : > { %8911 = vmatpush3.bf16.msra.mxu0 %v9921_v48  ;;  %8931 = vmatpush3.bf16.msra.mxu1 %v9922_v49  ;;  %v9983_v48 = vld [vmem:[%s11923_s8 + $0xb0] sm:$0xff]  }
 0x197   : > { %8912 = vmatprep.subr.bf16.mxu0 %v10516_v4  ;;  %8932 = vmatprep.subr.bf16.mxu1 %v10516_v4  ;;  %v9984_v49 = vld [vmem:[%s11923_s8 + $0xf0] sm:$0xff]  }
 0x19a   : > { %8913 = vmatpush3.bf16.msra.mxu0 %v9923_v50  ;;  %8933 = vmatpush3.bf16.msra.mxu1 %v9924_v51  ;;  %v9985_v50 = vld [vmem:[%s11923_s8 + $0xa8] sm:$0xff]  }
 0x19b   : > { %8914 = vmatprep.subr.bf16.mxu0 %v10516_v4  ;;  %8934 = vmatprep.subr.bf16.mxu1 %v10516_v4  ;;  %v9986_v51 = vld [vmem:[%s11923_s8 + $0xe8] sm:$0xff]  }
 0x19e   : > { %8915 = vmatpush3.bf16.msra.mxu0 %v9925_v52  ;;  %8935 = vmatpush3.bf16.msra.mxu1 %v9926_v53  ;;  %v9987_v52 = vld [vmem:[%s11923_s8 + $0xa0] sm:$0xff]  }
 0x19f   : > { %8916 = vmatprep.subr.bf16.mxu0 %v10516_v4  ;;  %8936 = vmatprep.subr.bf16.mxu1 %v10516_v4  ;;  %v9988_v53 = vld [vmem:[%s11923_s8 + $0xe0] sm:$0xff]  }
 0x1a2   : > { %8917 = vmatpush3.bf16.msra.mxu0 %v9927_v54  ;;  %8937 = vmatpush3.bf16.msra.mxu1 %v9928_v55  ;;  %v9989_v54 = vld [vmem:[%s11923_s8 + $0x98] sm:$0xff]  }
 0x1a3   : > { %8918 = vmatprep.subr.bf16.mxu0 %v10516_v4  ;;  %8938 = vmatprep.subr.bf16.mxu1 %v10516_v4  ;;  %v9990_v55 = vld [vmem:[%s11923_s8 + $0xd8] sm:$0xff]  }
 0x1a6   : > { %8919 = vmatpush3.bf16.msra.mxu0 %v9929_v56  ;;  %8939 = vmatpush3.bf16.msra.mxu1 %v9930_v57  ;;  %v9991_v56 = vld [vmem:[%s11923_s8 + $0x90] sm:$0xff]  }
 0x1a7   : > { %8920 = vmatprep.subr.bf16.mxu0 %v10516_v4  ;;  %8940 = vmatprep.subr.bf16.mxu1 %v10516_v4  ;;  %v9992_v57 = vld [vmem:[%s11923_s8 + $0xd0] sm:$0xff]  }
 0x1aa   : > { %8921 = vmatpush3.bf16.msra.mxu0 %v9931_v58  ;;  %8941 = vmatpush3.bf16.msra.mxu1 %v9932_v59  ;;  %v9993_v58 = vld [vmem:[%s11923_s8 + $0x88] sm:$0xff]  }
 0x1ab   : > { %8946 = vmatprep.subr.bf16.mxu0 %v10516_v4  ;;  %8966 = vmatprep.subr.bf16.mxu1 %v10516_v4  ;;  %v9994_v59 = vld [vmem:[%s11923_s8 + $0xc8] sm:$0xff]  }
 0x1ad   : > { %8923 = vmatmul.mubr.bf16.vlgmr.msra.gmra.mxu0 %v10787_v45  ;;  %8943 = vmatmul.mubr.bf16.vlgmr.msra.gmra.mxu1 %v10787_v45 }
 0x1ae   : > { %8947 = vmatpush3.bf16.msra.mxu0 %v9933_v60  ;;  %8967 = vmatpush3.bf16.msra.mxu1 %v9934_v61  ;;  %v9995_v60 = vld [vmem:[%s11923_s8 + $0x80] sm:$0xff]  }
 0x1af   : > { %8948 = vmatprep.subr.bf16.mxu0 %v10516_v4  ;;  %8968 = vmatprep.subr.bf16.mxu1 %v10516_v4  ;;  %v9996_v61 = vld [vmem:[%s11923_s8 + $0xc0] sm:$0xff]  }
 0x1b0   : > { %8962 = vmatprep.mubr.msk.bf16.mxu0 %vm10517_vm0, %v10516_v4  ;;  %8982 = vmatprep.mubr.msk.bf16.mxu1 %vm10517_vm0, %v10516_v4 }
 0x1b2   : > { %8949 = vmatpush3.bf16.msra.mxu0 %v9935_v62  ;;  %8969 = vmatpush3.bf16.msra.mxu1 %v9936_v63 }
 0x1b3   : > { %8950 = vmatprep.subr.bf16.mxu0 %v10516_v4  ;;  %8970 = vmatprep.subr.bf16.mxu1 %v10516_v4 }
 0x1b6   : > { %8951 = vmatpush3.bf16.msra.mxu0 %v9937_v0  ;;  %8971 = vmatpush3.bf16.msra.mxu1 %v9938_v1 }
 0x1b7   : > { %8952 = vmatprep.subr.bf16.mxu0 %v10516_v4  ;;  %8972 = vmatprep.subr.bf16.mxu1 %v10516_v4 }
 0x1ba   : > { %8953 = vmatpush3.bf16.msra.mxu0 %v9939_v2  ;;  %8973 = vmatpush3.bf16.msra.mxu1 %v9940_v3 }
 0x1bb   : > { %8954 = vmatprep.subr.bf16.mxu0 %v10516_v4  ;;  %8974 = vmatprep.subr.bf16.mxu1 %v10516_v4 }
 0x1be   : > { %8955 = vmatpush3.bf16.msra.mxu0 %v9941_v5  ;;  %8975 = vmatpush3.bf16.msra.mxu1 %v9942_v6 }
 0x1bf   : > { %8956 = vmatprep.subr.bf16.mxu0 %v10516_v4  ;;  %8976 = vmatprep.subr.bf16.mxu1 %v10516_v4 }
 0x1c2   : > { %8957 = vmatpush3.bf16.msra.mxu0 %v9943_v7  ;;  %8977 = vmatpush3.bf16.msra.mxu1 %v9944_v8 }
 0x1c3   : > { %8958 = vmatprep.subr.bf16.mxu0 %v10516_v4  ;;  %8978 = vmatprep.subr.bf16.mxu1 %v10516_v4 }
 0x1c6   : > { %8959 = vmatpush3.bf16.msra.mxu0 %v9945_v9  ;;  %8979 = vmatpush3.bf16.msra.mxu1 %v9946_v10 }
 0x1c7   : > { %8960 = vmatprep.subr.bf16.mxu0 %v10516_v4  ;;  %8980 = vmatprep.subr.bf16.mxu1 %v10516_v4 }
 0x1ca   : > { %8961 = vmatpush3.bf16.msra.mxu0 %v9947_v11  ;;  %8981 = vmatpush3.bf16.msra.mxu1 %v9948_v12 }
 0x1cb   : > { %8986 = vmatprep.subr.bf16.mxu0 %v10516_v4  ;;  %9006 = vmatprep.subr.bf16.mxu1 %v10516_v4 }
 0x1cd   : > { %8963 = vmatmul.mubr.bf16.vlgmr.msra.gmra.mxu0 %v10787_v45  ;;  %8983 = vmatmul.mubr.bf16.vlgmr.msra.gmra.mxu1 %v10787_v45 }
 0x1ce   : > { %8987 = vmatpush3.bf16.msra.mxu0 %v9949_v13  ;;  %9007 = vmatpush3.bf16.msra.mxu1 %v9950_v14 }
 0x1cf   : > { %8988 = vmatprep.subr.bf16.mxu0 %v10516_v4  ;;  %9008 = vmatprep.subr.bf16.mxu1 %v10516_v4 }
 0x1d0   : > { %9002 = vmatprep.mubr.msk.bf16.mxu0 %vm10517_vm0, %v10516_v4  ;;  %9022 = vmatprep.mubr.msk.bf16.mxu1 %vm10517_vm0, %v10516_v4 }
 0x1d2   : > { %8989 = vmatpush3.bf16.msra.mxu0 %v9951_v15  ;;  %9009 = vmatpush3.bf16.msra.mxu1 %v9952_v16 }
 0x1d3   : > { %8990 = vmatprep.subr.bf16.mxu0 %v10516_v4  ;;  %9010 = vmatprep.subr.bf16.mxu1 %v10516_v4 }
 0x1d6   : > { %8991 = vmatpush3.bf16.msra.mxu0 %v9953_v17  ;;  %9011 = vmatpush3.bf16.msra.mxu1 %v9954_v18 }
 0x1d7   : > { %8992 = vmatprep.subr.bf16.mxu0 %v10516_v4  ;;  %9012 = vmatprep.subr.bf16.mxu1 %v10516_v4 }
 0x1da   : > { %8993 = vmatpush3.bf16.msra.mxu0 %v9955_v19  ;;  %9013 = vmatpush3.bf16.msra.mxu1 %v9956_v20 }
 0x1db   : > { %8994 = vmatprep.subr.bf16.mxu0 %v10516_v4  ;;  %9014 = vmatprep.subr.bf16.mxu1 %v10516_v4 }
 0x1de   : > { %8995 = vmatpush3.bf16.msra.mxu0 %v9957_v21  ;;  %9015 = vmatpush3.bf16.msra.mxu1 %v9958_v22 }
 0x1df   : > { %8996 = vmatprep.subr.bf16.mxu0 %v10516_v4  ;;  %9016 = vmatprep.subr.bf16.mxu1 %v10516_v4 }
 0x1e2   : > { %8997 = vmatpush3.bf16.msra.mxu0 %v9959_v23  ;;  %9017 = vmatpush3.bf16.msra.mxu1 %v9960_v24 }
 0x1e3   : > { %8998 = vmatprep.subr.bf16.mxu0 %v10516_v4  ;;  %9018 = vmatprep.subr.bf16.mxu1 %v10516_v4 }
 0x1e6   : > { %8999 = vmatpush3.bf16.msra.mxu0 %v9961_v25  ;;  %9019 = vmatpush3.bf16.msra.mxu1 %v9962_v26 }
 0x1e7   : > { %9000 = vmatprep.subr.bf16.mxu0 %v10516_v4  ;;  %9020 = vmatprep.subr.bf16.mxu1 %v10516_v4 }
 0x1ea   : > { %9001 = vmatpush3.bf16.msra.mxu0 %v9963_v27  ;;  %9021 = vmatpush3.bf16.msra.mxu1 %v9964_v28 }
 0x1eb   : > { %9026 = vmatprep.subr.bf16.mxu0 %v10516_v4  ;;  %9046 = vmatprep.subr.bf16.mxu1 %v10516_v4 }
 0x1ed   : > { %9003 = vmatmul.mubr.bf16.vlgmr.msra.gmra.mxu0 %v10787_v45  ;;  %9023 = vmatmul.mubr.bf16.vlgmr.msra.gmra.mxu1 %v10787_v45 }
 0x1ee   : > { %9027 = vmatpush3.bf16.msra.mxu0 %v9965_v29  ;;  %9047 = vmatpush3.bf16.msra.mxu1 %v9966_v30 }
 0x1ef   : > { %9028 = vmatprep.subr.bf16.mxu0 %v10516_v4  ;;  %9048 = vmatprep.subr.bf16.mxu1 %v10516_v4 }
 0x1f0   : > { %9042 = vmatprep.mubr.msk.bf16.mxu0 %vm10517_vm0, %v10516_v4  ;;  %9062 = vmatprep.mubr.msk.bf16.mxu1 %vm10517_vm0, %v10516_v4 }
 0x1f2   : > { %9029 = vmatpush3.bf16.msra.mxu0 %v9967_v31  ;;  %9049 = vmatpush3.bf16.msra.mxu1 %v9968_v32 }
 0x1f3   : > { %9030 = vmatprep.subr.bf16.mxu0 %v10516_v4  ;;  %9050 = vmatprep.subr.bf16.mxu1 %v10516_v4 }
 0x1f6   : > { %9031 = vmatpush3.bf16.msra.mxu0 %v9969_v33  ;;  %9051 = vmatpush3.bf16.msra.mxu1 %v9970_v34 }
 0x1f7   : > { %9032 = vmatprep.subr.bf16.mxu0 %v10516_v4  ;;  %9052 = vmatprep.subr.bf16.mxu1 %v10516_v4 }
 0x1fa   : > { %9033 = vmatpush3.bf16.msra.mxu0 %v9971_v35  ;;  %9053 = vmatpush3.bf16.msra.mxu1 %v9972_v36 }
 0x1fb   : > { %9034 = vmatprep.subr.bf16.mxu0 %v10516_v4  ;;  %9054 = vmatprep.subr.bf16.mxu1 %v10516_v4 }
 0x1fe   : > { %9035 = vmatpush3.bf16.msra.mxu0 %v9973_v37  ;;  %9055 = vmatpush3.bf16.msra.mxu1 %v9974_v38 }
 0x1ff   : > { %9036 = vmatprep.subr.bf16.mxu0 %v10516_v4  ;;  %9056 = vmatprep.subr.bf16.mxu1 %v10516_v4 }
 0x202   : > { %9037 = vmatpush3.bf16.msra.mxu0 %v9975_v39  ;;  %9057 = vmatpush3.bf16.msra.mxu1 %v9976_v40 }
 0x203   : > { %9038 = vmatprep.subr.bf16.mxu0 %v10516_v4  ;;  %9058 = vmatprep.subr.bf16.mxu1 %v10516_v4 }
 0x206   : > { %9039 = vmatpush3.bf16.msra.mxu0 %v9977_v41  ;;  %9059 = vmatpush3.bf16.msra.mxu1 %v9978_v42 }
 0x207   : > { %9040 = vmatprep.subr.bf16.mxu0 %v10516_v4  ;;  %9060 = vmatprep.subr.bf16.mxu1 %v10516_v4 }
 0x20a   : > { %9041 = vmatpush3.bf16.msra.mxu0 %v9979_v43  ;;  %9061 = vmatpush3.bf16.msra.mxu1 %v9980_v44 }
 0x20b   : > { %9066 = vmatprep.subr.bf16.mxu0 %v10516_v4  ;;  %9086 = vmatprep.subr.bf16.mxu1 %v10516_v4 }
 0x20d   : > { %9043 = vmatmul.mubr.bf16.vlgmr.msra.gmra.mxu0 %v10787_v45  ;;  %9063 = vmatmul.mubr.bf16.vlgmr.msra.gmra.mxu1 %v10787_v45 }
 0x20e   : > { %9067 = vmatpush3.bf16.msra.mxu0 %v9981_v46  ;;  %9087 = vmatpush3.bf16.msra.mxu1 %v9982_v47 }
 0x20f   : > { %9068 = vmatprep.subr.bf16.mxu0 %v10516_v4  ;;  %9088 = vmatprep.subr.bf16.mxu1 %v10516_v4 }
 0x210   : > { %9082 = vmatprep.mubr.msk.bf16.mxu0 %vm10517_vm0, %v10516_v4  ;;  %9102 = vmatprep.mubr.msk.bf16.mxu1 %vm10517_vm0, %v10516_v4 }
 0x212   : > { %9069 = vmatpush3.bf16.msra.mxu0 %v9983_v48  ;;  %9089 = vmatpush3.bf16.msra.mxu1 %v9984_v49 }
 0x213   : > { %9070 = vmatprep.subr.bf16.mxu0 %v10516_v4  ;;  %9090 = vmatprep.subr.bf16.mxu1 %v10516_v4 }
 0x216   : > { %9071 = vmatpush3.bf16.msra.mxu0 %v9985_v50  ;;  %9091 = vmatpush3.bf16.msra.mxu1 %v9986_v51 }
 0x217   : > { %9072 = vmatprep.subr.bf16.mxu0 %v10516_v4  ;;  %9092 = vmatprep.subr.bf16.mxu1 %v10516_v4 }
 0x21a   : > { %9073 = vmatpush3.bf16.msra.mxu0 %v9987_v52  ;;  %9093 = vmatpush3.bf16.msra.mxu1 %v9988_v53 }
 0x21b   : > { %9074 = vmatprep.subr.bf16.mxu0 %v10516_v4  ;;  %9094 = vmatprep.subr.bf16.mxu1 %v10516_v4 }
 0x21e   : > { %9075 = vmatpush3.bf16.msra.mxu0 %v9989_v54  ;;  %9095 = vmatpush3.bf16.msra.mxu1 %v9990_v55 }
 0x21f   : > { %9076 = vmatprep.subr.bf16.mxu0 %v10516_v4  ;;  %9096 = vmatprep.subr.bf16.mxu1 %v10516_v4 }
 0x222   : > { %9077 = vmatpush3.bf16.msra.mxu0 %v9991_v56  ;;  %9097 = vmatpush3.bf16.msra.mxu1 %v9992_v57 }
 0x223   : > { %9078 = vmatprep.subr.bf16.mxu0 %v10516_v4  ;;  %9098 = vmatprep.subr.bf16.mxu1 %v10516_v4 }
 0x226   : > { %9079 = vmatpush3.bf16.msra.mxu0 %v9993_v58  ;;  %9099 = vmatpush3.bf16.msra.mxu1 %v9994_v59 }
 0x227   : > { %9080 = vmatprep.subr.bf16.mxu0 %v10516_v4  ;;  %9100 = vmatprep.subr.bf16.mxu1 %v10516_v4 }
 0x22a   : > { %9081 = vmatpush3.bf16.msra.mxu0 %v9995_v60  ;;  %9101 = vmatpush3.bf16.msra.mxu1 %v9996_v61 }
 0x22b   : > { %9106 = vmatprep.subr.bf16.mxu0 %v10516_v4  ;;  %9112 = vmatprep.subr.bf16.mxu1 %v10516_v4 }
 0x22d   : > { %9083 = vmatmul.mubr.bf16.vlgmr.msra.gmra.mxu0 %v10787_v45  ;;  %9103 = vmatmul.mubr.bf16.vlgmr.msra.gmra.mxu1 %v10787_v45 }
 0x22e   : > { %9108 = vmatprep.mubr.msk.bf16.mxu0 %vm10517_vm0, %v10516_v4  ;;  %9114 = vmatprep.mubr.msk.bf16.mxu1 %vm10517_vm0, %v10516_v4 }
 0x24d   : > { %v1170_v62 = vpop.f32.mrf.mxu0  ;;  %v1259_v63 = vpop.f32.mrf.mxu1 }
 0x24f   : > { %v8884_v0 = vpop.f32.mrf.mxu0  ;;  %v8904_v1 = vpop.f32.mrf.mxu1 }
 0x250   : > { %v978_v1 = vld [vmem:[%s10540_s13] sm:$0xff] }
 0x251   : > { %v1173_v2 = vpop.f32.mrf.mxu0  ;;  %v1262_v3 = vpop.f32.mrf.mxu1 }
 0x252   : > { %v2284_v5 = vpack.c.bf16 %v1173_v2, %v1170_v62  ;;  %v2285_v6 = vpack.c.bf16 %v1262_v3, %v1259_v63 }
 0x253   : > { %v8885_v7 = vpop.f32.mrf.mxu0  ;;  %v8905_v8 = vpop.f32.mrf.mxu1 }
 0x26d   : > { %v1348_v9 = vpop.f32.mrf.mxu0  ;;  %v1437_v10 = vpop.f32.mrf.mxu1 }
 0x26f   : > { %v8924_v11 = vpop.f32.mrf.mxu0  ;;  %v8944_v45 = vpop.f32.mrf.mxu1 }
 0x271   : > { %v1351_v12 = vpop.f32.mrf.mxu0  ;;  %v1440_v13 = vpop.f32.mrf.mxu1 }
 0x272   : > { %v2286_v14 = vpack.c.bf16 %v1351_v12, %v1348_v9  ;;  %v2287_v15 = vpack.c.bf16 %v1440_v13, %v1437_v10  ;;  %v979_v10 = vld [vmem:[%s10540_s13 + $0x8] sm:$0xff] }
 0x273   : > { %v8925_v16 = vpop.f32.mrf.mxu0  ;;  %v8945_v17 = vpop.f32.mrf.mxu1 }
 0x28d   : > { %v1590_v18 = vpop.f32.mrf.mxu0  ;;  %v1679_v19 = vpop.f32.mrf.mxu1 }
 0x28f   : > { %v8964_v20 = vpop.f32.mrf.mxu0  ;;  %v8984_v21 = vpop.f32.mrf.mxu1 }
 0x291   : > { %v1593_v22 = vpop.f32.mrf.mxu0  ;;  %v1682_v23 = vpop.f32.mrf.mxu1 }
 0x292   : > { %v2288_v24 = vpack.c.bf16 %v1593_v22, %v1590_v18  ;;  %v2289_v25 = vpack.c.bf16 %v1682_v23, %v1679_v19 }
 0x293   : > { %v8965_v26 = vpop.f32.mrf.mxu0  ;;  %v8985_v27 = vpop.f32.mrf.mxu1 }
 0x294   : > { %v2297_v28 = vsel %vm2292_vm1, %v2288_v24, 0  ;;  %v2344_v29 = vsel %vm2292_vm1, %v2289_v25, 0 }
 0x295   : > { %9107 = vmatpush3.bf16.xpose.msra.mxu0 %v2297_v28  ;;  %9113 = vmatpush3.bf16.xpose.msra.mxu1 %v2344_v29 }
 0x296   : > { %9118 = vmatprep.subr.bf16.mxu0 %v10516_v4  ;;  %9124 = vmatprep.subr.bf16.mxu1 %v10516_v4 }
 0x29c   : > { %9109 = vmatmul.mubr.msk.bf16.vlgmr.msra.gmra.mxu0 %vm2292_vm1, %v2284_v5  ;;  %9115 = vmatmul.mubr.msk.bf16.vlgmr.msra.gmra.mxu1 %vm2292_vm1, %v2285_v6 }
 0x29d   : > { %9120 = vmatprep.mubr.msk.bf16.mxu0 %vm10517_vm0, %v10516_v4  ;;  %9126 = vmatprep.mubr.msk.bf16.mxu1 %vm10517_vm0, %v10516_v4 }
 0x2ad   : > { %v1768_v30 = vpop.f32.mrf.mxu0  ;;  %v1857_v31 = vpop.f32.mrf.mxu1 }
 0x2af   : > { %v9004_v32 = vpop.f32.mrf.mxu0  ;;  %v9024_v33 = vpop.f32.mrf.mxu1 }
 0x2b1   : > { %v1771_v34 = vpop.f32.mrf.mxu0  ;;  %v1860_v35 = vpop.f32.mrf.mxu1 }
 0x2b2   : > { %v2290_v36 = vpack.c.bf16 %v1771_v34, %v1768_v30  ;;  %v2291_v37 = vpack.c.bf16 %v1860_v35, %v1857_v31 }
 0x2b3   : > { %v9005_v38 = vpop.f32.mrf.mxu0  ;;  %v9025_v39 = vpop.f32.mrf.mxu1 }
 0x2b4   : > { %v2391_v40 = vsel %vm2292_vm1, %v2290_v36, 0  ;;  %v2438_v41 = vsel %vm2292_vm1, %v2291_v37, 0 }
 0x2b5   : > { %9119 = vmatpush3.bf16.xpose.msra.mxu0 %v2391_v40  ;;  %9125 = vmatpush3.bf16.xpose.msra.mxu1 %v2438_v41 }
 0x2b6   : > { %9130 = vmatprep.subr.bf16.mxu0 %v10516_v4  ;;  %9136 = vmatprep.subr.bf16.mxu1 %v10516_v4 }
 0x2bc   : > { %9121 = vmatmul.mubr.msk.bf16.vlgmr.msra.gmra.mxu0 %vm2292_vm1, %v2286_v14  ;;  %9127 = vmatmul.mubr.msk.bf16.vlgmr.msra.gmra.mxu1 %vm2292_vm1, %v2287_v15 }
 0x2bd   : > { %9132 = vmatprep.mubr.msk.bf16.mxu0 %vm10517_vm0, %v10516_v4  ;;  %9138 = vmatprep.mubr.msk.bf16.mxu1 %vm10517_vm0, %v10516_v4 }
 0x2cd   : > { %v2010_v42 = vpop.f32.mrf.mxu0  ;;  %v2099_v43 = vpop.f32.mrf.mxu1 }
 0x2cf   : > { %v9044_v44 = vpop.f32.mrf.mxu0  ;;  %v9064_v46 = vpop.f32.mrf.mxu1 }
 0x2d1   : > { %v2013_v47 = vpop.f32.mrf.mxu0  ;;  %v2102_v48 = vpop.f32.mrf.mxu1 }
 0x2d2   : > { %v2574_v49 = vpack.c.bf16 %v2013_v47, %v2010_v42  ;;  %v2575_v50 = vpack.c.bf16 %v2102_v48, %v2099_v43 }
 0x2d3   : > { %v9045_v51 = vpop.f32.mrf.mxu0  ;;  %v9065_v52 = vpop.f32.mrf.mxu1 }
 0x2d4   : > { %9131 = vmatpush3.bf16.msra.mxu0 %v2574_v49  ;;  %9137 = vmatpush3.bf16.msra.mxu1 %v2575_v50 }
 0x2d5   : > { %9142 = vmatprep.subr.bf16.mxu0 %v10516_v4  ;;  %9148 = vmatprep.subr.bf16.mxu1 %v10516_v4 }
 0x2ed   : > { %v11005_v53 = vpop.f32.mrf.mxu0  ;;  %v11007_v54 = vpop.f32.mrf.mxu1 }
 0x2ef   : > { %v9084_v55 = vpop.f32.mrf.mxu0  ;;  %v9104_v56 = vpop.f32.mrf.mxu1 }
 0x2f1   : > { %v11009_v57 = vpop.f32.mrf.mxu0  ;;  %v11011_v58 = vpop.f32.mrf.mxu1 }
 0x2f2   : > { %v2576_v59 = vpack.c.bf16 %v11009_v57, %v11005_v53  ;;  %v2577_v60 = vpack.c.bf16 %v11011_v58, %v11007_v54 }
 0x2f3   : > { %v9085_v61 = vpop.f32.mrf.mxu0  ;;  %v9105_v62 = vpop.f32.mrf.mxu1 }
 0x35c   : > { %v2333_v63 = vpop.f32.mrf.mxu0  ;;  %v2380_v0 = vpop.f32.mrf.mxu1 }
 0x35d   : > { %v2481_v2 = vmul.f32 0.17677669, %v2333_v63  ;;  %v2483_v3 = vmul.f32 0.17677669, %v2380_v0 }
 0x35e   : > { %v9110_v5 = vpop.f32.mrf.mxu0  ;;  %v9116_v6 = vpop.f32.mrf.mxu1 }
 0x35f   : > { %v2489_v7 = vadd.f32 %v2481_v2, %v978_v1  ;;  %v2491_v13 = vadd.f32 %v2483_v3, %v978_v1 }
 0x360   : > { %v2336_v8 = vpop.f32.mrf.mxu0  ;;  %v2383_v9 = vpop.f32.mrf.mxu1 }
 0x361   : > { %v2482_v11 = vmul.f32 0.17677669, %v2336_v8  ;;  %v2484_v45 = vmul.f32 0.17677669, %v2383_v9  ;;  %v2498_v12 = vsel %vm2497_vm2, %v2489_v7, -inf  ;;  %v2504_v17 = vsel %vm2497_vm2, %v2491_v13, -inf }
 0x362   : > { %v9117_v14 = vpop.f32.mrf.mxu1  ;;  %2499 = vmax.xlane.f32.xlu0 %v2498_v12  ;;  %v9111_v15 = vpop.f32.mrf.mxu0 }
 0x363   : > { %v2490_v16 = vadd.f32 %v2482_v11, %v979_v10  ;;  %v2492_v19 = vadd.f32 %v2484_v45, %v979_v10 }
 0x365   : > { %v2501_v18 = vsel %vm2497_vm2, %v2490_v16, -inf  ;;  %v2507_v20 = vsel %vm2497_vm2, %v2492_v19, -inf }
 0x366   : > { %2505 = vmax.xlane.f32.xlu0 %v2504_v17  ;;  %2502 = vmax.xlane.f32.xlu1 %v2501_v18 }
 0x36a   : > { %2508 = vmax.xlane.f32.xlu1 %v2507_v20 }
 0x37c   : > { %v2427_v21 = vpop.f32.mrf.mxu0  ;;  %v2474_v22 = vpop.f32.mrf.mxu1 }
 0x37d   : > { %v2485_v23 = vmul.f32 0.17677669, %v2427_v21  ;;  %v2487_v24 = vmul.f32 0.17677669, %v2474_v22  ;;  %v9997_v22 = vld [vmem:[%s10575_s14 + $0x8] sm:$0xff]  }
 0x37e   : > { %v9122_v25 = vpop.f32.mrf.mxu0  ;;  %v9128_v26 = vpop.f32.mrf.mxu1 }
 0x37f   : > { %v2493_v27 = vadd.f32 %v2485_v23, %v978_v1  ;;  %v2495_v33 = vadd.f32 %v2487_v24, %v978_v1  ;;  %v9998_v23 = vld [vmem:[%s10575_s14] sm:$0xff]   ;;  %v9999_v24 = vld [vmem:[%s10575_s14 + $0x18] sm:$0xff]   ;;  %v10000_v25 = vld [vmem:[%s10575_s14 + $0x10] sm:$0xff]  }
 0x380   : > { %v2430_v28 = vpop.f32.mrf.mxu0  ;;  %v2477_v29 = vpop.f32.mrf.mxu1 }
 0x381   : > { %v2486_v30 = vmul.f32 0.17677669, %v2430_v28  ;;  %v2488_v31 = vmul.f32 0.17677669, %v2477_v29  ;;  %v2510_v32 = vsel %vm2497_vm2, %v2493_v27, -inf  ;;  %v2516_v37 = vsel %vm2497_vm2, %v2495_v33, -inf }
 0x382   : > { %v9129_v34 = vpop.f32.mrf.mxu1  ;;  %2511 = vmax.xlane.f32.xlu0 %v2510_v32  ;;  %v9123_v35 = vpop.f32.mrf.mxu0 }
 0x383   : > { %v2494_v36 = vadd.f32 %v2486_v30, %v979_v10  ;;  %v2496_v39 = vadd.f32 %v2488_v31, %v979_v10 }
 0x385   : > { %v2513_v38 = vsel %vm2497_vm2, %v2494_v36, -inf  ;;  %v2519_v40 = vsel %vm2497_vm2, %v2496_v39, -inf }
 0x386   : > { %2517 = vmax.xlane.f32.xlu0 %v2516_v37  ;;  %2514 = vmax.xlane.f32.xlu1 %v2513_v38 }
 0x38a   : > { %2520 = vmax.xlane.f32.xlu1 %v2519_v40 }
 0x3eb   : > { %v2500_v41 = vpop.xlane.xlu0 %2499 }
 0x3ec   : > { %v2522_v42 = vsub.f32 %v2489_v7, %v2500_v41  ;;  %v10001_v41 = vld [vmem:[%s10575_s14 + $0x28] sm:$0xff]  }
 0x3ee   : > { %v2530_v43 = vmul.f32 1.442695, %v2522_v42 }
 0x3ef   : > { %v2506_v44 = vpop.xlane.xlu0 %2505  ;;  %v2503_v46 = vpop.xlane.xlu1 %2502 }
 0x3f0   : > { %10297 = vpow2.f32 %v2530_v43  ;;  %v2524_v47 = vsub.f32 %v2491_v13, %v2506_v44  ;;  %v2523_v48 = vsub.f32 %v2490_v16, %v2503_v46 }
 0x3f2   : > { %v2534_v49 = vmul.f32 1.442695, %v2524_v47  ;;  %v2532_v50 = vmul.f32 1.442695, %v2523_v48 }
 0x3f3   : > { %v2509_v51 = vpop.xlane.xlu1 %2508 }
 0x3f4   : > { %10299 = vpow2.f32 %v2534_v49  ;;  %v2525_v52 = vsub.f32 %v2492_v19, %v2509_v51  ;;  %v10003_v49 = vld [vmem:[%s10575_s14 + $0x38] sm:$0xff]   ;;  %v10002_v51 = vld [vmem:[%s10575_s14 + $0x20] sm:$0xff]  }
 0x3f5   : > { %10301 = vpow2.f32 %v2532_v50 }
 0x3f6   : > { %v2536_v55 = vmul.f32 1.442695, %v2525_v52  ;;  %v10004_v52 = vld [vmem:[%s10575_s14 + $0x30] sm:$0xff]  }
 0x3f8   : > { %10303 = vpow2.f32 %v2536_v55 }
 0x3fd   : > { %v10298_v56 = vpop.eup %10297 }
 0x3fe   : > { %v2546_v61 = vsel %vm2497_vm2, %v10298_v56, 0.0 }
 0x3ff   : > { %2547 = vadd.xlane.f32.xlu0 %v2546_v61 }
 0x401   : > { %v10300_v62 = vpop.eup %10299 }
 0x402   : > { %v10302_v63 = vpop.eup %10301  ;;  %v2552_v0 = vsel %vm2497_vm2, %v10300_v62, 0.0 }
 0x403   : > { %2553 = vadd.xlane.f32.xlu0 %v2552_v0  ;;  %v2549_v1 = vsel %vm2497_vm2, %v10302_v63, 0.0  ;;  %v2570_v2 = vpack.c.bf16 %v10302_v63, %v10298_v56 }
 0x404   : > { %2550 = vadd.xlane.f32.xlu1 %v2549_v1 }
 0x405   : > { %v10304_v3 = vpop.eup %10303  ;;  %9133 = vmatmul.mubr.msk.bf16.vlgmr.msra.gmra.mxu0 %vm2497_vm2, %v2570_v2 }
 0x406   : > { %9143 = vmatpush3.bf16.msra.mxu0 %v2576_v59  ;;  %v2555_v5 = vsel %vm2497_vm2, %v10304_v3, 0.0  ;;  %v2571_v6 = vpack.c.bf16 %v10304_v3, %v10300_v62  ;;  %9144 = vmatprep.mubr.msk.bf16.mxu0 %vm10517_vm0, %v10516_v4 }
 0x407   : > { %9154 = vmatprep.subr.bf16.mxu0 %v10516_v4 }
 0x408   : > { %2556 = vadd.xlane.f32.xlu1 %v2555_v5  ;;  %9139 = vmatmul.mubr.msk.bf16.vlgmr.msra.gmra.mxu1 %vm2497_vm2, %v2571_v6 }
 0x409   : > { %9149 = vmatpush3.bf16.msra.mxu1 %v2577_v60  ;;  %9150 = vmatprep.mubr.msk.bf16.mxu1 %vm10517_vm0, %v10516_v4 }
 0x40a   : > { %9162 = vmatprep.subr.bf16.mxu1 %v10516_v4 }
 0x40b   : > { %v2512_v53 = vpop.xlane.xlu0 %2511 }
 0x40c   : > { %v2526_v57 = vsub.f32 %v2493_v27, %v2512_v53 }
 0x40e   : > { %v2538_v59 = vmul.f32 1.442695, %v2526_v57 }
 0x40f   : > { %v2518_v7 = vpop.xlane.xlu0 %2517  ;;  %v2515_v8 = vpop.xlane.xlu1 %2514 }
 0x410   : > { %10305 = vpow2.f32 %v2538_v59  ;;  %v2528_v9 = vsub.f32 %v2495_v33, %v2518_v7  ;;  %v2527_v10 = vsub.f32 %v2494_v36, %v2515_v8 }
 0x412   : > { %v2542_v11 = vmul.f32 1.442695, %v2528_v9  ;;  %v2540_v45 = vmul.f32 1.442695, %v2527_v10 }
 0x413   : > { %v2521_v12 = vpop.xlane.xlu1 %2520 }
 0x414   : > { %10307 = vpow2.f32 %v2542_v11  ;;  %v2529_v13 = vsub.f32 %v2496_v39, %v2521_v12 }
 0x415   : > { %10309 = vpow2.f32 %v2540_v45 }
 0x416   : > { %v2544_v54 = vmul.f32 1.442695, %v2529_v13 }
 0x418   : > { %10311 = vpow2.f32 %v2544_v54 }
 0x41d   : > { %v10306_v58 = vpop.eup %10305 }
 0x41e   : > { %v2558_v60 = vsel %vm2497_vm2, %v10306_v58, 0.0 }
 0x41f   : > { %2559 = vadd.xlane.f32.xlu0 %v2558_v60 }
 0x421   : > { %v10308_v14 = vpop.eup %10307 }
 0x422   : > { %v10310_v15 = vpop.eup %10309  ;;  %v2564_v16 = vsel %vm2497_vm2, %v10308_v14, 0.0 }
 0x423   : > { %2565 = vadd.xlane.f32.xlu0 %v2564_v16  ;;  %v2561_v17 = vsel %vm2497_vm2, %v10310_v15, 0.0  ;;  %v2572_v18 = vpack.c.bf16 %v10310_v15, %v10306_v58 }
 0x424   : > { %2562 = vadd.xlane.f32.xlu1 %v2561_v17 }
 0x425   : > { %v10312_v19 = vpop.eup %10311  ;;  %9145 = vmatmul.mubr.msk.bf16.vlgmr.msra.gmra.mxu0 %vm2497_vm2, %v2572_v18 }
 0x426   : > { %v2567_v20 = vsel %vm2497_vm2, %v10312_v19, 0.0  ;;  %v2573_v21 = vpack.c.bf16 %v10312_v19, %v10308_v14  ;;  %9158 = vmatprep.mubr.msk.bf16.mxu0 %vm10517_vm0, %v10516_v4  ;;  %9155 = vmatpush3.bf16.msra.mxu0 %v9997_v22 }
 0x427   : > { %9156 = vmatprep.subr.bf16.mxu0 %v10516_v4 }
 0x428   : > { %2568 = vadd.xlane.f32.xlu1 %v2567_v20  ;;  %9151 = vmatmul.mubr.msk.bf16.vlgmr.msra.gmra.mxu1 %vm2497_vm2, %v2573_v21 }
 0x429   : > { %9166 = vmatprep.mubr.msk.bf16.mxu1 %vm10517_vm0, %v10516_v4  ;;  %9163 = vmatpush3.bf16.msra.mxu1 %v9999_v24  ;;  %v8101_v24 = vld [vmem:[%s10580_s19] ss:$0 sm:$0xff] }
 0x42a   : > { %9157 = vmatpush3.bf16.msra.mxu0 %v9998_v23  ;;  %9164 = vmatprep.subr.bf16.mxu1 %v10516_v4 }
 0x42b   : > { %9170 = vmatprep.subr.bf16.mxu0 %v10516_v4 }
 0x42d   : > { %9165 = vmatpush3.bf16.msra.mxu1 %v10000_v25 }
 0x42e   : > { %9178 = vmatprep.subr.bf16.mxu1 %v10516_v4 }
 0x488   : > { %v2548_v26 = vpop.xlane.xlu0 %2547 }
 0x489   : > { %10313 = vrcp.f32 %v2548_v26 }
 0x48c   : > { %v2554_v28 = vpop.xlane.xlu0 %2553 }
 0x48d   : > { %v2551_v27 = vpop.xlane.xlu1 %2550 }
 0x48e   : > { %10315 = vrcp.f32 %v2551_v27 }
 0x48f   : > { %10317 = vrcp.f32 %v2554_v28 }
 0x491   : > { %v2557_v29 = vpop.xlane.xlu1 %2556 }
 0x492   : > { %10319 = vrcp.f32 %v2557_v29 }
 0x496   : > { %v10314_v32 = vpop.eup %10313 }
 0x49b   : > { %v10316_v34 = vpop.eup %10315 }
 0x49c   : > { %v10318_v39 = vpop.eup %10317 }
 0x49f   : > { %v10320_v42 = vpop.eup %10319 }
 0x4a8   : > { %v2560_v55 = vpop.xlane.xlu0 %2559 }
 0x4a9   : > { %10321 = vrcp.f32 %v2560_v55  ;;  %v10009_v55 = vld [vmem:[%s11924_s6 + $0x28] sm:$0xff]  }
 0x4ac   : > { %v2566_v61 = vpop.xlane.xlu0 %2565 }
 0x4ad   : > { %v2563_v56 = vpop.xlane.xlu1 %2562 }
 0x4ae   : > { %10323 = vrcp.f32 %v2563_v56  ;;  %v10010_v56 = vld [vmem:[%s11924_s6 + $0x68] sm:$0xff]  }
 0x4af   : > { %10325 = vrcp.f32 %v2566_v61  ;;  %v10011_v61 = vld [vmem:[%s11924_s6 + $0x20] sm:$0xff]  }
 0x4b1   : > { %v2569_v62 = vpop.xlane.xlu1 %2568 }
 0x4b2   : > { %10327 = vrcp.f32 %v2569_v62  ;;  %v10012_v62 = vld [vmem:[%s11924_s6 + $0x60] sm:$0xff]  }
 0x4b6   : > { %v10322_v1 = vpop.eup %10321 }
 0x4bb   : > { %v10324_v3 = vpop.eup %10323 }
 0x4bc   : > { %v10326_v59 = vpop.eup %10325 }
 0x4bf   : > { %v10328_v8 = vpop.eup %10327 }
 0x4c5   : > { %v2615_v30 = vpop.f32.mrf.mxu0 }
 0x4c6   : > { %v2762_v36 = vmul.f32 %v10314_v32, %v2615_v30 }
 0x4c7   : > { %v9134_v31 = vpop.f32.mrf.mxu0 }
 0x4c8   : > { %v2659_v33 = vpop.f32.mrf.mxu1 }
 0x4c9   : > { %v2618_v35 = vpop.f32.mrf.mxu0  ;;  %v2764_v46 = vmul.f32 %v10318_v39, %v2659_v33 }
 0x4ca   : > { %v2763_v37 = vmul.f32 %v10316_v34, %v2618_v35  ;;  %v9140_v38 = vpop.f32.mrf.mxu1  ;;  %v10421_v34 = vld [vmem:[%s10741_s7] sm:$0xff] }
 0x4cb   : > { %v9135_v40 = vpop.f32.mrf.mxu0  ;;  %v10422_v38 = vld [vmem:[%s10741_s7 + $0x8] sm:$0xff]  ;;  %s11932_s7 = sld [smem:[#allocation12_spill]] }
 0x4cc   : > { %v2770_v43 = vpack.c.bf16 %v2763_v37, %v2762_v36  ;;  %v2662_v44 = vpop.f32.mrf.mxu1  ;;  %v10005_v40 = vld [vmem:[%s11924_s6 + $0x38] sm:$0xff]  }
 0x4cd   : > { %v2765_v47 = vmul.f32 %v10320_v42, %v2662_v44 }
 0x4ce   : > { %9159 = vmatmul.mubr.msk.bf16.vlgmr.msra.gmra.mxu0 %vm2292_vm1, %v2770_v43  ;;  %v9141_v48 = vpop.f32.mrf.mxu1 }
 0x4cf   : > { %v2771_v50 = vpack.c.bf16 %v2765_v47, %v2764_v46  ;;  %9171 = vmatpush3.bf16.msra.mxu0 %v10001_v41  ;;  %9174 = vmatprep.mubr.msk.bf16.mxu0 %vm10517_vm0, %v10516_v4  ;;  %v10006_v41 = vld [vmem:[%s11924_s6 + $0x78] sm:$0xff]  }
 0x4d0   : > { %9172 = vmatprep.subr.bf16.mxu0 %v10516_v4 }
 0x4d1   : > { %9167 = vmatmul.mubr.msk.bf16.vlgmr.msra.gmra.mxu1 %vm2292_vm1, %v2771_v50 }
 0x4d2   : > { %9179 = vmatpush3.bf16.msra.mxu1 %v10003_v49  ;;  %9182 = vmatprep.mubr.msk.bf16.mxu1 %vm10517_vm0, %v10516_v4 }
 0x4d3   : > { %9173 = vmatpush3.bf16.msra.mxu0 %v10002_v51  ;;  %9180 = vmatprep.subr.bf16.mxu1 %v10516_v4  ;;  %v10007_v51 = vld [vmem:[%s11924_s6 + $0x30] sm:$0xff]  }
 0x4d4   : > { %9186 = vmatprep.subr.bf16.mxu0 %v10516_v4 }
 0x4d6   : > { %9181 = vmatpush3.bf16.msra.mxu1 %v10004_v52  ;;  %v10008_v52 = vld [vmem:[%s11924_s6 + $0x70] sm:$0xff]  }
 0x4d7   : > { %9206 = vmatprep.subr.bf16.mxu1 %v10516_v4 }
 0x4e5   : > { %v2703_v63 = vpop.f32.mrf.mxu0 }
 0x4e6   : > { %v2766_v6 = vmul.f32 %v10322_v1, %v2703_v63  ;;  %v10013_v63 = vld [vmem:[%s11924_s6 + $0x18] sm:$0xff]   ;;  %v10015_v1 = vld [vmem:[%s11924_s6 + $0x10] sm:$0xff]  }
 0x4e7   : > { %v9146_v0 = vpop.f32.mrf.mxu0 }
 0x4e8   : > { %v2747_v2 = vpop.f32.mrf.mxu1  ;;  %v10014_v0 = vld [vmem:[%s11924_s6 + $0x58] sm:$0xff]  }
 0x4e9   : > { %v2706_v5 = vpop.f32.mrf.mxu0  ;;  %v2768_v11 = vmul.f32 %v10326_v59, %v2747_v2  ;;  %v10016_v2 = vld [vmem:[%s11924_s6 + $0x50] sm:$0xff]  }
 0x4ea   : > { %v2767_v53 = vmul.f32 %v10324_v3, %v2706_v5  ;;  %v9152_v57 = vpop.f32.mrf.mxu1  ;;  %v10017_v3 = vld [vmem:[%s11924_s6 + $0x8] sm:$0xff]  }
 0x4eb   : > { %v9147_v7 = vpop.f32.mrf.mxu0  ;;  %v10018_v5 = vld [vmem:[%s11924_s6 + $0x48] sm:$0xff]  }
 0x4ec   : > { %v2772_v9 = vpack.c.bf16 %v2767_v53, %v2766_v6  ;;  %v2750_v10 = vpop.f32.mrf.mxu1  ;;  %v10019_v6 = vld [vmem:[%s11924_s6] sm:$0xff]  }
 0x4ed   : > { %v2769_v45 = vmul.f32 %v10328_v8, %v2750_v10  ;;  %v10020_v53 = vld [vmem:[%s11924_s6 + $0x40] sm:$0xff]  }
 0x4ee   : > { %9175 = vmatmul.mubr.msk.bf16.vlgmr.msra.gmra.mxu0 %vm2292_vm1, %v2772_v9  ;;  %v9153_v12 = vpop.f32.mrf.mxu1 }
 0x4ef   : > { %v2773_v13 = vpack.c.bf16 %v2769_v45, %v2768_v11  ;;  %9202 = vmatprep.mubr.msk.bf16.mxu0 %vm10517_vm0, %v10516_v4  ;;  %9187 = vmatpush3.bf16.msra.mxu0 %v10005_v40  ;;  %v8102_v12 = vld [vmem:[%s10585_s24] ss:$0 sm:$0xff]  ;;  %v10041_v40 = vld [vmem:[%s10600_s12 + $0x28] sm:$0xff]  }
 0x4f0   : > { %9188 = vmatprep.subr.bf16.mxu0 %v10516_v4 }
 0x4f1   : > { %9183 = vmatmul.mubr.msk.bf16.vlgmr.msra.gmra.mxu1 %vm2292_vm1, %v2773_v13 }
 0x4f2   : > { %9222 = vmatprep.mubr.msk.bf16.mxu1 %vm10517_vm0, %v10516_v4  ;;  %9207 = vmatpush3.bf16.msra.mxu1 %v10006_v41  ;;  %v10042_v41 = vld [vmem:[%s10600_s12 + $0x68] sm:$0xff]  }
 0x4f3   : > { %9208 = vmatprep.subr.bf16.mxu1 %v10516_v4  ;;  %9189 = vmatpush3.bf16.msra.mxu0 %v10007_v51  ;;  %v10051_v51 = vld [vmem:[%s10600_s12] sm:$0xff]  }
 0x4f4   : > { %9190 = vmatprep.subr.bf16.mxu0 %v10516_v4 }
 0x4f6   : > { %9209 = vmatpush3.bf16.msra.mxu1 %v10008_v52  ;;  %v10052_v52 = vld [vmem:[%s10600_s12 + $0x40] sm:$0xff]  }
 0x4f7   : > { %9210 = vmatprep.subr.bf16.mxu1 %v10516_v4  ;;  %9191 = vmatpush3.bf16.msra.mxu0 %v10009_v55  ;;  %v10053_v55 = vld [vmem:[%s10600_s12 + $0xb8] sm:$0xff]  }
 0x4f8   : > { %9192 = vmatprep.subr.bf16.mxu0 %v10516_v4 }
 0x4fa   : > { %9211 = vmatpush3.bf16.msra.mxu1 %v10010_v56  ;;  %v10054_v56 = vld [vmem:[%s10600_s12 + $0xf8] sm:$0xff]  }
 0x4fb   : > { %9212 = vmatprep.subr.bf16.mxu1 %v10516_v4  ;;  %9193 = vmatpush3.bf16.msra.mxu0 %v10011_v61  ;;  %v10055_v61 = vld [vmem:[%s10600_s12 + $0xb0] sm:$0xff]  }
 0x4fc   : > { %9194 = vmatprep.subr.bf16.mxu0 %v10516_v4 }
 0x4fe   : > { %9213 = vmatpush3.bf16.msra.mxu1 %v10012_v62  ;;  %v10056_v62 = vld [vmem:[%s10600_s12 + $0xf0] sm:$0xff]  }
 0x4ff   : > { %9214 = vmatprep.subr.bf16.mxu1 %v10516_v4  ;;  %9195 = vmatpush3.bf16.msra.mxu0 %v10013_v63  ;;  %v10057_v63 = vld [vmem:[%s10600_s12 + $0xa8] sm:$0xff]  }
 0x500   : > { %9196 = vmatprep.subr.bf16.mxu0 %v10516_v4 }
 0x502   : > { %9215 = vmatpush3.bf16.msra.mxu1 %v10014_v0  ;;  %v10058_v0 = vld [vmem:[%s10600_s12 + $0xe8] sm:$0xff]  }
 0x503   : > { %9216 = vmatprep.subr.bf16.mxu1 %v10516_v4  ;;  %9197 = vmatpush3.bf16.msra.mxu0 %v10015_v1  ;;  %v10059_v1 = vld [vmem:[%s10600_s12 + $0xa0] sm:$0xff]  }
 0x504   : > { %9198 = vmatprep.subr.bf16.mxu0 %v10516_v4 }
 0x506   : > { %9217 = vmatpush3.bf16.msra.mxu1 %v10016_v2  ;;  %v10060_v2 = vld [vmem:[%s10600_s12 + $0xe0] sm:$0xff]  }
 0x507   : > { %9218 = vmatprep.subr.bf16.mxu1 %v10516_v4  ;;  %9199 = vmatpush3.bf16.msra.mxu0 %v10017_v3  ;;  %v10061_v3 = vld [vmem:[%s10600_s12 + $0x98] sm:$0xff]  }
 0x508   : > { %9200 = vmatprep.subr.bf16.mxu0 %v10516_v4 }
 0x50a   : > { %9219 = vmatpush3.bf16.msra.mxu1 %v10018_v5  ;;  %v10062_v5 = vld [vmem:[%s10600_s12 + $0xd8] sm:$0xff]  }
 0x50b   : > { %9220 = vmatprep.subr.bf16.mxu1 %v10516_v4  ;;  %9201 = vmatpush3.bf16.msra.mxu0 %v10019_v6  ;;  %v10063_v6 = vld [vmem:[%s10600_s12 + $0x90] sm:$0xff]  }
 0x50c   : > { %9226 = vmatprep.subr.bf16.mxu0 %v10516_v4 }
 0x50e   : > { %9221 = vmatpush3.bf16.msra.mxu1 %v10020_v53  ;;  %v10064_v53 = vld [vmem:[%s10600_s12 + $0xd0] sm:$0xff]  }
 0x50f   : > { %9246 = vmatprep.subr.bf16.mxu1 %v10516_v4 }
 0x58e   : > { %v2839_v54 = vpop.f32.mrf.mxu0 }
 0x590   : > { %v9160_v58 = vpop.f32.mrf.mxu0 }
 0x591   : > { %v2895_v60 = vpop.f32.mrf.mxu1 }
 0x592   : > { %v2842_v14 = vpop.f32.mrf.mxu0  ;;  %v3014_v19 = vadd.f32 %v2895_v60, %v2839_v54  ;;  %v8103_v60 = vld [vmem:[%s10590_s30] ss:$0 sm:$0xff] }
 0x593   : > { %v9168_v15 = vpop.f32.mrf.mxu1 }
 0x594   : > { %v9161_v16 = vpop.f32.mrf.mxu0 }
 0x595   : > { %v2898_v17 = vpop.f32.mrf.mxu1 }
 0x596   : > { %v3017_v25 = vadd.f32 %v2898_v17, %v2842_v14  ;;  %v10021_v17 = vld [vmem:[%s11924_s6 + $0xb8] sm:$0xff]  }
 0x597   : > { %v9169_v18 = vpop.f32.mrf.mxu1 }
 0x598   : > { %v10022_v18 = vld [vmem:[%s11924_s6 + $0xf8] sm:$0xff]  }
 0x5ae   : > { %v2951_v20 = vpop.f32.mrf.mxu0 }
 0x5af   : > { %v3015_v21 = vadd.f32 %v3014_v19, %v2951_v20  ;;  %v10023_v20 = vld [vmem:[%s11924_s6 + $0xb0] sm:$0xff]  }
 0x5b0   : > { %v9176_v22 = vpop.f32.mrf.mxu0 }
 0x5b1   : > { %v3007_v23 = vpop.f32.mrf.mxu1  ;;  %v10025_v22 = vld [vmem:[%s11924_s6 + $0xa8] sm:$0xff]  }
 0x5b2   : > { %v2954_v26 = vpop.f32.mrf.mxu0  ;;  %v3016_v27 = vadd.f32 %v3015_v21, %v3007_v23  ;;  %v10024_v21 = vld [vmem:[%s11924_s6 + $0xf0] sm:$0xff]   ;;  %v10026_v23 = vld [vmem:[%s11924_s6 + $0xe8] sm:$0xff]  }
 0x5b3   : > { %v9184_v28 = vpop.f32.mrf.mxu1  ;;  %v3018_v29 = vadd.f32 %v3017_v25, %v2954_v26  ;;  %v10028_v25 = vld [vmem:[%s11924_s6 + $0xe0] sm:$0xff]   ;;  %v10029_v26 = vld [vmem:[%s11924_s6 + $0x98] sm:$0xff]  }
 0x5b4   : > { %v3027_v30 = vadd.f32 %v8101_v24, %v3016_v27  ;;  %v9177_v31 = vpop.f32.mrf.mxu0  ;;  %v10030_v27 = vld [vmem:[%s11924_s6 + $0xd8] sm:$0xff]   ;;  %v10031_v28 = vld [vmem:[%s11924_s6 + $0x90] sm:$0xff]  }
 0x5b5   : > { %v3010_v32 = vpop.f32.mrf.mxu1  ;;  %v10034_v31 = vld [vmem:[%s11924_s6 + $0xc8] sm:$0xff]  }
 0x5b6   : > { %v3019_v33 = vadd.f32 %v3018_v29, %v3010_v32  ;;  %v11085_v35 = vadd.f32 %v10421_v34, %v3027_v30  ;;  %v10032_v29 = vld [vmem:[%s11924_s6 + $0xd0] sm:$0xff]   ;;  %v10033_v30 = vld [vmem:[%s11924_s6 + $0x88] sm:$0xff]   ;;  %v10035_v32 = vld [vmem:[%s11924_s6 + $0x80] sm:$0xff]  }
 0x5b7   : > { %v9185_v36 = vpop.f32.mrf.mxu1  ;;  %v10037_v34 = vld [vmem:[%s10600_s12 + $0x38] sm:$0xff]  }
 0x5b8   : > { %v3028_v37 = vadd.f32 %v8101_v24, %v3019_v33  ;;  %3033 = vadd.xlane.f32.xlu0 %v11085_v35  ;;  %v10027_v24 = vld [vmem:[%s11924_s6 + $0xa0] sm:$0xff]   ;;  %v10038_v36 = vld [vmem:[%s10600_s12 + $0x78] sm:$0xff]  }
 0x5b9   : > { %v10036_v33 = vld [vmem:[%s11924_s6 + $0xc0] sm:$0xff]   ;;  %s8413_s6 = sshll.u32 %s10708_s0, 8  ;;  %s10519_s0 = smov [#allocation2]  }
 0x5ba   : > { %v11089_v39 = vadd.f32 %v10422_v38, %v3028_v37  ;;  %v10039_v37 = vld [vmem:[%s10600_s12 + $0x30] sm:$0xff]  }
 0x5bb   : > { %v10040_v38 = vld [vmem:[%s10600_s12 + $0x70] sm:$0xff]  }
 0x5bc   : > { %3035 = vadd.xlane.f32.xlu1 %v11089_v39 }
 0x641   : > { %v3034_v42 = vpop.xlane.xlu0 %3033 }
 0x642   : > { %v3037_v43 = vmul.f32 0.0078125, %v3034_v42  ;;  %v10043_v42 = vld [vmem:[%s10600_s12 + $0x20] sm:$0xff]  }
 0x644   : > { %v3039_v44 = vsub.f32 %v11085_v35, %v3037_v43  ;;  %v10044_v43 = vld [vmem:[%s10600_s12 + $0x60] sm:$0xff]  }
 0x645   : > { %v3036_v46 = vpop.xlane.xlu1 %3035 }
 0x646   : > { %v3038_v47 = vmul.f32 0.0078125, %v3036_v46  ;;  %v3041_v48 = vmul.f32 %v3039_v44, %v3039_v44  ;;  %v10046_v46 = vld [vmem:[%s10600_s12 + $0x58] sm:$0xff]  }
 0x648   : > { %v3040_v49 = vsub.f32 %v11089_v39, %v3038_v47  ;;  %3043 = vadd.xlane.f32.xlu0 %v3041_v48  ;;  %v10047_v47 = vld [vmem:[%s10600_s12 + $0x10] sm:$0xff]  }
 0x649   : > { %v10048_v48 = vld [vmem:[%s10600_s12 + $0x50] sm:$0xff]  }
 0x64a   : > { %v3042_v50 = vmul.f32 %v3040_v49, %v3040_v49 }
 0x64c   : > { %3045 = vadd.xlane.f32.xlu1 %v3042_v50  ;;  %v10050_v50 = vld [vmem:[%s10600_s12 + $0x48] sm:$0xff]  }
 0x6d1   : > { %v3044_v57 = vpop.xlane.xlu0 %3043 }
 0x6d2   : > { %v3047_v59 = vmul.f32 0.0078125, %v3044_v57  ;;  %v10065_v57 = vld [vmem:[%s10600_s12 + $0x88] sm:$0xff]  }
 0x6d4   : > { %v3049_v7 = vadd.f32 1e-05, %v3047_v59  ;;  %v10066_v59 = vld [vmem:[%s10600_s12 + $0xc8] sm:$0xff]  }
 0x6d5   : > { %v3046_v8 = vpop.xlane.xlu1 %3045 }
 0x6d6   : > { %10329 = vrsqrt.f32 %v3049_v7  ;;  %v3048_v9 = vmul.f32 0.0078125, %v3046_v8  ;;  %v10067_v7 = vld [vmem:[%s10600_s12 + $0x80] sm:$0xff]  }
 0x6d7   : > { %v10068_v8 = vld [vmem:[%s10600_s12 + $0xc0] sm:$0xff]  }
 0x6d8   : > { %v3050_v10 = vadd.f32 1e-05, %v3048_v9  ;;  %v10069_v9 = vld [vmem:[%s10605_s20 + $0x38] sm:$0xff]  }
 0x6da   : > { %10331 = vrsqrt.f32 %v3050_v10  ;;  %v10070_v10 = vld [vmem:[%s10605_s20 + $0x78] sm:$0xff]  }
 0x6e3   : > { %v10330_v11 = vpop.eup %10329 }
 0x6e4   : > { %v3053_v45 = vmul.f32 %v10330_v11, %v3039_v44  ;;  %v10045_v44 = vld [vmem:[%s10600_s12 + $0x18] sm:$0xff]   ;;  %v10071_v11 = vld [vmem:[%s10605_s20 + $0x30] sm:$0xff]  }
 0x6e6   : > { %v3061_v54 = vmul.f32 %v8102_v12, %v3053_v45  ;;  %v10072_v45 = vld [vmem:[%s10605_s20 + $0x70] sm:$0xff]  }
 0x6e7   : > { %v10332_v13 = vpop.eup %10331 }
 0x6e8   : > { %v3054_v58 = vmul.f32 %v10332_v13, %v3040_v49  ;;  %v3069_v15 = vadd.f32 %v8103_v60, %v3061_v54  ;;  %v10049_v49 = vld [vmem:[%s10600_s12 + $0x8] sm:$0xff]   ;;  %v10075_v54 = vld [vmem:[%s10605_s20 + $0x20] sm:$0xff]  }
 0x6e9   : > { %v10074_v13 = vld [vmem:[%s10605_s20 + $0x68] sm:$0xff]  }
 0x6ea   : > { %v3062_v14 = vmul.f32 %v8102_v12, %v3054_v58  ;;  %v10073_v12 = vld [vmem:[%s10605_s20 + $0x28] sm:$0xff]   ;;  %v10076_v58 = vld [vmem:[%s10605_s20 + $0x60] sm:$0xff]  }
 0x6ec   : > { %v3070_v16 = vadd.f32 %v8103_v60, %v3062_v14  ;;  %v10077_v60 = vld [vmem:[%s10605_s20 + $0x18] sm:$0xff]  }
 0x6ed   : > { %v10078_v14 = vld [vmem:[%s10605_s20 + $0x58] sm:$0xff]  }
 0x6ee   : > { %v11130_v19 = vpack.c.bf16 %v3070_v16, %v3069_v15  ;;  %v10079_v15 = vld [vmem:[%s10605_s20 + $0x10] sm:$0xff]  }
 0x6ef   : > { %v10080_v16 = vld [vmem:[%s10605_s20 + $0x50] sm:$0xff]  }
 0x6f0   : > { %9203 = vmatmul.mubr.bf16.vlgmr.msra.gmra.mxu0 %v11130_v19  ;;  %9223 = vmatmul.mubr.bf16.vlgmr.msra.gmra.mxu1 %v11130_v19 }
 0x6f1   : > { %9227 = vmatpush3.bf16.msra.mxu0 %v10021_v17  ;;  %9247 = vmatpush3.bf16.msra.mxu1 %v10022_v18  ;;  %v10081_v17 = vld [vmem:[%s10605_s20 + $0x8] sm:$0xff]  }
 0x6f2   : > { %9228 = vmatprep.subr.bf16.mxu0 %v10516_v4  ;;  %9248 = vmatprep.subr.bf16.mxu1 %v10516_v4  ;;  %v10082_v18 = vld [vmem:[%s10605_s20 + $0x48] sm:$0xff]  }
 0x6f3   : > { %9242 = vmatprep.mubr.msk.bf16.mxu0 %vm10517_vm0, %v10516_v4  ;;  %9262 = vmatprep.mubr.msk.bf16.mxu1 %vm10517_vm0, %v10516_v4 }
 0x6f5   : > { %9229 = vmatpush3.bf16.msra.mxu0 %v10023_v20  ;;  %9249 = vmatpush3.bf16.msra.mxu1 %v10024_v21  ;;  %v10083_v20 = vld [vmem:[%s10605_s20] sm:$0xff]  }
 0x6f6   : > { %9230 = vmatprep.subr.bf16.mxu0 %v10516_v4  ;;  %9250 = vmatprep.subr.bf16.mxu1 %v10516_v4  ;;  %v10084_v21 = vld [vmem:[%s10605_s20 + $0x40] sm:$0xff]  }
 0x6f9   : > { %9231 = vmatpush3.bf16.msra.mxu0 %v10025_v22  ;;  %9251 = vmatpush3.bf16.msra.mxu1 %v10026_v23  ;;  %v10085_v22 = vld [vmem:[%s10605_s20 + $0xb8] sm:$0xff]  }
 0x6fa   : > { %9232 = vmatprep.subr.bf16.mxu0 %v10516_v4  ;;  %9252 = vmatprep.subr.bf16.mxu1 %v10516_v4  ;;  %v10086_v23 = vld [vmem:[%s10605_s20 + $0xf8] sm:$0xff]  }
 0x6fd   : > { %9233 = vmatpush3.bf16.msra.mxu0 %v10027_v24  ;;  %9253 = vmatpush3.bf16.msra.mxu1 %v10028_v25  ;;  %v10087_v24 = vld [vmem:[%s10605_s20 + $0xb0] sm:$0xff]  }
 0x6fe   : > { %9234 = vmatprep.subr.bf16.mxu0 %v10516_v4  ;;  %9254 = vmatprep.subr.bf16.mxu1 %v10516_v4  ;;  %v10088_v25 = vld [vmem:[%s10605_s20 + $0xf0] sm:$0xff]  }
 0x701   : > { %9235 = vmatpush3.bf16.msra.mxu0 %v10029_v26  ;;  %9255 = vmatpush3.bf16.msra.mxu1 %v10030_v27  ;;  %v10089_v26 = vld [vmem:[%s10605_s20 + $0xa8] sm:$0xff]  }
 0x702   : > { %9236 = vmatprep.subr.bf16.mxu0 %v10516_v4  ;;  %9256 = vmatprep.subr.bf16.mxu1 %v10516_v4  ;;  %v10090_v27 = vld [vmem:[%s10605_s20 + $0xe8] sm:$0xff]  }
 0x705   : > { %9237 = vmatpush3.bf16.msra.mxu0 %v10031_v28  ;;  %9257 = vmatpush3.bf16.msra.mxu1 %v10032_v29  ;;  %v10091_v28 = vld [vmem:[%s10605_s20 + $0xa0] sm:$0xff]  }
 0x706   : > { %9238 = vmatprep.subr.bf16.mxu0 %v10516_v4  ;;  %9258 = vmatprep.subr.bf16.mxu1 %v10516_v4  ;;  %v10092_v29 = vld [vmem:[%s10605_s20 + $0xe0] sm:$0xff]  }
 0x709   : > { %9239 = vmatpush3.bf16.msra.mxu0 %v10033_v30  ;;  %9259 = vmatpush3.bf16.msra.mxu1 %v10034_v31  ;;  %v10093_v30 = vld [vmem:[%s10605_s20 + $0x98] sm:$0xff]  }
 0x70a   : > { %9240 = vmatprep.subr.bf16.mxu0 %v10516_v4  ;;  %9260 = vmatprep.subr.bf16.mxu1 %v10516_v4  ;;  %v10094_v31 = vld [vmem:[%s10605_s20 + $0xd8] sm:$0xff]  }
 0x70d   : > { %9241 = vmatpush3.bf16.msra.mxu0 %v10035_v32  ;;  %9261 = vmatpush3.bf16.msra.mxu1 %v10036_v33  ;;  %v10095_v32 = vld [vmem:[%s10605_s20 + $0x90] sm:$0xff]  }
 0x70e   : > { %9266 = vmatprep.subr.bf16.mxu0 %v10516_v4  ;;  %9286 = vmatprep.subr.bf16.mxu1 %v10516_v4  ;;  %v10096_v33 = vld [vmem:[%s10605_s20 + $0xd0] sm:$0xff]  }
 0x710   : > { %9243 = vmatmul.mubr.bf16.vlgmr.msra.gmra.mxu0 %v11130_v19  ;;  %9263 = vmatmul.mubr.bf16.vlgmr.msra.gmra.mxu1 %v11130_v19 }
 0x711   : > { %9267 = vmatpush3.bf16.msra.mxu0 %v10037_v34  ;;  %9287 = vmatpush3.bf16.msra.mxu1 %v10038_v36  ;;  %v10097_v34 = vld [vmem:[%s10605_s20 + $0x88] sm:$0xff]  }
 0x712   : > { %9268 = vmatprep.subr.bf16.mxu0 %v10516_v4  ;;  %9288 = vmatprep.subr.bf16.mxu1 %v10516_v4  ;;  %v10098_v36 = vld [vmem:[%s10605_s20 + $0xc8] sm:$0xff]  }
 0x713   : > { %9282 = vmatprep.mubr.msk.bf16.mxu0 %vm10517_vm0, %v10516_v4  ;;  %9302 = vmatprep.mubr.msk.bf16.mxu1 %vm10517_vm0, %v10516_v4 }
 0x715   : > { %9269 = vmatpush3.bf16.msra.mxu0 %v10039_v37  ;;  %9289 = vmatpush3.bf16.msra.mxu1 %v10040_v38  ;;  %v10099_v37 = vld [vmem:[%s10605_s20 + $0x80] sm:$0xff]  }
 0x716   : > { %9270 = vmatprep.subr.bf16.mxu0 %v10516_v4  ;;  %9290 = vmatprep.subr.bf16.mxu1 %v10516_v4  ;;  %v10100_v38 = vld [vmem:[%s10605_s20 + $0xc0] sm:$0xff]  }
 0x719   : > { %9271 = vmatpush3.bf16.msra.mxu0 %v10041_v40  ;;  %9291 = vmatpush3.bf16.msra.mxu1 %v10042_v41 }
 0x71a   : > { %9272 = vmatprep.subr.bf16.mxu0 %v10516_v4  ;;  %9292 = vmatprep.subr.bf16.mxu1 %v10516_v4 }
 0x71d   : > { %9273 = vmatpush3.bf16.msra.mxu0 %v10043_v42  ;;  %9293 = vmatpush3.bf16.msra.mxu1 %v10044_v43 }
 0x71e   : > { %9274 = vmatprep.subr.bf16.mxu0 %v10516_v4  ;;  %9294 = vmatprep.subr.bf16.mxu1 %v10516_v4 }
 0x721   : > { %9275 = vmatpush3.bf16.msra.mxu0 %v10045_v44  ;;  %9295 = vmatpush3.bf16.msra.mxu1 %v10046_v46 }
 0x722   : > { %9276 = vmatprep.subr.bf16.mxu0 %v10516_v4  ;;  %9296 = vmatprep.subr.bf16.mxu1 %v10516_v4 }
 0x725   : > { %9277 = vmatpush3.bf16.msra.mxu0 %v10047_v47  ;;  %9297 = vmatpush3.bf16.msra.mxu1 %v10048_v48 }
 0x726   : > { %9278 = vmatprep.subr.bf16.mxu0 %v10516_v4  ;;  %9298 = vmatprep.subr.bf16.mxu1 %v10516_v4 }
 0x729   : > { %9279 = vmatpush3.bf16.msra.mxu0 %v10049_v49  ;;  %9299 = vmatpush3.bf16.msra.mxu1 %v10050_v50 }
 0x72a   : > { %9280 = vmatprep.subr.bf16.mxu0 %v10516_v4  ;;  %9300 = vmatprep.subr.bf16.mxu1 %v10516_v4 }
 0x72d   : > { %9281 = vmatpush3.bf16.msra.mxu0 %v10051_v51  ;;  %9301 = vmatpush3.bf16.msra.mxu1 %v10052_v52 }
 0x72e   : > { %9306 = vmatprep.subr.bf16.mxu0 %v10516_v4  ;;  %9326 = vmatprep.subr.bf16.mxu1 %v10516_v4 }
 0x730   : > { %9283 = vmatmul.mubr.bf16.vlgmr.msra.gmra.mxu0 %v11130_v19  ;;  %9303 = vmatmul.mubr.bf16.vlgmr.msra.gmra.mxu1 %v11130_v19 }
 0x731   : > { %9307 = vmatpush3.bf16.msra.mxu0 %v10053_v55  ;;  %9327 = vmatpush3.bf16.msra.mxu1 %v10054_v56 }
 0x732   : > { %9308 = vmatprep.subr.bf16.mxu0 %v10516_v4  ;;  %9328 = vmatprep.subr.bf16.mxu1 %v10516_v4 }
 0x733   : > { %9322 = vmatprep.mubr.msk.bf16.mxu0 %vm10517_vm0, %v10516_v4  ;;  %9342 = vmatprep.mubr.msk.bf16.mxu1 %vm10517_vm0, %v10516_v4 }
 0x735   : > { %9309 = vmatpush3.bf16.msra.mxu0 %v10055_v61  ;;  %9329 = vmatpush3.bf16.msra.mxu1 %v10056_v62 }
 0x736   : > { %9310 = vmatprep.subr.bf16.mxu0 %v10516_v4  ;;  %9330 = vmatprep.subr.bf16.mxu1 %v10516_v4 }
 0x739   : > { %9311 = vmatpush3.bf16.msra.mxu0 %v10057_v63  ;;  %9331 = vmatpush3.bf16.msra.mxu1 %v10058_v0 }
 0x73a   : > { %9312 = vmatprep.subr.bf16.mxu0 %v10516_v4  ;;  %9332 = vmatprep.subr.bf16.mxu1 %v10516_v4 }
 0x73d   : > { %9313 = vmatpush3.bf16.msra.mxu0 %v10059_v1  ;;  %9333 = vmatpush3.bf16.msra.mxu1 %v10060_v2 }
 0x73e   : > { %9314 = vmatprep.subr.bf16.mxu0 %v10516_v4  ;;  %9334 = vmatprep.subr.bf16.mxu1 %v10516_v4 }
 0x741   : > { %9315 = vmatpush3.bf16.msra.mxu0 %v10061_v3  ;;  %9335 = vmatpush3.bf16.msra.mxu1 %v10062_v5 }
 0x742   : > { %9316 = vmatprep.subr.bf16.mxu0 %v10516_v4  ;;  %9336 = vmatprep.subr.bf16.mxu1 %v10516_v4 }
 0x745   : > { %9317 = vmatpush3.bf16.msra.mxu0 %v10063_v6  ;;  %9337 = vmatpush3.bf16.msra.mxu1 %v10064_v53 }
 0x746   : > { %9318 = vmatprep.subr.bf16.mxu0 %v10516_v4  ;;  %9338 = vmatprep.subr.bf16.mxu1 %v10516_v4 }
 0x749   : > { %9319 = vmatpush3.bf16.msra.mxu0 %v10065_v57  ;;  %9339 = vmatpush3.bf16.msra.mxu1 %v10066_v59 }
 0x74a   : > { %9320 = vmatprep.subr.bf16.mxu0 %v10516_v4  ;;  %9340 = vmatprep.subr.bf16.mxu1 %v10516_v4 }
 0x74d   : > { %9321 = vmatpush3.bf16.msra.mxu0 %v10067_v7  ;;  %9341 = vmatpush3.bf16.msra.mxu1 %v10068_v8 }
 0x74e   : > { %9346 = vmatprep.subr.bf16.mxu0 %v10516_v4  ;;  %9366 = vmatprep.subr.bf16.mxu1 %v10516_v4 }
 0x750   : > { %9323 = vmatmul.mubr.bf16.vlgmr.msra.gmra.mxu0 %v11130_v19  ;;  %9343 = vmatmul.mubr.bf16.vlgmr.msra.gmra.mxu1 %v11130_v19 }
 0x751   : > { %9347 = vmatpush3.bf16.msra.mxu0 %v10069_v9  ;;  %9367 = vmatpush3.bf16.msra.mxu1 %v10070_v10 }
 0x752   : > { %9348 = vmatprep.subr.bf16.mxu0 %v10516_v4  ;;  %9368 = vmatprep.subr.bf16.mxu1 %v10516_v4 }
 0x753   : > { %9362 = vmatprep.mubr.msk.bf16.mxu0 %vm10517_vm0, %v10516_v4  ;;  %9382 = vmatprep.mubr.msk.bf16.mxu1 %vm10517_vm0, %v10516_v4 }
 0x755   : > { %9349 = vmatpush3.bf16.msra.mxu0 %v10071_v11  ;;  %9369 = vmatpush3.bf16.msra.mxu1 %v10072_v45 }
 0x756   : > { %9350 = vmatprep.subr.bf16.mxu0 %v10516_v4  ;;  %9370 = vmatprep.subr.bf16.mxu1 %v10516_v4 }
 0x759   : > { %9351 = vmatpush3.bf16.msra.mxu0 %v10073_v12  ;;  %9371 = vmatpush3.bf16.msra.mxu1 %v10074_v13 }
 0x75a   : > { %9352 = vmatprep.subr.bf16.mxu0 %v10516_v4  ;;  %9372 = vmatprep.subr.bf16.mxu1 %v10516_v4 }
 0x75d   : > { %9353 = vmatpush3.bf16.msra.mxu0 %v10075_v54  ;;  %9373 = vmatpush3.bf16.msra.mxu1 %v10076_v58 }
 0x75e   : > { %9354 = vmatprep.subr.bf16.mxu0 %v10516_v4  ;;  %9374 = vmatprep.subr.bf16.mxu1 %v10516_v4 }
 0x761   : > { %9355 = vmatpush3.bf16.msra.mxu0 %v10077_v60  ;;  %9375 = vmatpush3.bf16.msra.mxu1 %v10078_v14 }
 0x762   : > { %9356 = vmatprep.subr.bf16.mxu0 %v10516_v4  ;;  %9376 = vmatprep.subr.bf16.mxu1 %v10516_v4 }
 0x765   : > { %9357 = vmatpush3.bf16.msra.mxu0 %v10079_v15  ;;  %9377 = vmatpush3.bf16.msra.mxu1 %v10080_v16 }
 0x766   : > { %9358 = vmatprep.subr.bf16.mxu0 %v10516_v4  ;;  %9378 = vmatprep.subr.bf16.mxu1 %v10516_v4 }
 0x769   : > { %9359 = vmatpush3.bf16.msra.mxu0 %v10081_v17  ;;  %9379 = vmatpush3.bf16.msra.mxu1 %v10082_v18 }
 0x76a   : > { %9360 = vmatprep.subr.bf16.mxu0 %v10516_v4  ;;  %9380 = vmatprep.subr.bf16.mxu1 %v10516_v4 }
 0x76d   : > { %9361 = vmatpush3.bf16.msra.mxu0 %v10083_v20  ;;  %9381 = vmatpush3.bf16.msra.mxu1 %v10084_v21 }
 0x76e   : > { %9386 = vmatprep.subr.bf16.mxu0 %v10516_v4  ;;  %9406 = vmatprep.subr.bf16.mxu1 %v10516_v4 }
 0x770   : > { %9363 = vmatmul.mubr.bf16.vlgmr.msra.gmra.mxu0 %v11130_v19  ;;  %9383 = vmatmul.mubr.bf16.vlgmr.msra.gmra.mxu1 %v11130_v19 }
 0x771   : > { %9387 = vmatpush3.bf16.msra.mxu0 %v10085_v22  ;;  %9407 = vmatpush3.bf16.msra.mxu1 %v10086_v23 }
 0x772   : > { %9388 = vmatprep.subr.bf16.mxu0 %v10516_v4  ;;  %9408 = vmatprep.subr.bf16.mxu1 %v10516_v4 }
 0x773   : > { %9402 = vmatprep.mubr.msk.bf16.mxu0 %vm10517_vm0, %v10516_v4  ;;  %9422 = vmatprep.mubr.msk.bf16.mxu1 %vm10517_vm0, %v10516_v4 }
 0x775   : > { %9389 = vmatpush3.bf16.msra.mxu0 %v10087_v24  ;;  %9409 = vmatpush3.bf16.msra.mxu1 %v10088_v25 }
 0x776   : > { %9390 = vmatprep.subr.bf16.mxu0 %v10516_v4  ;;  %9410 = vmatprep.subr.bf16.mxu1 %v10516_v4 }
 0x779   : > { %9391 = vmatpush3.bf16.msra.mxu0 %v10089_v26  ;;  %9411 = vmatpush3.bf16.msra.mxu1 %v10090_v27 }
 0x77a   : > { %9392 = vmatprep.subr.bf16.mxu0 %v10516_v4  ;;  %9412 = vmatprep.subr.bf16.mxu1 %v10516_v4 }
 0x77d   : > { %9393 = vmatpush3.bf16.msra.mxu0 %v10091_v28  ;;  %9413 = vmatpush3.bf16.msra.mxu1 %v10092_v29 }
 0x77e   : > { %9394 = vmatprep.subr.bf16.mxu0 %v10516_v4  ;;  %9414 = vmatprep.subr.bf16.mxu1 %v10516_v4 }
 0x781   : > { %9395 = vmatpush3.bf16.msra.mxu0 %v10093_v30  ;;  %9415 = vmatpush3.bf16.msra.mxu1 %v10094_v31 }
 0x782   : > { %9396 = vmatprep.subr.bf16.mxu0 %v10516_v4  ;;  %9416 = vmatprep.subr.bf16.mxu1 %v10516_v4 }
 0x785   : > { %9397 = vmatpush3.bf16.msra.mxu0 %v10095_v32  ;;  %9417 = vmatpush3.bf16.msra.mxu1 %v10096_v33 }
 0x786   : > { %9398 = vmatprep.subr.bf16.mxu0 %v10516_v4  ;;  %9418 = vmatprep.subr.bf16.mxu1 %v10516_v4 }
 0x789   : > { %9399 = vmatpush3.bf16.msra.mxu0 %v10097_v34  ;;  %9419 = vmatpush3.bf16.msra.mxu1 %v10098_v36 }
 0x78a   : > { %9400 = vmatprep.subr.bf16.mxu0 %v10516_v4  ;;  %9420 = vmatprep.subr.bf16.mxu1 %v10516_v4 }
 0x78d   : > { %9401 = vmatpush3.bf16.msra.mxu0 %v10099_v37  ;;  %9421 = vmatpush3.bf16.msra.mxu1 %v10100_v38 }
 0x78e   : > { %9426 = vmatprep.subr.bf16.mxu0 %v10516_v4  ;;  %9432 = vmatprep.subr.bf16.mxu1 %v10516_v4 }
 0x790   : > { %9403 = vmatmul.mubr.bf16.vlgmr.msra.gmra.mxu0 %v11130_v19  ;;  %9423 = vmatmul.mubr.bf16.vlgmr.msra.gmra.mxu1 %v11130_v19 }
 0x791   : > { %9428 = vmatprep.mubr.msk.bf16.mxu0 %vm10517_vm0, %v10516_v4  ;;  %9434 = vmatprep.mubr.msk.bf16.mxu1 %vm10517_vm0, %v10516_v4 }
 0x7b0   : > { %v3218_v40 = vpop.f32.mrf.mxu0  ;;  %v3307_v41 = vpop.f32.mrf.mxu1 }
 0x7b2   : > { %v9204_v42 = vpop.f32.mrf.mxu0  ;;  %v9224_v43 = vpop.f32.mrf.mxu1 }
 0x7b4   : > { %v3221_v44 = vpop.f32.mrf.mxu0  ;;  %v3310_v46 = vpop.f32.mrf.mxu1 }
 0x7b5   : > { %v4332_v47 = vpack.c.bf16 %v3221_v44, %v3218_v40  ;;  %v4333_v48 = vpack.c.bf16 %v3310_v46, %v3307_v41  ;;  %v980_v46 = vld [vmem:[%s11930_s10] sm:$0xff] }
 0x7b6   : > { %v9205_v49 = vpop.f32.mrf.mxu0  ;;  %v9225_v50 = vpop.f32.mrf.mxu1 }
 0x7d0   : > { %v3396_v51 = vpop.f32.mrf.mxu0  ;;  %v3485_v52 = vpop.f32.mrf.mxu1 }
 0x7d2   : > { %v9244_v55 = vpop.f32.mrf.mxu0  ;;  %v9264_v19 = vpop.f32.mrf.mxu1 }
 0x7d3   : > { %v981_v19 = vld [vmem:[%s11930_s10 + $0x8] sm:$0xff] }
 0x7d4   : > { %v3399_v56 = vpop.f32.mrf.mxu0  ;;  %v3488_v61 = vpop.f32.mrf.mxu1 }
 0x7d5   : > { %v4334_v62 = vpack.c.bf16 %v3399_v56, %v3396_v51  ;;  %v4335_v63 = vpack.c.bf16 %v3488_v61, %v3485_v52 }
 0x7d6   : > { %v9245_v0 = vpop.f32.mrf.mxu0  ;;  %v9265_v1 = vpop.f32.mrf.mxu1 }
 0x7f0   : > { %v3638_v2 = vpop.f32.mrf.mxu0  ;;  %v3727_v3 = vpop.f32.mrf.mxu1 }
 0x7f2   : > { %v9284_v5 = vpop.f32.mrf.mxu0  ;;  %v9304_v6 = vpop.f32.mrf.mxu1 }
 0x7f4   : > { %v3641_v53 = vpop.f32.mrf.mxu0  ;;  %v3730_v57 = vpop.f32.mrf.mxu1 }
 0x7f5   : > { %v4336_v59 = vpack.c.bf16 %v3641_v53, %v3638_v2  ;;  %v4337_v7 = vpack.c.bf16 %v3730_v57, %v3727_v3 }
 0x7f6   : > { %v9285_v8 = vpop.f32.mrf.mxu0  ;;  %v9305_v9 = vpop.f32.mrf.mxu1 }
 0x7f7   : > { %v4344_v10 = vsel %vm2292_vm1, %v4336_v59, 0  ;;  %v4391_v11 = vsel %vm2292_vm1, %v4337_v7, 0 }
 0x7f8   : > { %9427 = vmatpush3.bf16.xpose.msra.mxu0 %v4344_v10  ;;  %9433 = vmatpush3.bf16.xpose.msra.mxu1 %v4391_v11 }
 0x7f9   : > { %9438 = vmatprep.subr.bf16.mxu0 %v10516_v4  ;;  %9444 = vmatprep.subr.bf16.mxu1 %v10516_v4 }
 0x7ff   : > { %9429 = vmatmul.mubr.msk.bf16.vlgmr.msra.gmra.mxu0 %vm2292_vm1, %v4332_v47  ;;  %9435 = vmatmul.mubr.msk.bf16.vlgmr.msra.gmra.mxu1 %vm2292_vm1, %v4333_v48 }
 0x800   : > { %9440 = vmatprep.mubr.msk.bf16.mxu0 %vm10517_vm0, %v10516_v4  ;;  %9446 = vmatprep.mubr.msk.bf16.mxu1 %vm10517_vm0, %v10516_v4 }
 0x810   : > { %v3816_v45 = vpop.f32.mrf.mxu0  ;;  %v3905_v12 = vpop.f32.mrf.mxu1 }
 0x812   : > { %v9324_v13 = vpop.f32.mrf.mxu0  ;;  %v9344_v54 = vpop.f32.mrf.mxu1 }
 0x814   : > { %v3819_v58 = vpop.f32.mrf.mxu0  ;;  %v3908_v60 = vpop.f32.mrf.mxu1 }
 0x815   : > { %v4338_v14 = vpack.c.bf16 %v3819_v58, %v3816_v45  ;;  %v4339_v15 = vpack.c.bf16 %v3908_v60, %v3905_v12 }
 0x816   : > { %v9325_v16 = vpop.f32.mrf.mxu0  ;;  %v9345_v17 = vpop.f32.mrf.mxu1 }
 0x817   : > { %v4438_v18 = vsel %vm2292_vm1, %v4338_v14, 0  ;;  %v4485_v20 = vsel %vm2292_vm1, %v4339_v15, 0 }
 0x818   : > { %9439 = vmatpush3.bf16.xpose.msra.mxu0 %v4438_v18  ;;  %9445 = vmatpush3.bf16.xpose.msra.mxu1 %v4485_v20 }
 0x819   : > { %9450 = vmatprep.subr.bf16.mxu0 %v10516_v4  ;;  %9456 = vmatprep.subr.bf16.mxu1 %v10516_v4 }
 0x81f   : > { %9441 = vmatmul.mubr.msk.bf16.vlgmr.msra.gmra.mxu0 %vm2292_vm1, %v4334_v62  ;;  %9447 = vmatmul.mubr.msk.bf16.vlgmr.msra.gmra.mxu1 %vm2292_vm1, %v4335_v63 }
 0x820   : > { %9452 = vmatprep.mubr.msk.bf16.mxu0 %vm10517_vm0, %v10516_v4  ;;  %9458 = vmatprep.mubr.msk.bf16.mxu1 %vm10517_vm0, %v10516_v4 }
 0x830   : > { %v4058_v21 = vpop.f32.mrf.mxu0  ;;  %v4147_v22 = vpop.f32.mrf.mxu1 }
 0x832   : > { %v9364_v23 = vpop.f32.mrf.mxu0  ;;  %v9384_v24 = vpop.f32.mrf.mxu1 }
 0x834   : > { %v4061_v25 = vpop.f32.mrf.mxu0  ;;  %v4150_v26 = vpop.f32.mrf.mxu1 }
 0x835   : > { %v4620_v27 = vpack.c.bf16 %v4061_v25, %v4058_v21  ;;  %v4621_v28 = vpack.c.bf16 %v4150_v26, %v4147_v22 }
 0x836   : > { %v9365_v29 = vpop.f32.mrf.mxu0  ;;  %v9385_v30 = vpop.f32.mrf.mxu1 }
 0x837   : > { %9451 = vmatpush3.bf16.msra.mxu0 %v4620_v27  ;;  %9457 = vmatpush3.bf16.msra.mxu1 %v4621_v28 }
 0x838   : > { %9462 = vmatprep.subr.bf16.mxu0 %v10516_v4  ;;  %9468 = vmatprep.subr.bf16.mxu1 %v10516_v4 }
 0x850   : > { %v11348_v31 = vpop.f32.mrf.mxu0  ;;  %v11350_v32 = vpop.f32.mrf.mxu1 }
 0x852   : > { %v9404_v33 = vpop.f32.mrf.mxu0  ;;  %v9424_v34 = vpop.f32.mrf.mxu1 }
 0x854   : > { %v11352_v36 = vpop.f32.mrf.mxu0  ;;  %v11354_v37 = vpop.f32.mrf.mxu1 }
 0x855   : > { %v4622_v38 = vpack.c.bf16 %v11352_v36, %v11348_v31  ;;  %v4623_v40 = vpack.c.bf16 %v11354_v37, %v11350_v32 }
 0x856   : > { %v9405_v41 = vpop.f32.mrf.mxu0  ;;  %v9425_v42 = vpop.f32.mrf.mxu1 }
 0x8bf   : > { %v4380_v43 = vpop.f32.mrf.mxu0  ;;  %v4427_v44 = vpop.f32.mrf.mxu1 }
 0x8c0   : > { %v4528_v47 = vmul.f32 0.17677669, %v4380_v43  ;;  %v4530_v48 = vmul.f32 0.17677669, %v4427_v44 }
 0x8c1   : > { %v9430_v49 = vpop.f32.mrf.mxu0  ;;  %v9436_v50 = vpop.f32.mrf.mxu1 }
 0x8c2   : > { %v4536_v51 = vadd.f32 %v4528_v47, %v980_v46  ;;  %v4538_v63 = vadd.f32 %v4530_v48, %v980_v46 }
 0x8c3   : > { %v4383_v52 = vpop.f32.mrf.mxu0  ;;  %v4430_v55 = vpop.f32.mrf.mxu1 }
 0x8c4   : > { %v4529_v56 = vmul.f32 0.17677669, %v4383_v52  ;;  %v4531_v61 = vmul.f32 0.17677669, %v4430_v55  ;;  %v4544_v62 = vsel %vm2497_vm2, %v4536_v51, -inf  ;;  %v4550_v3 = vsel %vm2497_vm2, %v4538_v63, -inf }
 0x8c5   : > { %v9437_v0 = vpop.f32.mrf.mxu1  ;;  %4545 = vmax.xlane.f32.xlu0 %v4544_v62  ;;  %v9431_v1 = vpop.f32.mrf.mxu0 }
 0x8c6   : > { %v4537_v2 = vadd.f32 %v4529_v56, %v981_v19  ;;  %v4539_v6 = vadd.f32 %v4531_v61, %v981_v19 }
 0x8c8   : > { %v4547_v5 = vsel %vm2497_vm2, %v4537_v2, -inf  ;;  %v4553_v53 = vsel %vm2497_vm2, %v4539_v6, -inf }
 0x8c9   : > { %4551 = vmax.xlane.f32.xlu0 %v4550_v3  ;;  %4548 = vmax.xlane.f32.xlu1 %v4547_v5 }
 0x8cd   : > { %4554 = vmax.xlane.f32.xlu1 %v4553_v53 }
 0x8df   : > { %v4474_v57 = vpop.f32.mrf.mxu0  ;;  %v4521_v59 = vpop.f32.mrf.mxu1 }
 0x8e0   : > { %v4532_v7 = vmul.f32 0.17677669, %v4474_v57  ;;  %v4534_v8 = vmul.f32 0.17677669, %v4521_v59 }
 0x8e1   : > { %v9442_v9 = vpop.f32.mrf.mxu0  ;;  %v9448_v10 = vpop.f32.mrf.mxu1 }
 0x8e2   : > { %v4540_v11 = vadd.f32 %v4532_v7, %v980_v46  ;;  %v4542_v60 = vadd.f32 %v4534_v8, %v980_v46  ;;  %v10101_v8 = vld [vmem:[%s11931_s1 + $0x8] sm:$0xff]   ;;  %v10102_v9 = vld [vmem:[%s11931_s1] sm:$0xff]   ;;  %v10103_v10 = vld [vmem:[%s11931_s1 + $0x18] sm:$0xff]  }
 0x8e3   : > { %v4477_v45 = vpop.f32.mrf.mxu0  ;;  %v4524_v12 = vpop.f32.mrf.mxu1 }
 0x8e4   : > { %v4533_v13 = vmul.f32 0.17677669, %v4477_v45  ;;  %v4535_v54 = vmul.f32 0.17677669, %v4524_v12  ;;  %v4556_v58 = vsel %vm2497_vm2, %v4540_v11, -inf  ;;  %v4562_v17 = vsel %vm2497_vm2, %v4542_v60, -inf }
 0x8e5   : > { %v9449_v14 = vpop.f32.mrf.mxu1  ;;  %4557 = vmax.xlane.f32.xlu0 %v4556_v58  ;;  %v9443_v15 = vpop.f32.mrf.mxu0 }
 0x8e6   : > { %v4541_v16 = vadd.f32 %v4533_v13, %v981_v19  ;;  %v4543_v20 = vadd.f32 %v4535_v54, %v981_v19 }
 0x8e8   : > { %v4559_v18 = vsel %vm2497_vm2, %v4541_v16, -inf  ;;  %v4565_v21 = vsel %vm2497_vm2, %v4543_v20, -inf }
 0x8e9   : > { %4563 = vmax.xlane.f32.xlu0 %v4562_v17  ;;  %4560 = vmax.xlane.f32.xlu1 %v4559_v18 }
 0x8ed   : > { %4566 = vmax.xlane.f32.xlu1 %v4565_v21 }
 0x94e   : > { %v4546_v22 = vpop.xlane.xlu0 %4545 }
 0x94f   : > { %v4568_v23 = vsub.f32 %v4536_v51, %v4546_v22 }
 0x951   : > { %v4576_v24 = vmul.f32 1.442695, %v4568_v23 }
 0x952   : > { %v4552_v25 = vpop.xlane.xlu0 %4551  ;;  %v4549_v26 = vpop.xlane.xlu1 %4548 }
 0x953   : > { %10333 = vpow2.f32 %v4576_v24  ;;  %v4570_v27 = vsub.f32 %v4538_v63, %v4552_v25  ;;  %v4569_v28 = vsub.f32 %v4537_v2, %v4549_v26  ;;  %v10105_v24 = vld [vmem:[%s11931_s1 + $0x28] sm:$0xff]  }
 0x955   : > { %v4580_v29 = vmul.f32 1.442695, %v4570_v27  ;;  %v4578_v30 = vmul.f32 1.442695, %v4569_v28 }
 0x956   : > { %v4555_v33 = vpop.xlane.xlu1 %4554 }
 0x957   : > { %10335 = vpow2.f32 %v4580_v29  ;;  %v4571_v34 = vsub.f32 %v4539_v6, %v4555_v33  ;;  %v10107_v33 = vld [vmem:[%s11931_s1 + $0x38] sm:$0xff]  }
 0x958   : > { %10337 = vpow2.f32 %v4578_v30 }
 0x959   : > { %v4582_v41 = vmul.f32 1.442695, %v4571_v34 }
 0x95b   : > { %10339 = vpow2.f32 %v4582_v41  ;;  %v10106_v41 = vld [vmem:[%s11931_s1 + $0x20] sm:$0xff]  }
 0x960   : > { %v10334_v42 = vpop.eup %10333 }
 0x961   : > { %v4592_v43 = vsel %vm2497_vm2, %v10334_v42, 0.0 }
 0x962   : > { %4593 = vadd.xlane.f32.xlu0 %v4592_v43 }
 0x964   : > { %v10336_v44 = vpop.eup %10335 }
 0x965   : > { %v10338_v46 = vpop.eup %10337  ;;  %v4598_v47 = vsel %vm2497_vm2, %v10336_v44, 0.0 }
 0x966   : > { %4599 = vadd.xlane.f32.xlu0 %v4598_v47  ;;  %v4595_v48 = vsel %vm2497_vm2, %v10338_v46, 0.0  ;;  %v4616_v49 = vpack.c.bf16 %v10338_v46, %v10334_v42  ;;  %v10108_v42 = vld [vmem:[%s11931_s1 + $0x30] sm:$0xff]  }
 0x967   : > { %4596 = vadd.xlane.f32.xlu1 %v4595_v48 }
 0x968   : > { %v10340_v50 = vpop.eup %10339  ;;  %9453 = vmatmul.mubr.msk.bf16.vlgmr.msra.gmra.mxu0 %vm2497_vm2, %v4616_v49 }
 0x969   : > { %9463 = vmatpush3.bf16.msra.mxu0 %v4622_v38  ;;  %v4601_v51 = vsel %vm2497_vm2, %v10340_v50, 0.0  ;;  %v4617_v52 = vpack.c.bf16 %v10340_v50, %v10336_v44  ;;  %9464 = vmatprep.mubr.msk.bf16.mxu0 %vm10517_vm0, %v10516_v4 }
 0x96a   : > { %9474 = vmatprep.subr.bf16.mxu0 %v10516_v4 }
 0x96b   : > { %4602 = vadd.xlane.f32.xlu1 %v4601_v51  ;;  %9459 = vmatmul.mubr.msk.bf16.vlgmr.msra.gmra.mxu1 %vm2497_vm2, %v4617_v52 }
 0x96c   : > { %9469 = vmatpush3.bf16.msra.mxu1 %v4623_v40  ;;  %9470 = vmatprep.mubr.msk.bf16.mxu1 %vm10517_vm0, %v10516_v4 }
 0x96d   : > { %9482 = vmatprep.subr.bf16.mxu1 %v10516_v4 }
 0x96e   : > { %v4558_v31 = vpop.xlane.xlu0 %4557 }
 0x96f   : > { %v4572_v36 = vsub.f32 %v4540_v11, %v4558_v31  ;;  %v10104_v11 = vld [vmem:[%s11931_s1 + $0x10] sm:$0xff]   ;;  %s11933_s1 = sld [smem:[#allocation15_spill]] }
 0x971   : > { %v4584_v38 = vmul.f32 1.442695, %v4572_v36 }
 0x972   : > { %v4564_v55 = vpop.xlane.xlu0 %4563  ;;  %v4561_v19 = vpop.xlane.xlu1 %4560 }
 0x973   : > { %10341 = vpow2.f32 %v4584_v38  ;;  %v4574_v56 = vsub.f32 %v4542_v60, %v4564_v55  ;;  %v4573_v61 = vsub.f32 %v4541_v16, %v4561_v19 }
 0x975   : > { %v4588_v62 = vmul.f32 1.442695, %v4574_v56  ;;  %v4586_v63 = vmul.f32 1.442695, %v4573_v61 }
 0x976   : > { %v4567_v0 = vpop.xlane.xlu1 %4566 }
 0x977   : > { %10343 = vpow2.f32 %v4588_v62  ;;  %v4575_v1 = vsub.f32 %v4543_v20, %v4567_v0 }
 0x978   : > { %10345 = vpow2.f32 %v4586_v63 }
 0x979   : > { %v4590_v32 = vmul.f32 1.442695, %v4575_v1 }
 0x97b   : > { %10347 = vpow2.f32 %v4590_v32 }
 0x980   : > { %v10342_v37 = vpop.eup %10341 }
 0x981   : > { %v4604_v40 = vsel %vm2497_vm2, %v10342_v37, 0.0 }
 0x982   : > { %4605 = vadd.xlane.f32.xlu0 %v4604_v40 }
 0x984   : > { %v10344_v2 = vpop.eup %10343 }
 0x985   : > { %v10346_v3 = vpop.eup %10345  ;;  %v4610_v5 = vsel %vm2497_vm2, %v10344_v2, 0.0 }
 0x986   : > { %4611 = vadd.xlane.f32.xlu0 %v4610_v5  ;;  %v4607_v6 = vsel %vm2497_vm2, %v10346_v3, 0.0  ;;  %v4618_v53 = vpack.c.bf16 %v10346_v3, %v10342_v37 }
 0x987   : > { %4608 = vadd.xlane.f32.xlu1 %v4607_v6 }
 0x988   : > { %v10348_v57 = vpop.eup %10347  ;;  %9465 = vmatmul.mubr.msk.bf16.vlgmr.msra.gmra.mxu0 %vm2497_vm2, %v4618_v53 }
 0x989   : > { %v4613_v59 = vsel %vm2497_vm2, %v10348_v57, 0.0  ;;  %v4619_v7 = vpack.c.bf16 %v10348_v57, %v10344_v2  ;;  %9478 = vmatprep.mubr.msk.bf16.mxu0 %vm10517_vm0, %v10516_v4  ;;  %9475 = vmatpush3.bf16.msra.mxu0 %v10101_v8 }
 0x98a   : > { %9476 = vmatprep.subr.bf16.mxu0 %v10516_v4 }
 0x98b   : > { %4614 = vadd.xlane.f32.xlu1 %v4613_v59  ;;  %9471 = vmatmul.mubr.msk.bf16.vlgmr.msra.gmra.mxu1 %vm2497_vm2, %v4619_v7 }
 0x98c   : > { %9486 = vmatprep.mubr.msk.bf16.mxu1 %vm10517_vm0, %v10516_v4  ;;  %9483 = vmatpush3.bf16.msra.mxu1 %v10103_v10 }
 0x98d   : > { %9477 = vmatpush3.bf16.msra.mxu0 %v10102_v9  ;;  %9484 = vmatprep.subr.bf16.mxu1 %v10516_v4 }
 0x98e   : > { %9490 = vmatprep.subr.bf16.mxu0 %v10516_v4 }
 0x990   : > { %9485 = vmatpush3.bf16.msra.mxu1 %v10104_v11 }
 0x991   : > { %9498 = vmatprep.subr.bf16.mxu1 %v10516_v4 }
 0x9eb   : > { %v4594_v45 = vpop.xlane.xlu0 %4593 }
 0x9ec   : > { %10349 = vrcp.f32 %v4594_v45  ;;  %v8220_v45 = vld [vmem:[%s11932_s7] ss:$0 sm:$0xff]  ;;  %s11934_s7 = sld [smem:[#allocation13_spill]] }
 0x9ef   : > { %v4600_v13 = vpop.xlane.xlu0 %4599 }
 0x9f0   : > { %v4597_v12 = vpop.xlane.xlu1 %4596 }
 0x9f1   : > { %10351 = vrcp.f32 %v4597_v12 }
 0x9f2   : > { %10353 = vrcp.f32 %v4600_v13 }
 0x9f4   : > { %v4603_v54 = vpop.xlane.xlu1 %4602 }
 0x9f5   : > { %10355 = vrcp.f32 %v4603_v54 }
 0x9f9   : > { %v10350_v14 = vpop.eup %10349 }
 0x9fe   : > { %v10352_v16 = vpop.eup %10351 }
 0x9ff   : > { %v10354_v22 = vpop.eup %10353 }
 0xa02   : > { %v10356_v25 = vpop.eup %10355 }
 0xa0b   : > { %v4606_v43 = vpop.xlane.xlu0 %4605 }
 0xa0c   : > { %10357 = vrcp.f32 %v4606_v43  ;;  %v10115_v43 = vld [vmem:[%s11933_s1 + $0x20] sm:$0xff]  }
 0xa0f   : > { %v4612_v46 = vpop.xlane.xlu0 %4611 }
 0xa10   : > { %v4609_v44 = vpop.xlane.xlu1 %4608 }
 0xa11   : > { %10359 = vrcp.f32 %v4609_v44  ;;  %v10116_v44 = vld [vmem:[%s11933_s1 + $0x60] sm:$0xff]  }
 0xa12   : > { %10361 = vrcp.f32 %v4612_v46  ;;  %v10117_v46 = vld [vmem:[%s11933_s1 + $0x18] sm:$0xff]  }
 0xa14   : > { %v4615_v47 = vpop.xlane.xlu1 %4614 }
 0xa15   : > { %10363 = vrcp.f32 %v4615_v47  ;;  %v10118_v47 = vld [vmem:[%s11933_s1 + $0x58] sm:$0xff]  }
 0xa19   : > { %v10358_v50 = vpop.eup %10357 }
 0xa1e   : > { %v10360_v52 = vpop.eup %10359 }
 0xa1f   : > { %v10362_v19 = vpop.eup %10361 }
 0xa22   : > { %v10364_v61 = vpop.eup %10363 }
 0xa28   : > { %v4661_v58 = vpop.f32.mrf.mxu0 }
 0xa29   : > { %v4808_v18 = vmul.f32 %v10350_v14, %v4661_v58 }
 0xa2a   : > { %v9454_v60 = vpop.f32.mrf.mxu0 }
 0xa2b   : > { %v4705_v15 = vpop.f32.mrf.mxu1 }
 0xa2c   : > { %v4664_v17 = vpop.f32.mrf.mxu0  ;;  %v4810_v28 = vmul.f32 %v10354_v22, %v4705_v15 }
 0xa2d   : > { %v4809_v20 = vmul.f32 %v10352_v16, %v4664_v17  ;;  %v9460_v21 = vpop.f32.mrf.mxu1 }
 0xa2e   : > { %v9455_v23 = vpop.f32.mrf.mxu0 }
 0xa2f   : > { %v4816_v26 = vpack.c.bf16 %v4809_v20, %v4808_v18  ;;  %v4708_v27 = vpop.f32.mrf.mxu1  ;;  %v10109_v23 = vld [vmem:[%s11933_s1 + $0x38] sm:$0xff]  }
 0xa30   : > { %v4811_v29 = vmul.f32 %v10356_v25, %v4708_v27 }
 0xa31   : > { %9479 = vmatmul.mubr.msk.bf16.vlgmr.msra.gmra.mxu0 %vm2292_vm1, %v4816_v26  ;;  %v9461_v30 = vpop.f32.mrf.mxu1 }
 0xa32   : > { %v4817_v34 = vpack.c.bf16 %v4811_v29, %v4810_v28  ;;  %9491 = vmatpush3.bf16.msra.mxu0 %v10105_v24  ;;  %9494 = vmatprep.mubr.msk.bf16.mxu0 %vm10517_vm0, %v10516_v4  ;;  %v10110_v24 = vld [vmem:[%s11933_s1 + $0x78] sm:$0xff]  }
 0xa33   : > { %9492 = vmatprep.subr.bf16.mxu0 %v10516_v4 }
 0xa34   : > { %9487 = vmatmul.mubr.msk.bf16.vlgmr.msra.gmra.mxu1 %vm2292_vm1, %v4817_v34  ;;  %v10112_v34 = vld [vmem:[%s11933_s1 + $0x70] sm:$0xff]  }
 0xa35   : > { %9499 = vmatpush3.bf16.msra.mxu1 %v10107_v33  ;;  %9502 = vmatprep.mubr.msk.bf16.mxu1 %vm10517_vm0, %v10516_v4  ;;  %v10111_v33 = vld [vmem:[%s11933_s1 + $0x30] sm:$0xff]  }
 0xa36   : > { %9493 = vmatpush3.bf16.msra.mxu0 %v10106_v41  ;;  %9500 = vmatprep.subr.bf16.mxu1 %v10516_v4  ;;  %v10113_v41 = vld [vmem:[%s11933_s1 + $0x28] sm:$0xff]  }
 0xa37   : > { %9506 = vmatprep.subr.bf16.mxu0 %v10516_v4 }
 0xa39   : > { %9501 = vmatpush3.bf16.msra.mxu1 %v10108_v42  ;;  %v10114_v42 = vld [vmem:[%s11933_s1 + $0x68] sm:$0xff]  }
 0xa3a   : > { %9526 = vmatprep.subr.bf16.mxu1 %v10516_v4 }
 0xa48   : > { %v4749_v48 = vpop.f32.mrf.mxu0 }
 0xa49   : > { %v4812_v36 = vmul.f32 %v10358_v50, %v4749_v48  ;;  %v10119_v48 = vld [vmem:[%s11933_s1 + $0x10] sm:$0xff]   ;;  %v10121_v50 = vld [vmem:[%s11933_s1 + $0x8] sm:$0xff]  }
 0xa4a   : > { %v9466_v49 = vpop.f32.mrf.mxu0 }
 0xa4b   : > { %v4793_v51 = vpop.f32.mrf.mxu1  ;;  %v10120_v49 = vld [vmem:[%s11933_s1 + $0x50] sm:$0xff]  }
 0xa4c   : > { %v4752_v31 = vpop.f32.mrf.mxu0  ;;  %v4814_v0 = vmul.f32 %v10362_v19, %v4793_v51  ;;  %v10122_v51 = vld [vmem:[%s11933_s1 + $0x48] sm:$0xff]  }
 0xa4d   : > { %v4813_v38 = vmul.f32 %v10360_v52, %v4752_v31  ;;  %v9472_v55 = vpop.f32.mrf.mxu1  ;;  %v10123_v52 = vld [vmem:[%s11933_s1] sm:$0xff]  }
 0xa4e   : > { %v9467_v56 = vpop.f32.mrf.mxu0  ;;  %v10124_v31 = vld [vmem:[%s11933_s1 + $0x40] sm:$0xff]  }
 0xa4f   : > { %v4818_v62 = vpack.c.bf16 %v4813_v38, %v4812_v36  ;;  %v4796_v63 = vpop.f32.mrf.mxu1 }
 0xa50   : > { %v4815_v1 = vmul.f32 %v10364_v61, %v4796_v63 }
 0xa51   : > { %9495 = vmatmul.mubr.msk.bf16.vlgmr.msra.gmra.mxu0 %vm2292_vm1, %v4818_v62  ;;  %v9473_v32 = vpop.f32.mrf.mxu1 }
 0xa52   : > { %v4819_v37 = vpack.c.bf16 %v4815_v1, %v4814_v0  ;;  %9522 = vmatprep.mubr.msk.bf16.mxu0 %vm10517_vm0, %v10516_v4  ;;  %9507 = vmatpush3.bf16.msra.mxu0 %v10109_v23  ;;  %v8221_v0 = vld [vmem:[%s11934_s7] ss:$0 sm:$0xff]  ;;  %s11937_s7 = sld [smem:[#allocation6_spill]] }
 0xa53   : > { %9508 = vmatprep.subr.bf16.mxu0 %v10516_v4 }
 0xa54   : > { %9503 = vmatmul.mubr.msk.bf16.vlgmr.msra.gmra.mxu1 %vm2292_vm1, %v4819_v37 }
 0xa55   : > { %9542 = vmatprep.mubr.msk.bf16.mxu1 %vm10517_vm0, %v10516_v4  ;;  %9527 = vmatpush3.bf16.msra.mxu1 %v10110_v24 }
 0xa56   : > { %9528 = vmatprep.subr.bf16.mxu1 %v10516_v4  ;;  %9509 = vmatpush3.bf16.msra.mxu0 %v10111_v33 }
 0xa57   : > { %9510 = vmatprep.subr.bf16.mxu0 %v10516_v4 }
 0xa59   : > { %9529 = vmatpush3.bf16.msra.mxu1 %v10112_v34 }
 0xa5a   : > { %9530 = vmatprep.subr.bf16.mxu1 %v10516_v4  ;;  %9511 = vmatpush3.bf16.msra.mxu0 %v10113_v41 }
 0xa5b   : > { %9512 = vmatprep.subr.bf16.mxu0 %v10516_v4 }
 0xa5d   : > { %9531 = vmatpush3.bf16.msra.mxu1 %v10114_v42 }
 0xa5e   : > { %9532 = vmatprep.subr.bf16.mxu1 %v10516_v4  ;;  %9513 = vmatpush3.bf16.msra.mxu0 %v10115_v43 }
 0xa5f   : > { %9514 = vmatprep.subr.bf16.mxu0 %v10516_v4 }
 0xa61   : > { %9533 = vmatpush3.bf16.msra.mxu1 %v10116_v44 }
 0xa62   : > { %9534 = vmatprep.subr.bf16.mxu1 %v10516_v4  ;;  %9515 = vmatpush3.bf16.msra.mxu0 %v10117_v46 }
 0xa63   : > { %9516 = vmatprep.subr.bf16.mxu0 %v10516_v4 }
 0xa65   : > { %9535 = vmatpush3.bf16.msra.mxu1 %v10118_v47 }
 0xa66   : > { %9536 = vmatprep.subr.bf16.mxu1 %v10516_v4  ;;  %9517 = vmatpush3.bf16.msra.mxu0 %v10119_v48 }
 0xa67   : > { %9518 = vmatprep.subr.bf16.mxu0 %v10516_v4 }
 0xa69   : > { %9537 = vmatpush3.bf16.msra.mxu1 %v10120_v49 }
 0xa6a   : > { %9538 = vmatprep.subr.bf16.mxu1 %v10516_v4  ;;  %9519 = vmatpush3.bf16.msra.mxu0 %v10121_v50 }
 0xa6b   : > { %9520 = vmatprep.subr.bf16.mxu0 %v10516_v4 }
 0xa6d   : > { %9539 = vmatpush3.bf16.msra.mxu1 %v10122_v51 }
 0xa6e   : > { %9540 = vmatprep.subr.bf16.mxu1 %v10516_v4  ;;  %9521 = vmatpush3.bf16.msra.mxu0 %v10123_v52 }
 0xa6f   : > { %9546 = vmatprep.subr.bf16.mxu0 %v10516_v4 }
 0xa71   : > { %9541 = vmatpush3.bf16.msra.mxu1 %v10124_v31 }
 0xa72   : > { %9566 = vmatprep.subr.bf16.mxu1 %v10516_v4 }
 0xaf1   : > { %v4885_v40 = vpop.f32.mrf.mxu0 }
 0xaf3   : > { %v9480_v2 = vpop.f32.mrf.mxu0 }
 0xaf4   : > { %v4941_v3 = vpop.f32.mrf.mxu1 }
 0xaf5   : > { %v4888_v5 = vpop.f32.mrf.mxu0  ;;  %v5060_v7 = vadd.f32 %v4941_v3, %v4885_v40  ;;  %v8222_v40 = vld [vmem:[%s11935_s3] ss:$0 sm:$0xff]  ;;  %s11936_s3 = sld [smem:[#allocation16_spill]] }
 0xaf6   : > { %v9488_v6 = vpop.f32.mrf.mxu1 }
 0xaf7   : > { %v9481_v53 = vpop.f32.mrf.mxu0  ;;  %v10125_v6 = vld [vmem:[%s11933_s1 + $0xb8] sm:$0xff]  }
 0xaf8   : > { %v4944_v57 = vpop.f32.mrf.mxu1  ;;  %v10126_v53 = vld [vmem:[%s11933_s1 + $0xf8] sm:$0xff]  }
 0xaf9   : > { %v5063_v12 = vadd.f32 %v4944_v57, %v4888_v5 }
 0xafa   : > { %v9489_v59 = vpop.f32.mrf.mxu1 }
 0xafb   : > { %v10127_v59 = vld [vmem:[%s11933_s1 + $0xb0] sm:$0xff]   ;;  %v10145_v23 = vld [vmem:[%s11936_s3 + $0x28] sm:$0xff]   ;;  %v10155_v34 = vld [vmem:[%s11936_s3] sm:$0xff]  }
 0xafc   : > { %v10146_v24 = vld [vmem:[%s11936_s3 + $0x68] sm:$0xff]   ;;  %v10156_v41 = vld [vmem:[%s11936_s3 + $0x40] sm:$0xff]   ;;  %v10157_v43 = vld [vmem:[%s11936_s3 + $0xb8] sm:$0xff]  }
 0xafd   : > { %v10158_v44 = vld [vmem:[%s11936_s3 + $0xf8] sm:$0xff]   ;;  %v10159_v46 = vld [vmem:[%s11936_s3 + $0xb0] sm:$0xff]   ;;  %v10161_v48 = vld [vmem:[%s11936_s3 + $0xa8] sm:$0xff]  }
 0xafe   : > { %v10160_v47 = vld [vmem:[%s11936_s3 + $0xf0] sm:$0xff]   ;;  %v10162_v49 = vld [vmem:[%s11936_s3 + $0xe8] sm:$0xff]   ;;  %v10163_v50 = vld [vmem:[%s11936_s3 + $0xa0] sm:$0xff]  }
 0xaff   : > { %v10164_v51 = vld [vmem:[%s11936_s3 + $0xe0] sm:$0xff]   ;;  %v10165_v52 = vld [vmem:[%s11936_s3 + $0x98] sm:$0xff]  }
 0xb00   : > { %v10166_v31 = vld [vmem:[%s11936_s3 + $0xd8] sm:$0xff]  }
 0xb11   : > { %v4997_v8 = vpop.f32.mrf.mxu0 }
 0xb12   : > { %v5061_v9 = vadd.f32 %v5060_v7, %v4997_v8  ;;  %v10128_v7 = vld [vmem:[%s11933_s1 + $0xf0] sm:$0xff]   ;;  %v10129_v8 = vld [vmem:[%s11933_s1 + $0xa8] sm:$0xff]  }
 0xb13   : > { %v9496_v10 = vpop.f32.mrf.mxu0 }
 0xb14   : > { %v5053_v11 = vpop.f32.mrf.mxu1  ;;  %v10131_v10 = vld [vmem:[%s11933_s1 + $0xa0] sm:$0xff]  }
 0xb15   : > { %v5000_v13 = vpop.f32.mrf.mxu0  ;;  %v5062_v54 = vadd.f32 %v5061_v9, %v5053_v11  ;;  %v10130_v9 = vld [vmem:[%s11933_s1 + $0xe8] sm:$0xff]   ;;  %v10132_v11 = vld [vmem:[%s11933_s1 + $0xe0] sm:$0xff]  }
 0xb16   : > { %v9504_v58 = vpop.f32.mrf.mxu1  ;;  %v5064_v60 = vadd.f32 %v5063_v12, %v5000_v13  ;;  %v10134_v12 = vld [vmem:[%s11933_s1 + $0xd8] sm:$0xff]   ;;  %v10135_v13 = vld [vmem:[%s11933_s1 + $0x90] sm:$0xff]  }
 0xb17   : > { %v5073_v14 = vadd.f32 %v8220_v45, %v5062_v54  ;;  %v9497_v15 = vpop.f32.mrf.mxu0  ;;  %v10136_v54 = vld [vmem:[%s11933_s1 + $0xd0] sm:$0xff]   ;;  %v10137_v58 = vld [vmem:[%s11933_s1 + $0x88] sm:$0xff]  }
 0xb18   : > { %v5056_v16 = vpop.f32.mrf.mxu1  ;;  %v10140_v15 = vld [vmem:[%s11933_s1 + $0xc0] sm:$0xff]  }
 0xb19   : > { %v5065_v17 = vadd.f32 %v5064_v60, %v5056_v16  ;;  %v11428_v18 = vadd.f32 %v5073_v14, %v11085_v35  ;;  %v10138_v60 = vld [vmem:[%s11933_s1 + $0xc8] sm:$0xff]   ;;  %v10139_v14 = vld [vmem:[%s11933_s1 + $0x80] sm:$0xff]   ;;  %v10141_v16 = vld [vmem:[%s11936_s3 + $0x38] sm:$0xff]  }
 0xb1a   : > { %v9505_v20 = vpop.f32.mrf.mxu1 }
 0xb1b   : > { %v5074_v21 = vadd.f32 %v8220_v45, %v5065_v17  ;;  %5079 = vadd.xlane.f32.xlu0 %v11428_v18  ;;  %v10133_v45 = vld [vmem:[%s11933_s1 + $0x98] sm:$0xff]   ;;  %v10143_v20 = vld [vmem:[%s11936_s3 + $0x30] sm:$0xff]   ;;  %s7982_s1 = sshll.u32 %s10737_s18, 3  ;;  %s11939_s18 = sld [smem:[#allocation18_spill]] }
 0xb1c   : > { %v10142_v17 = vld [vmem:[%s11936_s3 + $0x78] sm:$0xff]   ;;  %s973_s5 = scalar_lea.vmem %s11937_s7, %s7982_s1  ;;  %s11940_s1 = sld [smem:[#allocation19_spill]] }
 0xb1d   : > { %v11432_v22 = vadd.f32 %v5074_v21, %v11089_v39  ;;  %v10144_v21 = vld [vmem:[%s11936_s3 + $0x70] sm:$0xff]   ;;  %v977_v33 = vld [vmem:[%s973_s5] sm:$0xff]  ;;  %s11938_s5 = sld [smem:[#allocation17_spill]] }
 0xb1e   : > { %v11543_v42 = vpack.c.bf16 %v977_v33, %v977_v33  ;;  %s11941_s7 = sld [smem:[#allocation22_spill]] }
 0xb1f   : > { %5081 = vadd.xlane.f32.xlu1 %v11432_v22 }
 0xba4   : > { %v5080_v35 = vpop.xlane.xlu0 %5079 }
 0xba5   : > { %v5083_v25 = vmul.f32 0.0078125, %v5080_v35  ;;  %v10147_v35 = vld [vmem:[%s11936_s3 + $0x20] sm:$0xff]  }
 0xba7   : > { %v5085_v26 = vsub.f32 %v11428_v18, %v5083_v25  ;;  %v10148_v25 = vld [vmem:[%s11936_s3 + $0x60] sm:$0xff]  }
 0xba8   : > { %v5082_v39 = vpop.xlane.xlu1 %5081 }
 0xba9   : > { %v5084_v27 = vmul.f32 0.0078125, %v5082_v39  ;;  %v5087_v28 = vmul.f32 %v5085_v26, %v5085_v26  ;;  %v10150_v39 = vld [vmem:[%s11936_s3 + $0x58] sm:$0xff]  }
 0xbab   : > { %v5086_v29 = vsub.f32 %v11432_v22, %v5084_v27  ;;  %5089 = vadd.xlane.f32.xlu0 %v5087_v28  ;;  %v10151_v27 = vld [vmem:[%s11936_s3 + $0x10] sm:$0xff]  }
 0xbac   : > { %v10152_v28 = vld [vmem:[%s11936_s3 + $0x50] sm:$0xff]  }
 0xbad   : > { %v5088_v30 = vmul.f32 %v5086_v29, %v5086_v29 }
 0xbaf   : > { %5091 = vadd.xlane.f32.xlu1 %v5088_v30  ;;  %v10154_v30 = vld [vmem:[%s11936_s3 + $0x48] sm:$0xff]  }
 0xc34   : > { %v5090_v36 = vpop.xlane.xlu0 %5089 }
 0xc35   : > { %v5093_v38 = vmul.f32 0.0078125, %v5090_v36  ;;  %v10167_v36 = vld [vmem:[%s11936_s3 + $0x90] sm:$0xff]  }
 0xc37   : > { %v5095_v55 = vadd.f32 1e-05, %v5093_v38  ;;  %v10168_v38 = vld [vmem:[%s11936_s3 + $0xd0] sm:$0xff]  }
 0xc38   : > { %v5092_v19 = vpop.xlane.xlu1 %5091 }
 0xc39   : > { %10365 = vrsqrt.f32 %v5095_v55  ;;  %v5094_v56 = vmul.f32 0.0078125, %v5092_v19  ;;  %v10169_v55 = vld [vmem:[%s11936_s3 + $0x88] sm:$0xff]  }
 0xc3a   : > { %v10170_v19 = vld [vmem:[%s11936_s3 + $0xc8] sm:$0xff]  }
 0xc3b   : > { %v5096_v61 = vadd.f32 1e-05, %v5094_v56  ;;  %v10171_v56 = vld [vmem:[%s11936_s3 + $0x80] sm:$0xff]  }
 0xc3d   : > { %10367 = vrsqrt.f32 %v5096_v61  ;;  %v10172_v61 = vld [vmem:[%s11936_s3 + $0xc0] sm:$0xff]  }
 0xc46   : > { %v10366_v62 = vpop.eup %10365 }
 0xc47   : > { %v5099_v63 = vmul.f32 %v10366_v62, %v5085_v26  ;;  %v10149_v26 = vld [vmem:[%s11936_s3 + $0x18] sm:$0xff]  }
 0xc48   : > { %v10173_v62 = vld [vmem:[%s11938_s5 + $0x38] sm:$0xff]  }
 0xc49   : > { %v5107_v37 = vmul.f32 %v8221_v0, %v5099_v63  ;;  %v10174_v63 = vld [vmem:[%s11938_s5 + $0x78] sm:$0xff]  }
 0xc4a   : > { %v10368_v1 = vpop.eup %10367 }
 0xc4b   : > { %v5100_v32 = vmul.f32 %v10368_v1, %v5086_v29  ;;  %v5115_v3 = vadd.f32 %v8222_v40, %v5107_v37  ;;  %v10153_v29 = vld [vmem:[%s11936_s3 + $0x8] sm:$0xff]   ;;  %v10176_v1 = vld [vmem:[%s11938_s5 + $0x70] sm:$0xff]   ;;  %s11943_s3 = sld [smem:[#allocation21_spill]] }
 0xc4c   : > { %v10178_v37 = vld [vmem:[%s11938_s5 + $0x68] sm:$0xff]  }
 0xc4d   : > { %v5108_v2 = vmul.f32 %v8221_v0, %v5100_v32  ;;  %v10175_v0 = vld [vmem:[%s11938_s5 + $0x30] sm:$0xff]   ;;  %v10177_v32 = vld [vmem:[%s11938_s5 + $0x28] sm:$0xff]  }
 0xc4f   : > { %v5116_v5 = vadd.f32 %v8222_v40, %v5108_v2  ;;  %v10179_v40 = vld [vmem:[%s11938_s5 + $0x20] sm:$0xff]  }
 0xc50   : > { %v10180_v2 = vld [vmem:[%s11938_s5 + $0x60] sm:$0xff]  }
 0xc51   : > { %v5117_v57 = vpack.c.bf16 %v5116_v5, %v5115_v3  ;;  %v10181_v3 = vld [vmem:[%s11938_s5 + $0x18] sm:$0xff]  }
 0xc52   : > { %v10182_v5 = vld [vmem:[%s11938_s5 + $0x58] sm:$0xff]  }
 0xc53   : > { %9523 = vmatmul.mubr.bf16.vlgmr.msra.gmra.mxu0 %v5117_v57  ;;  %9543 = vmatmul.mubr.bf16.vlgmr.msra.gmra.mxu1 %v5117_v57 }
 0xc54   : > { %9547 = vmatpush3.bf16.msra.mxu0 %v10125_v6  ;;  %9567 = vmatpush3.bf16.msra.mxu1 %v10126_v53  ;;  %v10183_v6 = vld [vmem:[%s11938_s5 + $0x10] sm:$0xff]  }
 0xc55   : > { %9548 = vmatprep.subr.bf16.mxu0 %v10516_v4  ;;  %9568 = vmatprep.subr.bf16.mxu1 %v10516_v4  ;;  %v10184_v53 = vld [vmem:[%s11938_s5 + $0x50] sm:$0xff]  }
 0xc56   : > { %9562 = vmatprep.mubr.msk.bf16.mxu0 %vm10517_vm0, %v10516_v4  ;;  %9582 = vmatprep.mubr.msk.bf16.mxu1 %vm10517_vm0, %v10516_v4 }
 0xc58   : > { %9549 = vmatpush3.bf16.msra.mxu0 %v10127_v59  ;;  %9569 = vmatpush3.bf16.msra.mxu1 %v10128_v7  ;;  %v10186_v59 = vld [vmem:[%s11938_s5 + $0x48] sm:$0xff]   ;;  %v10187_v7 = vld [vmem:[%s11938_s5] sm:$0xff]  }
 0xc59   : > { %9550 = vmatprep.subr.bf16.mxu0 %v10516_v4  ;;  %9570 = vmatprep.subr.bf16.mxu1 %v10516_v4 }
 0xc5c   : > { %9551 = vmatpush3.bf16.msra.mxu0 %v10129_v8  ;;  %9571 = vmatpush3.bf16.msra.mxu1 %v10130_v9  ;;  %v10188_v8 = vld [vmem:[%s11938_s5 + $0x40] sm:$0xff]   ;;  %v10189_v9 = vld [vmem:[%s11938_s5 + $0xb8] sm:$0xff]  }
 0xc5d   : > { %9552 = vmatprep.subr.bf16.mxu0 %v10516_v4  ;;  %9572 = vmatprep.subr.bf16.mxu1 %v10516_v4 }
 0xc60   : > { %9553 = vmatpush3.bf16.msra.mxu0 %v10131_v10  ;;  %9573 = vmatpush3.bf16.msra.mxu1 %v10132_v11  ;;  %v10190_v10 = vld [vmem:[%s11938_s5 + $0xf8] sm:$0xff]   ;;  %v10191_v11 = vld [vmem:[%s11938_s5 + $0xb0] sm:$0xff]  }
 0xc61   : > { %9554 = vmatprep.subr.bf16.mxu0 %v10516_v4  ;;  %9574 = vmatprep.subr.bf16.mxu1 %v10516_v4 }
 0xc64   : > { %9555 = vmatpush3.bf16.msra.mxu0 %v10133_v45  ;;  %9575 = vmatpush3.bf16.msra.mxu1 %v10134_v12  ;;  %v10192_v45 = vld [vmem:[%s11938_s5 + $0xf0] sm:$0xff]   ;;  %v10193_v12 = vld [vmem:[%s11938_s5 + $0xa8] sm:$0xff]  }
 0xc65   : > { %9556 = vmatprep.subr.bf16.mxu0 %v10516_v4  ;;  %9576 = vmatprep.subr.bf16.mxu1 %v10516_v4 }
 0xc68   : > { %9557 = vmatpush3.bf16.msra.mxu0 %v10135_v13  ;;  %9577 = vmatpush3.bf16.msra.mxu1 %v10136_v54  ;;  %v10194_v13 = vld [vmem:[%s11938_s5 + $0xe8] sm:$0xff]   ;;  %v10195_v54 = vld [vmem:[%s11938_s5 + $0xa0] sm:$0xff]  }
 0xc69   : > { %9558 = vmatprep.subr.bf16.mxu0 %v10516_v4  ;;  %9578 = vmatprep.subr.bf16.mxu1 %v10516_v4 }
 0xc6c   : > { %9559 = vmatpush3.bf16.msra.mxu0 %v10137_v58  ;;  %9579 = vmatpush3.bf16.msra.mxu1 %v10138_v60  ;;  %v10196_v58 = vld [vmem:[%s11938_s5 + $0xe0] sm:$0xff]   ;;  %v10197_v60 = vld [vmem:[%s11938_s5 + $0x98] sm:$0xff]  }
 0xc6d   : > { %9560 = vmatprep.subr.bf16.mxu0 %v10516_v4  ;;  %9580 = vmatprep.subr.bf16.mxu1 %v10516_v4 }
 0xc70   : > { %9561 = vmatpush3.bf16.msra.mxu0 %v10139_v14  ;;  %9581 = vmatpush3.bf16.msra.mxu1 %v10140_v15  ;;  %v10198_v14 = vld [vmem:[%s11938_s5 + $0xd8] sm:$0xff]   ;;  %v10199_v15 = vld [vmem:[%s11938_s5 + $0x90] sm:$0xff]  }
 0xc71   : > { %9586 = vmatprep.subr.bf16.mxu0 %v10516_v4  ;;  %9606 = vmatprep.subr.bf16.mxu1 %v10516_v4 }
 0xc73   : > { %9563 = vmatmul.mubr.bf16.vlgmr.msra.gmra.mxu0 %v5117_v57  ;;  %9583 = vmatmul.mubr.bf16.vlgmr.msra.gmra.mxu1 %v5117_v57  ;;  %v10185_v57 = vld [vmem:[%s11938_s5 + $0x8] sm:$0xff]  }
 0xc74   : > { %9587 = vmatpush3.bf16.msra.mxu0 %v10141_v16  ;;  %9607 = vmatpush3.bf16.msra.mxu1 %v10142_v17  ;;  %v10200_v16 = vld [vmem:[%s11938_s5 + $0xd0] sm:$0xff]   ;;  %v10201_v17 = vld [vmem:[%s11938_s5 + $0x88] sm:$0xff]  }
 0xc75   : > { %9588 = vmatprep.subr.bf16.mxu0 %v10516_v4  ;;  %9608 = vmatprep.subr.bf16.mxu1 %v10516_v4 }
 0xc76   : > { %9602 = vmatprep.mubr.msk.bf16.mxu0 %vm10517_vm0, %v10516_v4  ;;  %9622 = vmatprep.mubr.msk.bf16.mxu1 %vm10517_vm0, %v10516_v4 }
 0xc78   : > { %9589 = vmatpush3.bf16.msra.mxu0 %v10143_v20  ;;  %9609 = vmatpush3.bf16.msra.mxu1 %v10144_v21  ;;  %v10202_v20 = vld [vmem:[%s11938_s5 + $0xc8] sm:$0xff]   ;;  %v10203_v21 = vld [vmem:[%s11938_s5 + $0x80] sm:$0xff]  }
 0xc79   : > { %9590 = vmatprep.subr.bf16.mxu0 %v10516_v4  ;;  %9610 = vmatprep.subr.bf16.mxu1 %v10516_v4 }
 0xc7c   : > { %9591 = vmatpush3.bf16.msra.mxu0 %v10145_v23  ;;  %9611 = vmatpush3.bf16.msra.mxu1 %v10146_v24  ;;  %v10204_v23 = vld [vmem:[%s11938_s5 + $0xc0] sm:$0xff]  }
 0xc7d   : > { %9592 = vmatprep.subr.bf16.mxu0 %v10516_v4  ;;  %9612 = vmatprep.subr.bf16.mxu1 %v10516_v4 }
 0xc80   : > { %9593 = vmatpush3.bf16.msra.mxu0 %v10147_v35  ;;  %9613 = vmatpush3.bf16.msra.mxu1 %v10148_v25 }
 0xc81   : > { %9594 = vmatprep.subr.bf16.mxu0 %v10516_v4  ;;  %9614 = vmatprep.subr.bf16.mxu1 %v10516_v4 }
 0xc84   : > { %9595 = vmatpush3.bf16.msra.mxu0 %v10149_v26  ;;  %9615 = vmatpush3.bf16.msra.mxu1 %v10150_v39 }
 0xc85   : > { %9596 = vmatprep.subr.bf16.mxu0 %v10516_v4  ;;  %9616 = vmatprep.subr.bf16.mxu1 %v10516_v4 }
 0xc88   : > { %9597 = vmatpush3.bf16.msra.mxu0 %v10151_v27  ;;  %9617 = vmatpush3.bf16.msra.mxu1 %v10152_v28 }
 0xc89   : > { %9598 = vmatprep.subr.bf16.mxu0 %v10516_v4  ;;  %9618 = vmatprep.subr.bf16.mxu1 %v10516_v4 }
 0xc8c   : > { %9599 = vmatpush3.bf16.msra.mxu0 %v10153_v29  ;;  %9619 = vmatpush3.bf16.msra.mxu1 %v10154_v30 }
 0xc8d   : > { %9600 = vmatprep.subr.bf16.mxu0 %v10516_v4  ;;  %9620 = vmatprep.subr.bf16.mxu1 %v10516_v4 }
 0xc90   : > { %9601 = vmatpush3.bf16.msra.mxu0 %v10155_v34  ;;  %9621 = vmatpush3.bf16.msra.mxu1 %v10156_v41 }
 0xc91   : > { %9626 = vmatprep.subr.bf16.mxu0 %v10516_v4  ;;  %9646 = vmatprep.subr.bf16.mxu1 %v10516_v4 }
 0xc93   : > { %9603 = vmatmul.mubr.bf16.vlgmr.msra.gmra.mxu0 %v11543_v42  ;;  %9623 = vmatmul.mubr.bf16.vlgmr.msra.gmra.mxu1 %v11543_v42 }
 0xc94   : > { %9627 = vmatpush3.bf16.msra.mxu0 %v10157_v43  ;;  %9647 = vmatpush3.bf16.msra.mxu1 %v10158_v44 }
 0xc95   : > { %9628 = vmatprep.subr.bf16.mxu0 %v10516_v4  ;;  %9648 = vmatprep.subr.bf16.mxu1 %v10516_v4 }
 0xc96   : > { %9642 = vmatprep.mubr.msk.bf16.mxu0 %vm10517_vm0, %v10516_v4  ;;  %9662 = vmatprep.mubr.msk.bf16.mxu1 %vm10517_vm0, %v10516_v4 }
 0xc98   : > { %9629 = vmatpush3.bf16.msra.mxu0 %v10159_v46  ;;  %9649 = vmatpush3.bf16.msra.mxu1 %v10160_v47 }
 0xc99   : > { %9630 = vmatprep.subr.bf16.mxu0 %v10516_v4  ;;  %9650 = vmatprep.subr.bf16.mxu1 %v10516_v4 }
 0xc9c   : > { %9631 = vmatpush3.bf16.msra.mxu0 %v10161_v48  ;;  %9651 = vmatpush3.bf16.msra.mxu1 %v10162_v49 }
 0xc9d   : > { %9632 = vmatprep.subr.bf16.mxu0 %v10516_v4  ;;  %9652 = vmatprep.subr.bf16.mxu1 %v10516_v4 }
 0xca0   : > { %9633 = vmatpush3.bf16.msra.mxu0 %v10163_v50  ;;  %9653 = vmatpush3.bf16.msra.mxu1 %v10164_v51 }
 0xca1   : > { %9634 = vmatprep.subr.bf16.mxu0 %v10516_v4  ;;  %9654 = vmatprep.subr.bf16.mxu1 %v10516_v4 }
 0xca4   : > { %9635 = vmatpush3.bf16.msra.mxu0 %v10165_v52  ;;  %9655 = vmatpush3.bf16.msra.mxu1 %v10166_v31 }
 0xca5   : > { %9636 = vmatprep.subr.bf16.mxu0 %v10516_v4  ;;  %9656 = vmatprep.subr.bf16.mxu1 %v10516_v4 }
 0xca8   : > { %9637 = vmatpush3.bf16.msra.mxu0 %v10167_v36  ;;  %9657 = vmatpush3.bf16.msra.mxu1 %v10168_v38 }
 0xca9   : > { %9638 = vmatprep.subr.bf16.mxu0 %v10516_v4  ;;  %9658 = vmatprep.subr.bf16.mxu1 %v10516_v4 }
 0xcac   : > { %9639 = vmatpush3.bf16.msra.mxu0 %v10169_v55  ;;  %9659 = vmatpush3.bf16.msra.mxu1 %v10170_v19 }
 0xcad   : > { %9640 = vmatprep.subr.bf16.mxu0 %v10516_v4  ;;  %9660 = vmatprep.subr.bf16.mxu1 %v10516_v4 }
 0xcb0   : > { %9641 = vmatpush3.bf16.msra.mxu0 %v10171_v56  ;;  %9661 = vmatpush3.bf16.msra.mxu1 %v10172_v61 }
 0xcb1   : > { %9666 = vmatprep.subr.bf16.mxu0 %v10516_v4  ;;  %9686 = vmatprep.subr.bf16.mxu1 %v10516_v4 }
 0xcb3   : > { %9643 = vmatmul.mubr.bf16.vlgmr.msra.gmra.mxu0 %v11543_v42  ;;  %9663 = vmatmul.mubr.bf16.vlgmr.msra.gmra.mxu1 %v11543_v42 }
 0xcb4   : > { %9667 = vmatpush3.bf16.msra.mxu0 %v10173_v62  ;;  %9687 = vmatpush3.bf16.msra.mxu1 %v10174_v63 }
 0xcb5   : > { %9668 = vmatprep.subr.bf16.mxu0 %v10516_v4  ;;  %9688 = vmatprep.subr.bf16.mxu1 %v10516_v4 }
 0xcb6   : > { %9682 = vmatprep.mubr.msk.bf16.mxu0 %vm10517_vm0, %v10516_v4  ;;  %9702 = vmatprep.mubr.msk.bf16.mxu1 %vm10517_vm0, %v10516_v4 }
 0xcb8   : > { %9669 = vmatpush3.bf16.msra.mxu0 %v10175_v0  ;;  %9689 = vmatpush3.bf16.msra.mxu1 %v10176_v1 }
 0xcb9   : > { %9670 = vmatprep.subr.bf16.mxu0 %v10516_v4  ;;  %9690 = vmatprep.subr.bf16.mxu1 %v10516_v4 }
 0xcbc   : > { %9671 = vmatpush3.bf16.msra.mxu0 %v10177_v32  ;;  %9691 = vmatpush3.bf16.msra.mxu1 %v10178_v37 }
 0xcbd   : > { %9672 = vmatprep.subr.bf16.mxu0 %v10516_v4  ;;  %9692 = vmatprep.subr.bf16.mxu1 %v10516_v4 }
 0xcc0   : > { %9673 = vmatpush3.bf16.msra.mxu0 %v10179_v40  ;;  %9693 = vmatpush3.bf16.msra.mxu1 %v10180_v2 }
 0xcc1   : > { %9674 = vmatprep.subr.bf16.mxu0 %v10516_v4  ;;  %9694 = vmatprep.subr.bf16.mxu1 %v10516_v4 }
 0xcc4   : > { %9675 = vmatpush3.bf16.msra.mxu0 %v10181_v3  ;;  %9695 = vmatpush3.bf16.msra.mxu1 %v10182_v5 }
 0xcc5   : > { %9676 = vmatprep.subr.bf16.mxu0 %v10516_v4  ;;  %9696 = vmatprep.subr.bf16.mxu1 %v10516_v4 }
 0xcc8   : > { %9677 = vmatpush3.bf16.msra.mxu0 %v10183_v6  ;;  %9697 = vmatpush3.bf16.msra.mxu1 %v10184_v53 }
 0xcc9   : > { %9678 = vmatprep.subr.bf16.mxu0 %v10516_v4  ;;  %9698 = vmatprep.subr.bf16.mxu1 %v10516_v4 }
 0xccc   : > { %9679 = vmatpush3.bf16.msra.mxu0 %v10185_v57  ;;  %9699 = vmatpush3.bf16.msra.mxu1 %v10186_v59 }
 0xccd   : > { %9680 = vmatprep.subr.bf16.mxu0 %v10516_v4  ;;  %9700 = vmatprep.subr.bf16.mxu1 %v10516_v4 }
 0xcd0   : > { %9681 = vmatpush3.bf16.msra.mxu0 %v10187_v7  ;;  %9701 = vmatpush3.bf16.msra.mxu1 %v10188_v8 }
 0xcd1   : > { %9706 = vmatprep.subr.bf16.mxu0 %v10516_v4  ;;  %9726 = vmatprep.subr.bf16.mxu1 %v10516_v4 }
 0xcd3   : > { %9683 = vmatmul.mubr.bf16.vlgmr.msra.gmra.mxu0 %v11543_v42  ;;  %9703 = vmatmul.mubr.bf16.vlgmr.msra.gmra.mxu1 %v11543_v42 }
 0xcd4   : > { %9707 = vmatpush3.bf16.msra.mxu0 %v10189_v9  ;;  %9727 = vmatpush3.bf16.msra.mxu1 %v10190_v10 }
 0xcd5   : > { %9708 = vmatprep.subr.bf16.mxu0 %v10516_v4  ;;  %9728 = vmatprep.subr.bf16.mxu1 %v10516_v4 }
 0xcd6   : > { %9722 = vmatprep.mubr.msk.bf16.mxu0 %vm10517_vm0, %v10516_v4  ;;  %9742 = vmatprep.mubr.msk.bf16.mxu1 %vm10517_vm0, %v10516_v4 }
 0xcd8   : > { %9709 = vmatpush3.bf16.msra.mxu0 %v10191_v11  ;;  %9729 = vmatpush3.bf16.msra.mxu1 %v10192_v45 }
 0xcd9   : > { %9710 = vmatprep.subr.bf16.mxu0 %v10516_v4  ;;  %9730 = vmatprep.subr.bf16.mxu1 %v10516_v4 }
 0xcdc   : > { %9711 = vmatpush3.bf16.msra.mxu0 %v10193_v12  ;;  %9731 = vmatpush3.bf16.msra.mxu1 %v10194_v13 }
 0xcdd   : > { %9712 = vmatprep.subr.bf16.mxu0 %v10516_v4  ;;  %9732 = vmatprep.subr.bf16.mxu1 %v10516_v4 }
 0xce0   : > { %9713 = vmatpush3.bf16.msra.mxu0 %v10195_v54  ;;  %9733 = vmatpush3.bf16.msra.mxu1 %v10196_v58 }
 0xce1   : > { %9714 = vmatprep.subr.bf16.mxu0 %v10516_v4  ;;  %9734 = vmatprep.subr.bf16.mxu1 %v10516_v4 }
 0xce4   : > { %9715 = vmatpush3.bf16.msra.mxu0 %v10197_v60  ;;  %9735 = vmatpush3.bf16.msra.mxu1 %v10198_v14 }
 0xce5   : > { %9716 = vmatprep.subr.bf16.mxu0 %v10516_v4  ;;  %9736 = vmatprep.subr.bf16.mxu1 %v10516_v4 }
 0xce8   : > { %9717 = vmatpush3.bf16.msra.mxu0 %v10199_v15  ;;  %9737 = vmatpush3.bf16.msra.mxu1 %v10200_v16 }
 0xce9   : > { %9718 = vmatprep.subr.bf16.mxu0 %v10516_v4  ;;  %9738 = vmatprep.subr.bf16.mxu1 %v10516_v4 }
 0xcec   : > { %9719 = vmatpush3.bf16.msra.mxu0 %v10201_v17  ;;  %9739 = vmatpush3.bf16.msra.mxu1 %v10202_v20 }
 0xced   : > { %9720 = vmatprep.subr.bf16.mxu0 %v10516_v4  ;;  %9740 = vmatprep.subr.bf16.mxu1 %v10516_v4 }
 0xcf0   : > { %9721 = vmatpush3.bf16.msra.mxu0 %v10203_v21  ;;  %9741 = vmatpush3.bf16.msra.mxu1 %v10204_v23 }
 0xcf1   : > { %9746 = vmatprep.subr.bf16.mxu0 %v10516_v4  ;;  %9752 = vmatprep.subr.bf16.mxu1 %v10516_v4 }
 0xcf3   : > { %9723 = vmatmul.mubr.bf16.vlgmr.msra.gmra.mxu0 %v11543_v42  ;;  %9743 = vmatmul.mubr.bf16.vlgmr.msra.gmra.mxu1 %v11543_v42 }
 0xcf4   : > { %9748 = vmatprep.mubr.msk.bf16.mxu0 %vm10517_vm0, %v10516_v4  ;;  %9754 = vmatprep.mubr.msk.bf16.mxu1 %vm10517_vm0, %v10516_v4 }
 0xd13   : > { %v5265_v24 = vpop.f32.mrf.mxu0  ;;  %v5354_v35 = vpop.f32.mrf.mxu1 }
 0xd15   : > { %v9524_v25 = vpop.f32.mrf.mxu0  ;;  %v9544_v26 = vpop.f32.mrf.mxu1 }
 0xd17   : > { %v5268_v39 = vpop.f32.mrf.mxu0  ;;  %v5357_v27 = vpop.f32.mrf.mxu1 }
 0xd18   : > { %v6371_v28 = vpack.c.bf16 %v5268_v39, %v5265_v24  ;;  %v6372_v29 = vpack.c.bf16 %v5357_v27, %v5354_v35 }
 0xd19   : > { %v9525_v30 = vpop.f32.mrf.mxu0  ;;  %v9545_v33 = vpop.f32.mrf.mxu1 }
 0xd33   : > { %v5443_v34 = vpop.f32.mrf.mxu0  ;;  %v5532_v41 = vpop.f32.mrf.mxu1 }
 0xd35   : > { %v9564_v43 = vpop.f32.mrf.mxu0  ;;  %v9584_v42 = vpop.f32.mrf.mxu1 }
 0xd37   : > { %v5446_v44 = vpop.f32.mrf.mxu0  ;;  %v5535_v46 = vpop.f32.mrf.mxu1 }
 0xd38   : > { %v6373_v47 = vpack.c.bf16 %v5446_v44, %v5443_v34  ;;  %v6374_v48 = vpack.c.bf16 %v5535_v46, %v5532_v41 }
 0xd39   : > { %v9565_v49 = vpop.f32.mrf.mxu0  ;;  %v9585_v50 = vpop.f32.mrf.mxu1 }
 0xd53   : > { %v5685_v51 = vpop.f32.mrf.mxu0  ;;  %v5773_v52 = vpop.f32.mrf.mxu1 }
 0xd54   : > { %v6375_v31 = vpack.c.bf16 %v5685_v51, %v5685_v51  ;;  %v6376_v36 = vpack.c.bf16 %v5773_v52, %v5773_v52 }
 0xd55   : > { %v9604_v38 = vpop.f32.mrf.mxu0  ;;  %v9624_v55 = vpop.f32.mrf.mxu1 }
 0xd56   : > { %v6383_v19 = vsel %vm2292_vm1, %v6375_v31, 0  ;;  %v6430_v56 = vsel %vm2292_vm1, %v6376_v36, 0 }
 0xd57   : > { %v5688_v61 = vpop.f32.mrf.mxu0  ;;  %v5776_v62 = vpop.f32.mrf.mxu1  ;;  %9747 = vmatpush3.bf16.xpose.msra.mxu0 %v6383_v19  ;;  %9753 = vmatpush3.bf16.xpose.msra.mxu1 %v6430_v56 }
 0xd58   : > { %9758 = vmatprep.subr.bf16.mxu0 %v10516_v4  ;;  %9764 = vmatprep.subr.bf16.mxu1 %v10516_v4 }
 0xd59   : > { %v9605_v63 = vpop.f32.mrf.mxu0  ;;  %v9625_v0 = vpop.f32.mrf.mxu1 }
 0xd5e   : > { %9749 = vmatmul.mubr.msk.bf16.vlgmr.msra.gmra.mxu0 %vm2292_vm1, %v6371_v28  ;;  %9755 = vmatmul.mubr.msk.bf16.vlgmr.msra.gmra.mxu1 %vm2292_vm1, %v6372_v29 }
 0xd5f   : > { %9760 = vmatprep.mubr.msk.bf16.mxu0 %vm10517_vm0, %v10516_v4  ;;  %9766 = vmatprep.mubr.msk.bf16.mxu1 %vm10517_vm0, %v10516_v4 }
 0xd73   : > { %v5861_v1 = vpop.f32.mrf.mxu0  ;;  %v5949_v32 = vpop.f32.mrf.mxu1 }
 0xd74   : > { %v6377_v37 = vpack.c.bf16 %v5861_v1, %v5861_v1  ;;  %v6378_v40 = vpack.c.bf16 %v5949_v32, %v5949_v32 }
 0xd75   : > { %v9644_v2 = vpop.f32.mrf.mxu0  ;;  %v9664_v3 = vpop.f32.mrf.mxu1 }
 0xd76   : > { %v6477_v5 = vsel %vm2292_vm1, %v6377_v37, 0  ;;  %v6524_v6 = vsel %vm2292_vm1, %v6378_v40, 0 }
 0xd77   : > { %v5864_v53 = vpop.f32.mrf.mxu0  ;;  %v5952_v57 = vpop.f32.mrf.mxu1  ;;  %9759 = vmatpush3.bf16.xpose.msra.mxu0 %v6477_v5  ;;  %9765 = vmatpush3.bf16.xpose.msra.mxu1 %v6524_v6 }
 0xd78   : > { %9770 = vmatprep.subr.bf16.mxu0 %v10516_v4  ;;  %9776 = vmatprep.subr.bf16.mxu1 %v10516_v4 }
 0xd79   : > { %v9645_v59 = vpop.f32.mrf.mxu0  ;;  %v9665_v7 = vpop.f32.mrf.mxu1 }
 0xd7e   : > { %9761 = vmatmul.mubr.msk.bf16.vlgmr.msra.gmra.mxu0 %vm2292_vm1, %v6373_v47  ;;  %9767 = vmatmul.mubr.msk.bf16.vlgmr.msra.gmra.mxu1 %vm2292_vm1, %v6374_v48 }
 0xd7f   : > { %9772 = vmatprep.mubr.msk.bf16.mxu0 %vm10517_vm0, %v10516_v4  ;;  %9778 = vmatprep.mubr.msk.bf16.mxu1 %vm10517_vm0, %v10516_v4 }
 0xd93   : > { %v6101_v8 = vpop.f32.mrf.mxu0  ;;  %v6189_v9 = vpop.f32.mrf.mxu1 }
 0xd94   : > { %v6652_v10 = vpack.c.bf16 %v6101_v8, %v6101_v8  ;;  %v6653_v11 = vpack.c.bf16 %v6189_v9, %v6189_v9 }
 0xd95   : > { %v9684_v45 = vpop.f32.mrf.mxu0  ;;  %v9704_v12 = vpop.f32.mrf.mxu1 }
 0xd96   : > { %v6661_v13 = vsel %vm6659_vm3, %v6652_v10, 0  ;;  %v6708_v54 = vsel %vm6659_vm3, %v6653_v11, 0 }
 0xd97   : > { %v6104_v58 = vpop.f32.mrf.mxu0  ;;  %v6192_v60 = vpop.f32.mrf.mxu1  ;;  %9771 = vmatpush3.bf16.msra.mxu0 %v6661_v13  ;;  %9777 = vmatpush3.bf16.msra.mxu1 %v6708_v54 }
 0xd98   : > { %9782 = vmatprep.subr.bf16.mxu0 %v10516_v4  ;;  %9788 = vmatprep.subr.bf16.mxu1 %v10516_v4 }
 0xd99   : > { %v9685_v14 = vpop.f32.mrf.mxu0  ;;  %v9705_v15 = vpop.f32.mrf.mxu1 }
 0xdb3   : > { %v6277_v16 = vpop.f32.mrf.mxu0  ;;  %v6365_v17 = vpop.f32.mrf.mxu1 }
 0xdb4   : > { %v6654_v20 = vpack.c.bf16 %v6277_v16, %v6277_v16  ;;  %v6655_v21 = vpack.c.bf16 %v6365_v17, %v6365_v17 }
 0xdb5   : > { %v9724_v23 = vpop.f32.mrf.mxu0  ;;  %v9744_v24 = vpop.f32.mrf.mxu1 }
 0xdb6   : > { %v11692_v35 = vsel %vm6659_vm3, %v6654_v20, 0  ;;  %v11695_v25 = vsel %vm6659_vm3, %v6655_v21, 0 }
 0xdb7   : > { %v6280_v26 = vpop.f32.mrf.mxu0  ;;  %v6368_v39 = vpop.f32.mrf.mxu1 }
 0xdb9   : > { %v9725_v27 = vpop.f32.mrf.mxu0  ;;  %v9745_v28 = vpop.f32.mrf.mxu1 }
 0xe1e   : > { %v6419_v29 = vpop.f32.mrf.mxu0  ;;  %v6466_v30 = vpop.f32.mrf.mxu1 }
 0xe1f   : > { %v6567_v33 = vmul.f32 0.17677669, %v6419_v29  ;;  %v6569_v43 = vmul.f32 0.17677669, %v6466_v30 }
 0xe20   : > { %v9750_v34 = vpop.f32.mrf.mxu0  ;;  %v9756_v41 = vpop.f32.mrf.mxu1 }
 0xe21   : > { %v6576_v42 = vsel %vm6575_vm4, %v6567_v33, -inf  ;;  %v6582_v51 = vsel %vm6575_vm4, %v6569_v43, -inf }
 0xe22   : > { %v6469_v44 = vpop.f32.mrf.mxu1  ;;  %6577 = vmax.xlane.f32.xlu0 %v6576_v42  ;;  %v6422_v46 = vpop.f32.mrf.mxu0 }
 0xe23   : > { %v6568_v47 = vmul.f32 0.17677669, %v6422_v46  ;;  %v6570_v50 = vmul.f32 0.17677669, %v6469_v44 }
 0xe24   : > { %v9751_v48 = vpop.f32.mrf.mxu0  ;;  %v9757_v49 = vpop.f32.mrf.mxu1 }
 0xe25   : > { %v6579_v52 = vsel %vm6575_vm4, %v6568_v47, -inf  ;;  %v6585_v31 = vsel %vm6575_vm4, %v6570_v50, -inf }
 0xe26   : > { %6583 = vmax.xlane.f32.xlu0 %v6582_v51  ;;  %6580 = vmax.xlane.f32.xlu1 %v6579_v52 }
 0xe2a   : > { %6586 = vmax.xlane.f32.xlu1 %v6585_v31  ;;  %v10205_v31 = vld [vmem:[%s11939_s18 + $0x8] sm:$0xff]  }
 0xe3e   : > { %v6513_v36 = vpop.f32.mrf.mxu0  ;;  %v6560_v38 = vpop.f32.mrf.mxu1 }
 0xe3f   : > { %v6571_v55 = vmul.f32 0.17677669, %v6513_v36  ;;  %v6573_v61 = vmul.f32 0.17677669, %v6560_v38  ;;  %v10206_v36 = vld [vmem:[%s11939_s18] sm:$0xff]   ;;  %v10207_v38 = vld [vmem:[%s11939_s18 + $0x18] sm:$0xff]  }
 0xe40   : > { %v9762_v19 = vpop.f32.mrf.mxu0  ;;  %v9768_v56 = vpop.f32.mrf.mxu1 }
 0xe41   : > { %v6588_v62 = vsel %vm6575_vm4, %v6571_v55, -inf  ;;  %v6594_v2 = vsel %vm6575_vm4, %v6573_v61, -inf }
 0xe42   : > { %v6563_v63 = vpop.f32.mrf.mxu1  ;;  %6589 = vmax.xlane.f32.xlu0 %v6588_v62  ;;  %v6516_v0 = vpop.f32.mrf.mxu0 }
 0xe43   : > { %v6572_v1 = vmul.f32 0.17677669, %v6516_v0  ;;  %v6574_v40 = vmul.f32 0.17677669, %v6563_v63 }
 0xe44   : > { %v9763_v32 = vpop.f32.mrf.mxu0  ;;  %v9769_v37 = vpop.f32.mrf.mxu1 }
 0xe45   : > { %v6591_v3 = vsel %vm6575_vm4, %v6572_v1, -inf  ;;  %v6597_v5 = vsel %vm6575_vm4, %v6574_v40, -inf }
 0xe46   : > { %6595 = vmax.xlane.f32.xlu0 %v6594_v2  ;;  %6592 = vmax.xlane.f32.xlu1 %v6591_v3 }
 0xe4a   : > { %6598 = vmax.xlane.f32.xlu1 %v6597_v5 }
 0xeab   : > { %v6578_v6 = vpop.xlane.xlu0 %6577 }
 0xeac   : > { %v6600_v53 = vsub.f32 %v6567_v33, %v6578_v6 }
 0xeae   : > { %v6608_v57 = vmul.f32 1.442695, %v6600_v53 }
 0xeaf   : > { %v6584_v59 = vpop.xlane.xlu0 %6583  ;;  %v6581_v7 = vpop.xlane.xlu1 %6580 }
 0xeb0   : > { %10369 = vpow2.f32 %v6608_v57  ;;  %v6602_v8 = vsub.f32 %v6569_v43, %v6584_v59  ;;  %v6601_v9 = vsub.f32 %v6568_v47, %v6581_v7  ;;  %v10209_v57 = vld [vmem:[%s11939_s18 + $0x28] sm:$0xff]  }
 0xeb2   : > { %v6612_v10 = vmul.f32 1.442695, %v6602_v8  ;;  %v6610_v11 = vmul.f32 1.442695, %v6601_v9 }
 0xeb3   : > { %v6587_v45 = vpop.xlane.xlu1 %6586 }
 0xeb4   : > { %10371 = vpow2.f32 %v6612_v10  ;;  %v6603_v12 = vsub.f32 %v6570_v50, %v6587_v45  ;;  %v10211_v45 = vld [vmem:[%s11939_s18 + $0x38] sm:$0xff]  }
 0xeb5   : > { %10373 = vpow2.f32 %v6610_v11 }
 0xeb6   : > { %v6614_v13 = vmul.f32 1.442695, %v6603_v12 }
 0xeb8   : > { %10375 = vpow2.f32 %v6614_v13  ;;  %v10210_v13 = vld [vmem:[%s11939_s18 + $0x20] sm:$0xff]  }
 0xebd   : > { %v10370_v54 = vpop.eup %10369 }
 0xebe   : > { %v6624_v58 = vsel %vm6575_vm4, %v10370_v54, 0.0 }
 0xebf   : > { %6625 = vadd.xlane.f32.xlu0 %v6624_v58 }
 0xec1   : > { %v10372_v60 = vpop.eup %10371 }
 0xec2   : > { %v10374_v14 = vpop.eup %10373  ;;  %v6630_v15 = vsel %vm6575_vm4, %v10372_v60, 0.0 }
 0xec3   : > { %v6648_v16 = vpack.c.bf16 %v10374_v14, %v10370_v54  ;;  %6631 = vadd.xlane.f32.xlu0 %v6630_v15  ;;  %v6627_v17 = vsel %vm6575_vm4, %v10374_v14, 0.0  ;;  %v10212_v54 = vld [vmem:[%s11939_s18 + $0x30] sm:$0xff]  }
 0xec4   : > { %6628 = vadd.xlane.f32.xlu1 %v6627_v17 }
 0xec5   : > { %v10376_v20 = vpop.eup %10375  ;;  %9773 = vmatmul.mubr.msk.bf16.vlgmr.msra.gmra.mxu0 %vm6575_vm4, %v6648_v16 }
 0xec6   : > { %v6649_v21 = vpack.c.bf16 %v10376_v20, %v10372_v60  ;;  %9783 = vmatpush3.bf16.msra.mxu0 %v11692_v35  ;;  %v6633_v23 = vsel %vm6575_vm4, %v10376_v20, 0.0  ;;  %9784 = vmatprep.mubr.msk.bf16.mxu0 %vm10517_vm0, %v10516_v4 }
 0xec7   : > { %9794 = vmatprep.subr.bf16.mxu0 %v10516_v4 }
 0xec8   : > { %6634 = vadd.xlane.f32.xlu1 %v6633_v23  ;;  %9779 = vmatmul.mubr.msk.bf16.vlgmr.msra.gmra.mxu1 %vm6575_vm4, %v6649_v21 }
 0xec9   : > { %9789 = vmatpush3.bf16.msra.mxu1 %v11695_v25  ;;  %9790 = vmatprep.mubr.msk.bf16.mxu1 %vm10517_vm0, %v10516_v4 }
 0xeca   : > { %9802 = vmatprep.subr.bf16.mxu1 %v10516_v4 }
 0xecb   : > { %v6590_v24 = vpop.xlane.xlu0 %6589 }
 0xecc   : > { %v6604_v26 = vsub.f32 %v6571_v55, %v6590_v24  ;;  %v10208_v55 = vld [vmem:[%s11939_s18 + $0x10] sm:$0xff]  }
 0xece   : > { %v6616_v35 = vmul.f32 1.442695, %v6604_v26 }
 0xecf   : > { %v6596_v39 = vpop.xlane.xlu0 %6595  ;;  %v6593_v27 = vpop.xlane.xlu1 %6592 }
 0xed0   : > { %10377 = vpow2.f32 %v6616_v35  ;;  %v6606_v28 = vsub.f32 %v6573_v61, %v6596_v39  ;;  %v6605_v29 = vsub.f32 %v6572_v1, %v6593_v27 }
 0xed2   : > { %v6620_v30 = vmul.f32 1.442695, %v6606_v28  ;;  %v6618_v33 = vmul.f32 1.442695, %v6605_v29 }
 0xed3   : > { %v6599_v34 = vpop.xlane.xlu1 %6598 }
 0xed4   : > { %10379 = vpow2.f32 %v6620_v30  ;;  %v6607_v41 = vsub.f32 %v6574_v40, %v6599_v34 }
 0xed5   : > { %10381 = vpow2.f32 %v6618_v33 }
 0xed6   : > { %v6622_v25 = vmul.f32 1.442695, %v6607_v41 }
 0xed8   : > { %10383 = vpow2.f32 %v6622_v25 }
 0xedd   : > { %v10378_v43 = vpop.eup %10377 }
 0xede   : > { %v6636_v42 = vsel %vm6575_vm4, %v10378_v43, 0.0 }
 0xedf   : > { %6637 = vadd.xlane.f32.xlu0 %v6636_v42 }
 0xee1   : > { %v10380_v44 = vpop.eup %10379 }
 0xee2   : > { %v10382_v46 = vpop.eup %10381  ;;  %v6642_v47 = vsel %vm6575_vm4, %v10380_v44, 0.0 }
 0xee3   : > { %v6650_v48 = vpack.c.bf16 %v10382_v46, %v10378_v43  ;;  %6643 = vadd.xlane.f32.xlu0 %v6642_v47  ;;  %v6639_v49 = vsel %vm6575_vm4, %v10382_v46, 0.0 }
 0xee4   : > { %6640 = vadd.xlane.f32.xlu1 %v6639_v49 }
 0xee5   : > { %v10384_v50 = vpop.eup %10383  ;;  %9785 = vmatmul.mubr.msk.bf16.vlgmr.msra.gmra.mxu0 %vm6575_vm4, %v6650_v48 }
 0xee6   : > { %v6651_v51 = vpack.c.bf16 %v10384_v50, %v10380_v44  ;;  %v6645_v52 = vsel %vm6575_vm4, %v10384_v50, 0.0  ;;  %9798 = vmatprep.mubr.msk.bf16.mxu0 %vm10517_vm0, %v10516_v4  ;;  %9795 = vmatpush3.bf16.msra.mxu0 %v10205_v31 }
 0xee7   : > { %9796 = vmatprep.subr.bf16.mxu0 %v10516_v4 }
 0xee8   : > { %6646 = vadd.xlane.f32.xlu1 %v6645_v52  ;;  %9791 = vmatmul.mubr.msk.bf16.vlgmr.msra.gmra.mxu1 %vm6575_vm4, %v6651_v51 }
 0xee9   : > { %9806 = vmatprep.mubr.msk.bf16.mxu1 %vm10517_vm0, %v10516_v4  ;;  %9803 = vmatpush3.bf16.msra.mxu1 %v10207_v38 }
 0xeea   : > { %9797 = vmatpush3.bf16.msra.mxu0 %v10206_v36  ;;  %9804 = vmatprep.subr.bf16.mxu1 %v10516_v4 }
 0xeeb   : > { %9810 = vmatprep.subr.bf16.mxu0 %v10516_v4 }
 0xeed   : > { %9805 = vmatpush3.bf16.msra.mxu1 %v10208_v55  ;;  %v8339_v55 = vld [vmem:[%s11940_s1] ss:$0 sm:$0xff]  ;;  %s11942_s1 = sld [smem:[#allocation20_spill]] }
 0xeee   : > { %9818 = vmatprep.subr.bf16.mxu1 %v10516_v4 }
 0xf48   : > { %v6626_v19 = vpop.xlane.xlu0 %6625 }
 0xf49   : > { %10385 = vrcp.f32 %v6626_v19 }
 0xf4c   : > { %v6632_v61 = vpop.xlane.xlu0 %6631 }
 0xf4d   : > { %v6629_v56 = vpop.xlane.xlu1 %6628 }
 0xf4e   : > { %10387 = vrcp.f32 %v6629_v56 }
 0xf4f   : > { %10389 = vrcp.f32 %v6632_v61 }
 0xf51   : > { %v6635_v62 = vpop.xlane.xlu1 %6634 }
 0xf52   : > { %10391 = vrcp.f32 %v6635_v62 }
 0xf56   : > { %v10386_v1 = vpop.eup %10385 }
 0xf5b   : > { %v10388_v37 = vpop.eup %10387 }
 0xf5c   : > { %v10390_v6 = vpop.eup %10389 }
 0xf5f   : > { %v10392_v59 = vpop.eup %10391 }
 0xf68   : > { %v6638_v58 = vpop.xlane.xlu0 %6637 }
 0xf69   : > { %10393 = vrcp.f32 %v6638_v58  ;;  %v10222_v58 = vld [vmem:[%s11941_s7 + $0xc8] ss:$16 sps:$4 sm:$0xff]  }
 0xf6c   : > { %v6644_v14 = vpop.xlane.xlu0 %6643 }
 0xf6d   : > { %v6641_v60 = vpop.xlane.xlu1 %6640 }
 0xf6e   : > { %10395 = vrcp.f32 %v6641_v60  ;;  %v10227_v60 = vld [vmem:[%s11941_s7 + $0xa4] ss:$16 sps:$4 sm:$0xff]  }
 0xf6f   : > { %10397 = vrcp.f32 %v6644_v14  ;;  %v10230_v14 = vld [vmem:[%s11941_s7 + $0xac] ss:$16 sps:$4 sm:$0xff]  }
 0xf71   : > { %v6647_v15 = vpop.xlane.xlu1 %6646 }
 0xf72   : > { %10399 = vrcp.f32 %v6647_v15  ;;  %v10225_v15 = vld [vmem:[%s11941_s7 + $0xa0] ss:$16 sps:$4 sm:$0xff]  }
 0xf76   : > { %v10394_v20 = vpop.eup %10393 }
 0xf7b   : > { %v10396_v23 = vpop.eup %10395 }
 0xf7c   : > { %v10398_v27 = vpop.eup %10397 }
 0xf7f   : > { %v10400_v28 = vpop.eup %10399 }
 0xf85   : > { %v6697_v63 = vpop.f32.mrf.mxu0 }
 0xf86   : > { %v6853_v2 = vmul.f32 %v10386_v1, %v6697_v63 }
 0xf87   : > { %v9774_v0 = vpop.f32.mrf.mxu0 }
 0xf88   : > { %v6744_v32 = vpop.f32.mrf.mxu1 }
 0xf89   : > { %v6700_v40 = vpop.f32.mrf.mxu0  ;;  %v6855_v9 = vmul.f32 %v10390_v6, %v6744_v32  ;;  %v10213_v6 = vld [vmem:[%s11941_s7 + $0xe0] ss:$16 sps:$4 sm:$0xff]  }
 0xf8a   : > { %v6854_v3 = vmul.f32 %v10388_v37, %v6700_v40  ;;  %v9780_v5 = vpop.f32.mrf.mxu1 }
 0xf8b   : > { %v9775_v53 = vpop.f32.mrf.mxu0 }
 0xf8c   : > { %v6861_v7 = vpack.c.bf16 %v6854_v3, %v6853_v2  ;;  %v6747_v8 = vpop.f32.mrf.mxu1  ;;  %v10215_v53 = vld [vmem:[%s11941_s7 + $0xe4] ss:$16 sps:$4 sm:$0xff]  }
 0xf8d   : > { %v6856_v10 = vmul.f32 %v10392_v59, %v6747_v8  ;;  %v10218_v59 = vld [vmem:[%s11941_s7 + $0xec] ss:$16 sps:$4 sm:$0xff]  }
 0xf8e   : > { %9799 = vmatmul.mubr.msk.bf16.vlgmr.msra.gmra.mxu0 %vm2292_vm1, %v6861_v7  ;;  %v9781_v11 = vpop.f32.mrf.mxu1 }
 0xf8f   : > { %v6862_v12 = vpack.c.bf16 %v6856_v10, %v6855_v9  ;;  %9811 = vmatpush3.bf16.msra.mxu0 %v10209_v57  ;;  %9814 = vmatprep.mubr.msk.bf16.mxu0 %vm10517_vm0, %v10516_v4  ;;  %v10216_v57 = vld [vmem:[%s11941_s7 + $0xe8] ss:$16 sps:$4 sm:$0xff]  }
 0xf90   : > { %9812 = vmatprep.subr.bf16.mxu0 %v10516_v4 }
 0xf91   : > { %9807 = vmatmul.mubr.msk.bf16.vlgmr.msra.gmra.mxu1 %vm2292_vm1, %v6862_v12  ;;  %v10221_v12 = vld [vmem:[%s11941_s7 + $0xc4] ss:$16 sps:$4 sm:$0xff]  }
 0xf92   : > { %9819 = vmatpush3.bf16.msra.mxu1 %v10211_v45  ;;  %9822 = vmatprep.mubr.msk.bf16.mxu1 %vm10517_vm0, %v10516_v4 }
 0xf93   : > { %9813 = vmatpush3.bf16.msra.mxu0 %v10210_v13  ;;  %9820 = vmatprep.subr.bf16.mxu1 %v10516_v4  ;;  %v10224_v13 = vld [vmem:[%s11941_s7 + $0xcc] ss:$16 sps:$4 sm:$0xff]  }
 0xf94   : > { %7377 = vmatprep.subr.bf16.mxu0 %v10215_v53  ;;  %v10266_v53 = vld [vmem:[%s11925_s4 + $0xf0] sm:$0xff]  }
 0xf96   : > { %9821 = vmatpush3.bf16.msra.mxu1 %v10212_v54  ;;  %v10219_v54 = vld [vmem:[%s11941_s7 + $0xc0] ss:$16 sps:$4 sm:$0xff]  }
 0xf97   : > { %7420 = vmatprep.subr.bf16.mxu1 %v10218_v59  ;;  %v10268_v59 = vld [vmem:[%s11925_s4 + $0xb0] sm:$0xff]  }
 0xfa5   : > { %v6791_v16 = vpop.f32.mrf.mxu0 }
 0xfa6   : > { %v6857_v26 = vmul.f32 %v10394_v20, %v6791_v16  ;;  %v10228_v16 = vld [vmem:[%s11941_s7 + $0xa8] ss:$16 sps:$4 sm:$0xff]   ;;  %v10236_v20 = vld [vmem:[%s11941_s7 + $0x8c] ss:$16 sps:$4 sm:$0xff]  }
 0xfa7   : > { %v9786_v17 = vpop.f32.mrf.mxu0 }
 0xfa8   : > { %v6838_v21 = vpop.f32.mrf.mxu1  ;;  %v10233_v17 = vld [vmem:[%s11941_s7 + $0x84] ss:$16 sps:$4 sm:$0xff]  }
 0xfa9   : > { %v6794_v24 = vpop.f32.mrf.mxu0  ;;  %v6859_v33 = vmul.f32 %v10398_v27, %v6838_v21  ;;  %v10231_v21 = vld [vmem:[%s11941_s7 + $0x80] ss:$16 sps:$4 sm:$0xff]   ;;  %v10245_v27 = vld [vmem:[%s11941_s7 + $0x44] ss:$16 sps:$4 sm:$0xff]  }
 0xfaa   : > { %v6858_v35 = vmul.f32 %v10396_v23, %v6794_v24  ;;  %v9792_v39 = vpop.f32.mrf.mxu1  ;;  %v10234_v23 = vld [vmem:[%s11941_s7 + $0x88] ss:$16 sps:$4 sm:$0xff]   ;;  %v10239_v24 = vld [vmem:[%s11941_s7 + $0x64] ss:$16 sps:$4 sm:$0xff]  }
 0xfab   : > { %v9787_v4 = vpop.f32.mrf.mxu0  ;;  %v10240_v39 = vld [vmem:[%s11941_s7 + $0x68] ss:$16 sps:$4 sm:$0xff]  }
 0xfac   : > { %v6863_v29 = vpack.c.bf16 %v6858_v35, %v6857_v26  ;;  %v6841_v30 = vpop.f32.mrf.mxu1  ;;  %v10242_v26 = vld [vmem:[%s11941_s7 + $0x6c] ss:$16 sps:$4 sm:$0xff]   ;;  %v10237_v35 = vld [vmem:[%s11941_s7 + $0x60] ss:$16 sps:$4 sm:$0xff]  }
 0xfad   : > { %v6860_v34 = vmul.f32 %v10400_v28, %v6841_v30  ;;  %v10248_v4 = vld [vmem:[%s11941_s7 + $0x4c] ss:$16 sps:$4 sm:$0xff]   ;;  %v10243_v28 = vld [vmem:[%s11941_s7 + $0x40] ss:$16 sps:$4 sm:$0xff]  }
 0xfae   : > { %9815 = vmatmul.mubr.msk.bf16.vlgmr.msra.gmra.mxu0 %vm2292_vm1, %v6863_v29  ;;  %v9793_v41 = vpop.f32.mrf.mxu1  ;;  %v10246_v29 = vld [vmem:[%s11941_s7 + $0x48] ss:$16 sps:$4 sm:$0xff]   ;;  %v10249_v30 = vld [vmem:[%s11941_s7 + $0x20] ss:$16 sps:$4 sm:$0xff]  }
 0xfaf   : > { %v6864_v25 = vpack.c.bf16 %v6860_v34, %v6859_v33  ;;  %7378 = vmatpush1.bf16.msra.mxu0 %v10213_v6  ;;  %v10251_v33 = vld [vmem:[%s11941_s7 + $0x24] ss:$16 sps:$4 sm:$0xff]   ;;  %v10252_v34 = vld [vmem:[%s11941_s7 + $0x28] ss:$16 sps:$4 sm:$0xff]   ;;  %v10254_v41 = vld [vmem:[%s11941_s7 + $0x2c] ss:$16 sps:$4 sm:$0xff]  }
 0xfb0   : > { %7379 = vmatprep.subr.bf16.mxu0 %v10221_v12  ;;  %v10265_v6 = vld [vmem:[%s11925_s4 + $0x70] sm:$0xff]   ;;  %v10277_v12 = vld [vmem:[%s11925_s4 + $0x58] sm:$0xff]  }
 0xfb1   : > { %9823 = vmatmul.mubr.msk.bf16.vlgmr.msra.gmra.mxu1 %vm2292_vm1, %v6864_v25  ;;  %v10257_v25 = vld [vmem:[%s11941_s7 + $0x4] ss:$16 sps:$4 sm:$0xff]  }
 0xfb2   : > { %7421 = vmatpush1.bf16.msra.mxu1 %v10216_v57  ;;  %v10267_v57 = vld [vmem:[%s11925_s4 + $0x30] sm:$0xff]  }
 0xfb3   : > { %7422 = vmatprep.subr.bf16.mxu1 %v10224_v13  ;;  %7380 = vmatpush1.bf16.msra.mxu0 %v10219_v54  ;;  %v10278_v13 = vld [vmem:[%s11925_s4 + $0xd8] sm:$0xff]  }
 0xfb4   : > { %7381 = vmatprep.subr.bf16.mxu0 %v10227_v60  ;;  %v10279_v54 = vld [vmem:[%s11925_s4 + $0x18] sm:$0xff]   ;;  %v10281_v60 = vld [vmem:[%s11925_s4 + $0x50] sm:$0xff]  }
 0xfb6   : > { %7423 = vmatpush1.bf16.msra.mxu1 %v10222_v58  ;;  %v10280_v58 = vld [vmem:[%s11925_s4 + $0x98] sm:$0xff]  }
 0xfb7   : > { %7424 = vmatprep.subr.bf16.mxu1 %v10230_v14  ;;  %7382 = vmatpush1.bf16.msra.mxu0 %v10225_v15  ;;  %v10282_v14 = vld [vmem:[%s11925_s4 + $0xd0] sm:$0xff]  }
 0xfb8   : > { %7383 = vmatprep.subr.bf16.mxu0 %v10233_v17  ;;  %v10283_v15 = vld [vmem:[%s11925_s4 + $0x10] sm:$0xff]   ;;  %v10285_v17 = vld [vmem:[%s11925_s4 + $0x48] sm:$0xff]  }
 0xfba   : > { %7425 = vmatpush1.bf16.msra.mxu1 %v10228_v16  ;;  %v10284_v16 = vld [vmem:[%s11925_s4 + $0x90] sm:$0xff]  }
 0xfbb   : > { %7426 = vmatprep.subr.bf16.mxu1 %v10236_v20  ;;  %7384 = vmatpush1.bf16.msra.mxu0 %v10231_v21  ;;  %v10286_v20 = vld [vmem:[%s11925_s4 + $0xc8] sm:$0xff]  }
 0xfbc   : > { %7385 = vmatprep.subr.bf16.mxu0 %v10239_v24  ;;  %v10287_v21 = vld [vmem:[%s11925_s4 + $0x8] sm:$0xff]   ;;  %v10289_v24 = vld [vmem:[%s11925_s4 + $0x40] sm:$0xff]  }
 0xfbe   : > { %7427 = vmatpush1.bf16.msra.mxu1 %v10234_v23  ;;  %v10288_v23 = vld [vmem:[%s11925_s4 + $0x88] sm:$0xff]  }
 0xfbf   : > { %7428 = vmatprep.subr.bf16.mxu1 %v10242_v26  ;;  %7386 = vmatpush1.bf16.msra.mxu0 %v10237_v35  ;;  %v10290_v26 = vld [vmem:[%s11925_s4 + $0xc0] sm:$0xff]  }
 0xfc0   : > { %7387 = vmatprep.subr.bf16.mxu0 %v10245_v27  ;;  %v10291_v35 = vld [vmem:[%s11925_s4] sm:$0xff]   ;;  %v7197_v27 = vlaneseq }
 0xfc2   : > { %7429 = vmatpush1.bf16.msra.mxu1 %v10240_v39  ;;  %v10292_v39 = vld [vmem:[%s11925_s4 + $0x80] sm:$0xff]  }
 0xfc3   : > { %7430 = vmatprep.subr.bf16.mxu1 %v10248_v4  ;;  %7388 = vmatpush1.bf16.msra.mxu0 %v10243_v28  ;;  %v7198_v4 = vshrl.u32 %v7197_v27, 7 }
 0xfc4   : > { %7389 = vmatprep.subr.bf16.mxu0 %v10251_v33 }
 0xfc5   : > { %v7199_v28 = vsub.s32 0, %v7198_v4  ;;  %v7203_v33 = vsub.s32 1, %v7198_v4 }
 0xfc6   : > { %7431 = vmatpush1.bf16.msra.mxu1 %v10246_v29  ;;  %v7207_v29 = vsub.s32 2, %v7198_v4 }
 0xfc7   : > { %7432 = vmatprep.subr.bf16.mxu1 %v10254_v41  ;;  %7390 = vmatpush1.bf16.msra.mxu0 %v10249_v30  ;;  %v7195_v30 = vld [vmem:[%s10670_s27] sm:$0xf] }
 0xfc8   : > { %7391 = vmatprep.subr.bf16.mxu0 %v10257_v25  ;;  %v7200_v41 = vrot.slane %v7195_v30, %v7199_v28  ;;  %v7208_v25 = vrot.slane %v7195_v30, %v7207_v29 }
 0xfca   : > { %7433 = vmatpush1.bf16.msra.mxu1 %v10252_v34  ;;  %v7211_v34 = vsub.s32 3, %v7198_v4 }
0x104e   : > { %v6930_v43 = vpop.f32.mrf.mxu0 }
0x1050   : > { %v9800_v42 = vpop.f32.mrf.mxu0 }
0x1051   : > { %v6986_v44 = vpop.f32.mrf.mxu1  ;;  %v10255_v42 = vld [vmem:[%s11941_s7] ss:$16 sps:$4 sm:$0xff]  }
0x1052   : > { %v6933_v46 = vpop.f32.mrf.mxu0  ;;  %v7105_v51 = vadd.f32 %v6986_v44, %v6930_v43  ;;  %v10260_v43 = vld [vmem:[%s11941_s7 + $0xc] ss:$16 sps:$4 sm:$0xff]   ;;  %v10258_v44 = vld [vmem:[%s11941_s7 + $0x8] ss:$16 sps:$4 sm:$0xff]   ;;  %7392 = vmatpush1.bf16.msra.mxu0 %v10255_v42  ;;  %s11847_s7 = scalar_lea.hbm %s10685_s17, %s8413_s6 }
0x1053   : > { %v9808_v47 = vpop.f32.mrf.mxu1  ;;  %7434 = vmatprep.subr.bf16.mxu1 %v10260_v43 }
0x1054   : > { %v9801_v48 = vpop.f32.mrf.mxu0  ;;  %7435 = vmatpush1.bf16.msra.mxu1 %v10258_v44  ;;  %v7204_v44 = vrot.slane %v7195_v30, %v7203_v33 }
0x1055   : > { %v6989_v49 = vpop.f32.mrf.mxu1 }
0x1056   : > { %v7108_v19 = vadd.f32 %v6989_v49, %v6933_v46  ;;  %v10518_v46 = vmov 0  }
0x1057   : > { %v9809_v50 = vpop.f32.mrf.mxu1  ;;  %7409 = vmatprep.mubr.bf16.mxu0 %v10518_v46  ;;  %7452 = vmatprep.mubr.bf16.mxu1 %v10518_v46  ;;  %v7212_v46 = vrot.slane %v7195_v30, %v7211_v34 }
0x106e   : > { %v7042_v52 = vpop.f32.mrf.mxu0 }
0x106f   : > { %v7106_v31 = vadd.f32 %v7105_v51, %v7042_v52 }
0x1070   : > { %v9816_v36 = vpop.f32.mrf.mxu0 }
0x1071   : > { %v7098_v38 = vpop.f32.mrf.mxu1 }
0x1072   : > { %v7045_v56 = vpop.f32.mrf.mxu0  ;;  %v7107_v61 = vadd.f32 %v7106_v31, %v7098_v38  ;;  %v8340_v38 = vld [vmem:[%s11942_s1] ss:$0 sm:$0xff] }
0x1073   : > { %v9824_v62 = vpop.f32.mrf.mxu1  ;;  %v7109_v63 = vadd.f32 %v7108_v19, %v7045_v56 }
0x1074   : > { %v7118_v0 = vadd.f32 %v8339_v55, %v7107_v61  ;;  %v9817_v1 = vpop.f32.mrf.mxu0  ;;  %v8341_v61 = vld [vmem:[%s11943_s3] ss:$0 sm:$0xff]  ;;  %s962_s3 = sand.u32 1, %s10475_s23  }
0x1075   : > { %v7101_v32 = vpop.f32.mrf.mxu1  ;;  %s7979_s1 = sshll.u32 %s962_s3, 4  ;;  %s11849_s8 = scalar_lea.sflag [#allocation3], %s962_s3 }
0x1076   : > { %v7110_v37 = vadd.f32 %v7109_v63, %v7101_v32  ;;  %v11753_v40 = vadd.f32 %v7118_v0, %v11428_v18  ;;  %v10261_v32 = vld [vmem:[%s11925_s4 + $0x78] sm:$0xff]  }
0x1077   : > { %v9825_v2 = vpop.f32.mrf.mxu1  ;;  %8822 = vmatprep.subr.bf16.mxu0 %v10261_v32 }
0x1078   : > { %v7119_v3 = vadd.f32 %v8339_v55, %v7110_v37  ;;  %7124 = vadd.xlane.f32.xlu0 %v11753_v40  ;;  %v10262_v37 = vld [vmem:[%s11925_s4 + $0xf8] sm:$0xff]  }
0x1079   : > { %v10263_v2 = vld [vmem:[%s11925_s4 + $0x38] sm:$0xff]   ;;  %8844 = vmatprep.subr.bf16.mxu1 %v10262_v37 }
0x107a   : > { %v11757_v5 = vadd.f32 %v7119_v3, %v11432_v22  ;;  %v10264_v3 = vld [vmem:[%s11925_s4 + $0xb8] sm:$0xff]  }
0x107c   : > { %7126 = vadd.xlane.f32.xlu1 %v11757_v5 }
0x1101   : > { %v7125_v18 = vpop.xlane.xlu0 %7124 }
0x1102   : > { %v7128_v7 = vmul.f32 0.0078125, %v7125_v18  ;;  %v10269_v18 = vld [vmem:[%s11925_s4 + $0x68] sm:$0xff]  }
0x1104   : > { %v11765_v8 = vsub.f32 %v11753_v40, %v7128_v7  ;;  %v10270_v7 = vld [vmem:[%s11925_s4 + $0xe8] sm:$0xff]  }
0x1105   : > { %v7127_v22 = vpop.xlane.xlu1 %7126 }
0x1106   : > { %v7129_v9 = vmul.f32 0.0078125, %v7127_v22  ;;  %v7132_v10 = vmul.f32 %v11765_v8, %v11765_v8  ;;  %v10272_v22 = vld [vmem:[%s11925_s4 + $0xa8] sm:$0xff]  }
0x1108   : > { %v11770_v11 = vsub.f32 %v11757_v5, %v7129_v9  ;;  %7134 = vadd.xlane.f32.xlu0 %v7132_v10  ;;  %v10273_v9 = vld [vmem:[%s11925_s4 + $0x60] sm:$0xff]  }
0x1109   : > { %v10274_v10 = vld [vmem:[%s11925_s4 + $0xe0] sm:$0xff]  }
0x110a   : > { %v7133_v45 = vmul.f32 %v11770_v11, %v11770_v11 }
0x110c   : > { %7136 = vadd.xlane.f32.xlu1 %v7133_v45  ;;  %v10276_v45 = vld [vmem:[%s11925_s4 + $0xa0] sm:$0xff]  }
0x1191   : > { %v7135_v47 = vpop.xlane.xlu0 %7134 }
0x1192   : > { %v7138_v48 = vmul.f32 0.0078125, %v7135_v47 }
0x1194   : > { %v7140_v49 = vadd.f32 1e-05, %v7138_v48 }
0x1195   : > { %v7137_v50 = vpop.xlane.xlu1 %7136 }
0x1196   : > { %10401 = vrsqrt.f32 %v7140_v49  ;;  %v7139_v51 = vmul.f32 0.0078125, %v7137_v50 }
0x1198   : > { %v7141_v52 = vadd.f32 1e-05, %v7139_v51 }
0x119a   : > { %10403 = vrsqrt.f32 %v7141_v52 }
0x11a3   : > { %v10402_v31 = vpop.eup %10401 }
0x11a4   : > { %v7144_v36 = vmul.f32 %v10402_v31, %v11765_v8  ;;  %v10271_v8 = vld [vmem:[%s11925_s4 + $0x28] sm:$0xff]  }
0x11a6   : > { %v7152_v56 = vmul.f32 %v8340_v38, %v7144_v36 }
0x11a7   : > { %v10404_v55 = vpop.eup %10403 }
0x11a8   : > { %v7145_v19 = vmul.f32 %v10404_v55, %v11770_v11  ;;  %v7160_v63 = vadd.f32 %v8341_v61, %v7152_v56  ;;  %v10275_v11 = vld [vmem:[%s11925_s4 + $0x20] sm:$0xff]   ;;  %s964_s4 = scalar_lea.vmem [#allocation2], %s7979_s1  ;;  %s10427_s1 = sshll.u32 %s10519_s0, 4  ;;  %s10428_s1 = int_to_ptr.vmem [resolvable:$false] %s10427_s1 }
0x11a9   : > { %s7870_s5 = sshll.u32 %s964_s4, 4  ;;  %s10429_s10 = scalar_lea.vmem %s10428_s1, 512  ;;  %s11843_s5 = int_to_ptr.vmem [resolvable:$true] %s7870_s5 }
0x11aa   : > { %v7153_v62 = vmul.f32 %v8340_v38, %v7145_v19  ;;  %p10430_p0 = scmp.lt.s32.totalorder %s11843_s5, %s10428_s1 }
0x11ac   : > { %v7161_v0 = vadd.f32 %v8341_v61, %v7153_v62 }
0x11ae   : > { %v7162_v1 = vpack.c.bf16 %v7161_v0, %v7160_v63 }
0x11b0   : > { %7410 = vmatmul.mubr.bf16.vlgmr.msra.gmra.mxu0 %v7162_v1  ;;  %7453 = vmatmul.mubr.bf16.vlgmr.msra.gmra.mxu1 %v7162_v1 }
0x11b1   : > { %8823 = vmatpush3.bf16.msra.mxu0 %v10263_v2  ;;  %8845 = vmatpush3.bf16.msra.mxu1 %v10264_v3 }
0x11b2   : > { %8824 = vmatprep.subr.bf16.mxu0 %v10265_v6  ;;  %8846 = vmatprep.subr.bf16.mxu1 %v10266_v53 }
0x11b5   : > { %8825 = vmatpush3.bf16.msra.mxu0 %v10267_v57  ;;  %8847 = vmatpush3.bf16.msra.mxu1 %v10268_v59 }
0x11b6   : > { %8826 = vmatprep.subr.bf16.mxu0 %v10269_v18  ;;  %8848 = vmatprep.subr.bf16.mxu1 %v10270_v7 }
0x11b9   : > { %8827 = vmatpush3.bf16.msra.mxu0 %v10271_v8  ;;  %8849 = vmatpush3.bf16.msra.mxu1 %v10272_v22 }
0x11ba   : > { %8828 = vmatprep.subr.bf16.mxu0 %v10273_v9  ;;  %8850 = vmatprep.subr.bf16.mxu1 %v10274_v10 }
0x11bd   : > { %8829 = vmatpush3.bf16.msra.mxu0 %v10275_v11  ;;  %8851 = vmatpush3.bf16.msra.mxu1 %v10276_v45 }
0x11be   : > { %8830 = vmatprep.subr.bf16.mxu0 %v10277_v12  ;;  %8852 = vmatprep.subr.bf16.mxu1 %v10278_v13 }
0x11c1   : > { %8831 = vmatpush3.bf16.msra.mxu0 %v10279_v54  ;;  %8853 = vmatpush3.bf16.msra.mxu1 %v10280_v58 }
0x11c2   : > { %8832 = vmatprep.subr.bf16.mxu0 %v10281_v60  ;;  %8854 = vmatprep.subr.bf16.mxu1 %v10282_v14 }
0x11c5   : > { %8833 = vmatpush3.bf16.msra.mxu0 %v10283_v15  ;;  %8855 = vmatpush3.bf16.msra.mxu1 %v10284_v16 }
0x11c6   : > { %8834 = vmatprep.subr.bf16.mxu0 %v10285_v17  ;;  %8856 = vmatprep.subr.bf16.mxu1 %v10286_v20 }
0x11c9   : > { %8835 = vmatpush3.bf16.msra.mxu0 %v10287_v21  ;;  %8857 = vmatpush3.bf16.msra.mxu1 %v10288_v23 }
0x11ca   : > { %8836 = vmatprep.subr.bf16.mxu0 %v10289_v24  ;;  %8858 = vmatprep.subr.bf16.mxu1 %v10290_v26 }
0x11cd   : > { %8837 = vmatpush3.bf16.msra.mxu0 %v10291_v35  ;;  %8859 = vmatpush3.bf16.msra.mxu1 %v10292_v39 }
0x1270   : > { %v7411_v43 = vpop.f32.mrf.mxu0  ;;  %v7454_v42 = vpop.f32.mrf.mxu1 }
0x1271   : > { %v7412_v47 = vadd.f32 %v7411_v43, %v7200_v41  ;;  %v7455_v48 = vadd.f32 %v7454_v42, %v7208_v25 }
0x1272   : > { %v7413_v49 = vpop.f32.mrf.mxu0  ;;  %v7456_v50 = vpop.f32.mrf.mxu1 }
0x1273   : > { %v7471_v51 = vmul.f32 0.70710677, %v7412_v47  ;;  %v7473_v52 = vmul.f32 0.70710677, %v7455_v48  ;;  %v7414_v31 = vadd.f32 %v7413_v49, %v7204_v44  ;;  %v7457_v36 = vadd.f32 %v7456_v50, %v7212_v46 }
0x1274   : > { %v7415_v38 = vpop.f32.mrf.mxu0  ;;  %v7458_v55 = vpop.f32.mrf.mxu1  ;;  %v7463_v22 = vmul.f32 0.5, %v7412_v47  ;;  %v7465_v26 = vmul.f32 0.5, %v7455_v48 }
0x1275   : > { %v7416_v19 = vadd.f32 %v7415_v38, %v7200_v41  ;;  %v7459_v56 = vadd.f32 %v7458_v55, %v7208_v25  ;;  %10405 = verf.f32 %v7471_v51  ;;  %v7472_v61 = vmul.f32 0.70710677, %v7414_v31 }
0x1276   : > { %v7417_v62 = vpop.f32.mrf.mxu0  ;;  %v7460_v63 = vpop.f32.mrf.mxu1  ;;  %10407 = verf.f32 %v7473_v52  ;;  %v7474_v0 = vmul.f32 0.70710677, %v7457_v36  ;;  %v7464_v9 = vmul.f32 0.5, %v7414_v31  ;;  %v7466_v20 = vmul.f32 0.5, %v7457_v36 }
0x1277   : > { %v7475_v1 = vmul.f32 0.70710677, %v7416_v19  ;;  %10409 = verf.f32 %v7472_v61  ;;  %v7477_v32 = vmul.f32 0.70710677, %v7459_v56  ;;  %v7418_v37 = vadd.f32 %v7417_v62, %v7204_v44  ;;  %v8374_v44 = vld [vmem:[%s11944_s9] ss:$0 sm:$0xff] }
0x1278   : > { %v7461_v2 = vadd.f32 %v7460_v63, %v7212_v46  ;;  %10411 = verf.f32 %v7474_v0  ;;  %v7467_v54 = vmul.f32 0.5, %v7416_v19  ;;  %v7469_v15 = vmul.f32 0.5, %v7459_v56  ;;  %s10423_s9 = scalar_lea.vmem %s11843_s5, 256 }
0x1279   : > { %10413 = verf.f32 %v7475_v1  ;;  %v7476_v3 = vmul.f32 0.70710677, %v7418_v37  ;;  %v7468_v16 = vmul.f32 0.5, %v7418_v37  ;;  %p10424_p11 = scmp.ne.s32.totalorder %s11843_s5, %s10423_s9  ;;  %p10431_p1 = scmp.lt.s32.totalorder %s10429_s10, %s10423_s9 }
0x127a   : > { %10415 = verf.f32 %v7477_v32  ;;  %v7478_v6 = vmul.f32 0.70710677, %v7461_v2  ;;  %v7470_v23 = vmul.f32 0.5, %v7461_v2 }
0x127b   : > { %10417 = verf.f32 %v7476_v3  ;;  %p10425_p12 = pnand %p10424_p11, %p10725_p5  ;;  %p10432_p2 = por %p10431_p1, %p10430_p0 }
0x127c   : > { %10419 = verf.f32 %v7478_v6 }
0x127d   : > { %p10426_p13 = pneg %p10425_p12 }
0x127f   : > { %p10433_p3 = pnand %p10432_p2, %p10426_p13 }
0x1282   : > { %v10406_v53 = vpop.eup %10405 }
0x1283   : > { %v10408_v57 = vpop.eup %10407  ;;  %v7487_v12 = vadd.f32 1.0, %v10406_v53 }
0x1284   : > { %v10410_v59 = vpop.eup %10409  ;;  %v7489_v14 = vadd.f32 1.0, %v10408_v57 }
0x1285   : > { %v10412_v18 = vpop.eup %10411  ;;  %v7488_v10 = vadd.f32 1.0, %v10410_v59  ;;  %v7495_v4 = vmul.f32 %v7487_v12, %v7463_v22 }
0x1286   : > { %v10414_v7 = vpop.eup %10413  ;;  %v7490_v13 = vadd.f32 1.0, %v10412_v18  ;;  %v7497_v30 = vmul.f32 %v7489_v14, %v7465_v26 }
0x1287   : > { %v10416_v8 = vpop.eup %10415  ;;  %v7491_v11 = vadd.f32 1.0, %v10414_v7  ;;  %v7496_v35 = vmul.f32 %v7488_v10, %v7464_v9 }
0x1288   : > { %v10418_v45 = vpop.eup %10417  ;;  %v7493_v58 = vadd.f32 1.0, %v10416_v8  ;;  %v7498_v28 = vmul.f32 %v7490_v13, %v7466_v20 }
0x1289   : > { %v10420_v60 = vpop.eup %10419  ;;  %v7492_v17 = vadd.f32 1.0, %v10418_v45  ;;  %v7499_v21 = vmul.f32 %v7491_v11, %v7467_v54 }
0x128a   : > { %v7494_v24 = vadd.f32 1.0, %v10420_v60  ;;  %v7501_v39 = vmul.f32 %v7493_v58, %v7469_v15 }
0x128b   : > { %v7500_v27 = vmul.f32 %v7492_v17, %v7468_v16  ;;  %v7503_v34 = vpack.c.bf16 %v7499_v21, %v7495_v4 }
0x128c   : > { %v7502_v29 = vmul.f32 %v7494_v24, %v7470_v23  ;;  %v7505_v25 = vpack.c.bf16 %v7501_v39, %v7497_v30 }
0x128d   : > { %v7504_v33 = vpack.c.bf16 %v7500_v27, %v7496_v35 }
0x128e   : > { %v7506_v41 = vpack.c.bf16 %v7502_v29, %v7498_v28 }
0x128f   : > { %7802 = vmatprep.mubr.bf16.mxu0 %v7504_v33 }
0x1290   : > { %7843 = vmatprep.mubr.bf16.mxu1 %v7506_v41  ;;  %7803 = vmatmul.mubr.bf16.vlgmr.msra.gmra.mxu0 %v7503_v34 }
0x1291   : > { %7844 = vmatmul.mubr.bf16.vlgmr.msra.gmra.mxu1 %v7505_v25 }
0x1350   : > { %v8838_v43 = vpop.f32.mrf.mxu0 }
0x1351   : > { %v8860_v42 = vpop.f32.mrf.mxu1 }
0x1352   : > { %v8839_v46 = vpop.f32.mrf.mxu0 }
0x1353   : > { %v8840_v47 = vadd.f32 %v8839_v46, %v8838_v43  ;;  %v8861_v48 = vpop.f32.mrf.mxu1 }
0x1354   : > { %v8841_v49 = vpop.f32.mrf.mxu0  ;;  %v8862_v51 = vadd.f32 %v8861_v48, %v8860_v42 }
0x1355   : > { %v7805_v50 = vadd.f32 %v8840_v47, %v8374_v44  ;;  %v8863_v52 = vpop.f32.mrf.mxu1 }
0x1356   : > { %v8842_v31 = vpop.f32.mrf.mxu0 }
0x1357   : > { %v7846_v36 = vadd.f32 %v8862_v51, %v7805_v50  ;;  %v8843_v38 = vadd.f32 %v8842_v31, %v8841_v49  ;;  %v8864_v55 = vpop.f32.mrf.mxu1 }
0x1358   : > { %v8865_v61 = vadd.f32 %v8864_v55, %v8863_v52 }
0x1359   : > { %v7852_v19 = vadd.f32 %v7846_v36, %v11753_v40  ;;  %v7808_v56 = vadd.f32 %v8843_v38, %v8374_v44 }
0x135b   : > { %7854 = vst [vmem:[%s964_s4] sm:$0xff] %v7852_v19  ;;  %v7849_v62 = vadd.f32 %v8865_v61, %v7808_v56 }
0x135d   : > { %v7853_v63 = vadd.f32 %v7849_v62, %v11757_v5 }
0x135f   : > { %7855 = vst [vmem:[%s964_s4 + $0x8] sm:$0xff] %v7853_v63 }
0x1360   : > { %10436 = shalt.err (!%p10433_p3)
}
0x1361   : > { %s10437_s6 = scalar_lea.hbm %s11847_s7, 256  ;;  %s10441_s4 = scalar_lea.hbm %s10685_s17, 512 }
0x1362   : > { %p10438_p4 = scmp.ne.s32.totalorder %s11847_s7, %s10437_s6  ;;  %p10442_p9 = scmp.lt.s32.totalorder %s11847_s7, %s10685_s17 }
0x1363   : > { %p10443_p10 = scmp.lt.s32.totalorder %s10441_s4, %s10437_s6 }
0x1364   : > { %p10439_p7 = pnand %p10438_p4, %p10725_p5 }
0x1365   : > { %p10444_p11 = por %p10443_p10, %p10442_p9 }
0x1366   : > { %p10440_p8 = pneg %p10439_p7 }
0x1368   : > { %p10445_p12 = pnand %p10444_p11, %p10440_p8 }
0x136a   : > { %10448 = shalt.err (!%p10445_p12)
}
0x136b   : > { %s10520_s9 = smov 128   ;;  %s10521_s10 = smov 8  }
0x136c   : > { %9826 = dma.vmem_to_hbm [thread:$0]  (%p10725_p5), %s11843_s5, 256, %s11847_s7, %s11849_s8, %s10520_s9, %s10520_s9, %s10521_s10  }
0x136d PF: > { %p9832_p13 = scmp.ge.s32.totalorder %s10483_s28, 2  ;;  %s7885_s3 = sand.u32 1, %s10471_s22  }
0x136e   : > { %s7886_s0 = scalar_lea.sflag [#allocation3], %s7885_s3 }
0x136f   : > { %p9829_p0 = pnand %p9832_p13, %p10729_p6 }
0x1371   : > { %p9830_p1 = pneg %p9829_p0 }
0x1373   : > { %10466 = dma.done.wait (%p9830_p1), %s7886_s0, 256  }
0x1374   : > { %10468 = vsyncadd (%p9830_p1), %s7886_s0, 4294967040  ;;  %p73_p2 = scmp.ge.s32.totalorder %s10712_s2, 4   ;;  %s11945_s22 = smov %s10475_s23 }
0x1375   : > { %s11946_s23 = smov %s10479_s26  ;;  %s11947_s26 = smov %s10723_s11 }
0x1376   : > { %s11948_s28 = smov %s10712_s2  ;;  %75 = sbr.rel (!%p73_p2) target bundleno = 62 (0x3e), region = 213 }
0x137b   :  { %7891 = vsyncpa [#allocation3], 1 }
0x137c   :  { %7893 = vsyncpa [#allocation3 + $0x1], 1 }

</bundles_post_ra>
